<compile_context>
chip_gen: v7x
topology: tpu7x:2x2x1
jax: 0.10.0
libtpu: 0.0.40
codegen_flags: <defaults>
</compile_context>

<pallas_src>
import jax
import jax.numpy as jnp
from jax.experimental import pallas as pl
from jax.experimental.pallas import tpu as pltpu

# MLP dims from the module definition
D_IN, D1, D2, D3, D_OUT = 32, 128, 256, 512, 768


def decoder_kernel(x_ref,
                   w1_ref, b1_ref,
                   w2_ref, b2_ref,
                   w3_ref, b3_ref,
                   w4_ref, b4_ref,
                   o_ref):
    # Fused 4-layer MLP on one row-tile.
    # bf16 MXU operands, f32 accumulation (preferred_element_type).
    # Bias add / ReLU in f32 post-accumulation; cast back to bf16 only at the
    # next MXU input (keeps v5e off bf16 VPU paths).
    x = x_ref[...].astype(jnp.bfloat16)

    h = jnp.dot(x, w1_ref[...], preferred_element_type=jnp.float32) + b1_ref[...]
    h = jnp.maximum(h, 0.0)

    h = jnp.dot(h.astype(jnp.bfloat16), w2_ref[...],
                preferred_element_type=jnp.float32) + b2_ref[...]
    h = jnp.maximum(h, 0.0)

    h = jnp.dot(h.astype(jnp.bfloat16), w3_ref[...],
                preferred_element_type=jnp.float32) + b3_ref[...]
    h = jnp.maximum(h, 0.0)

    h = jnp.dot(h.astype(jnp.bfloat16), w4_ref[...],
                preferred_element_type=jnp.float32) + b4_ref[...]

    o_ref[...] = h.astype(o_ref.dtype)


def decoder_forward(x, params, *, tm=256):
    """x: [B, 32] float32. params: dict of w1..w4 ([in,out]) and b1..b4 ([1,out]).

    Returns [B, 768] float32. tm=256 keeps the double-buffered VMEM footprint
    (~5 MiB at bf16 weights) well inside even v7x's 32 MiB scoped budget while
    fully filling the MXU rows; batches that are not a multiple of tm are
    zero-padded in the wrapper and sliced back afterwards.
    """
    B, d_in = x.shape
    assert d_in == D_IN

    # Pad the batch to a multiple of tm instead of forcing a tiny row tile.
    grid_b = pl.cdiv(B, tm)
    Bp = grid_b * tm
    if Bp != B:
        x = jnp.pad(x, ((0, Bp - B), (0, 0)))

    # bf16 weights (halves weight DMA + VMEM); biases in f32 (added post-accum).
    w = lambda k: params[k].astype(jnp.bfloat16)
    b = lambda k: params[k].astype(jnp.float32)

    # Constant-index operands: fully resident in VMEM, single-buffered
    # (no per-grid-step re-DMA, half the buffer footprint).
    def resident(shape):
        return pl.BlockSpec(shape, lambda i: (0, 0), pipeline_mode=pl.Buffered(1))

    grid_spec = pltpu.PrefetchScalarGridSpec(
        num_scalar_prefetch=0,
        grid=(grid_b,),
        in_specs=[
            pl.BlockSpec((tm, D_IN), lambda i: (i, 0)),   # x row tile
            resident((D_IN, D1)),  resident((1, D1)),
            resident((D1, D2)),    resident((1, D2)),
            resident((D2, D3)),    resident((1, D3)),
            resident((D3, D_OUT)), resident((1, D_OUT)),
        ],
        out_specs=pl.BlockSpec((tm, D_OUT), lambda i: (i, 0)),  # lane-dense 768-wide
    )

    out = pl.pallas_call(
        decoder_kernel,
        out_shape=jax.ShapeDtypeStruct((Bp, D_OUT), jnp.float32),
        grid_spec=grid_spec,
        compiler_params=pltpu.CompilerParams(
            dimension_semantics=("parallel",)),  # shards row tiles across v7x's 2 TCs
    )(x, w("w1"), b("b1"), w("w2"), b("b2"),
      w("w3"), b("b3"), w("w4"), b("b4"))

    return out[:B]


def init_params(key):
    """Deterministic init mimicking nn.Linear's U(-1/sqrt(fan_in), 1/sqrt(fan_in)).

    Stored in f32 (reference precision); decoder_forward casts weights to bf16.
    """
    dims = [(D_IN, D1), (D1, D2), (D2, D3), (D3, D_OUT)]
    params = {}
    for idx, (fin, fout) in enumerate(dims, start=1):
        key, kw, kb = jax.random.split(key, 3)
        bound = 1.0 / jnp.sqrt(jnp.float32(fin))
        params[f"w{idx}"] = jax.random.uniform(
            kw, (fin, fout), jnp.float32, minval=-bound, maxval=bound)
        params[f"b{idx}"] = jax.random.uniform(
            kb, (1, fout), jnp.float32, minval=-bound, maxval=bound)
    return params


def reference_forward(x, params):
    h = jnp.maximum(x @ params["w1"] + params["b1"], 0.0)
    h = jnp.maximum(h @ params["w2"] + params["b2"], 0.0)
    h = jnp.maximum(h @ params["w3"] + params["b3"], 0.0)
    return h @ params["w4"] + params["b4"]


if __name__ == "__main__":
    key = jax.random.PRNGKey(0)
    key, kx = jax.random.split(key)
    params = init_params(key)

    # B=512 with tm=256 -> 2 grid steps, so both v7x TensorCores get work.
    B = 512
    x = jax.random.normal(kx, (B, D_IN), jnp.float32)

    out = jax.block_until_ready(decoder_forward(x, params))
    ref = reference_forward(x, params)
    assert out.shape == (B, D_OUT)
    # bf16 matmul inputs + f32 accumulation -> ~1e-2-level error vs f32 reference.
    max_rel = jnp.max(jnp.abs(out - ref)) / (jnp.max(jnp.abs(ref)) + 1e-6)
    assert max_rel < 5e-2, f"mismatch vs JAX reference: max_rel={max_rel}"

    # Exercise the pad path (batch not a multiple of tm).
    x_odd = jax.random.normal(jax.random.PRNGKey(1), (100, D_IN), jnp.float32)
    out_odd = jax.block_until_ready(decoder_forward(x_odd, params))
    ref_odd = reference_forward(x_odd, params)
    assert out_odd.shape == (100, D_OUT)
    max_rel_odd = jnp.max(jnp.abs(out_odd - ref_odd)) / (jnp.max(jnp.abs(ref_odd)) + 1e-6)
    assert max_rel_odd < 5e-2, f"mismatch on padded batch: max_rel={max_rel_odd}"

    print("KERNEL_OK")
</pallas_src>

<mosaic_0001>
module attributes {stable_mosaic.version = 11 : i64} {
  func.func @decoder_kernel(%arg0: i32, %arg1: memref<256x32xf32, #tpu.memory_space<vmem>>, %arg2: memref<32x128xbf16, #tpu.memory_space<vmem>>, %arg3: memref<1x128xf32, #tpu.memory_space<vmem>>, %arg4: memref<128x256xbf16, #tpu.memory_space<vmem>>, %arg5: memref<1x256xf32, #tpu.memory_space<vmem>>, %arg6: memref<256x512xbf16, #tpu.memory_space<vmem>>, %arg7: memref<1x512xf32, #tpu.memory_space<vmem>>, %arg8: memref<512x768xbf16, #tpu.memory_space<vmem>>, %arg9: memref<1x768xf32, #tpu.memory_space<vmem>>, %arg10: memref<256x768xf32, #tpu.memory_space<vmem>>) attributes {dimension_semantics = [#tpu.dimension_semantics<parallel>], iteration_bounds = array<i64: 2>, scalar_prefetch = 0 : i64, scratch_operands = 0 : i64, tpu.core_type = #tpu.core_type<tc>, window_params = [{transform_indices = @transform_0, window_bounds = array<i64: 256, 32>}, {pipeline_mode = #tpu.pipeline_mode<synchronous>, transform_indices = @transform_1, window_bounds = array<i64: 32, 128>}, {pipeline_mode = #tpu.pipeline_mode<synchronous>, transform_indices = @transform_2, window_bounds = array<i64: 1, 128>}, {pipeline_mode = #tpu.pipeline_mode<synchronous>, transform_indices = @transform_3, window_bounds = array<i64: 128, 256>}, {pipeline_mode = #tpu.pipeline_mode<synchronous>, transform_indices = @transform_4, window_bounds = array<i64: 1, 256>}, {pipeline_mode = #tpu.pipeline_mode<synchronous>, transform_indices = @transform_5, window_bounds = array<i64: 256, 512>}, {pipeline_mode = #tpu.pipeline_mode<synchronous>, transform_indices = @transform_6, window_bounds = array<i64: 1, 512>}, {pipeline_mode = #tpu.pipeline_mode<synchronous>, transform_indices = @transform_7, window_bounds = array<i64: 512, 768>}, {pipeline_mode = #tpu.pipeline_mode<synchronous>, transform_indices = @transform_8, window_bounds = array<i64: 1, 768>}, {transform_indices = @transform_9, window_bounds = array<i64: 256, 768>}]} {
    %c0 = arith.constant 0 : index
    %c0_0 = arith.constant 0 : index
    %0 = vector.load %arg1[%c0, %c0_0] : memref<256x32xf32, #tpu.memory_space<vmem>>, vector<256x32xf32>
    %1 = arith.truncf %0 : vector<256x32xf32> to vector<256x32xbf16>
    %c0_1 = arith.constant 0 : index
    %c0_2 = arith.constant 0 : index
    %2 = vector.load %arg2[%c0_1, %c0_2] : memref<32x128xbf16, #tpu.memory_space<vmem>>, vector<32x128xbf16>
    %cst = arith.constant dense<0.000000e+00> : vector<256x128xf32>
    %3 = tpu.matmul %1, %2, %cst {dimension_numbers = #tpu.dot_dimension_numbers<[1], [0], [0], [1], [0, 0, 1, 1], [], []>} : vector<256x32xbf16>, vector<32x128xbf16>, vector<256x128xf32> -> vector<256x128xf32>
    %c0_3 = arith.constant 0 : index
    %c0_4 = arith.constant 0 : index
    %4 = vector.load %arg3[%c0_3, %c0_4] : memref<1x128xf32, #tpu.memory_space<vmem>>, vector<1x128xf32>
    %5 = vector.broadcast %4 : vector<1x128xf32> to vector<256x128xf32>
    %6 = arith.addf %3, %5 : vector<256x128xf32>
    %cst_5 = arith.constant 0.000000e+00 : f32
    %7 = vector.broadcast %cst_5 : f32 to vector<256x128xf32>
    %8 = arith.maximumf %6, %7 : vector<256x128xf32>
    %9 = arith.truncf %8 : vector<256x128xf32> to vector<256x128xbf16>
    %c0_6 = arith.constant 0 : index
    %c0_7 = arith.constant 0 : index
    %10 = vector.load %arg4[%c0_6, %c0_7] : memref<128x256xbf16, #tpu.memory_space<vmem>>, vector<128x256xbf16>
    %cst_8 = arith.constant dense<0.000000e+00> : vector<256x256xf32>
    %11 = tpu.matmul %9, %10, %cst_8 {dimension_numbers = #tpu.dot_dimension_numbers<[1], [0], [0], [1], [0, 0, 1, 1], [], []>} : vector<256x128xbf16>, vector<128x256xbf16>, vector<256x256xf32> -> vector<256x256xf32>
    %c0_9 = arith.constant 0 : index
    %c0_10 = arith.constant 0 : index
    %12 = vector.load %arg5[%c0_9, %c0_10] : memref<1x256xf32, #tpu.memory_space<vmem>>, vector<1x256xf32>
    %13 = vector.broadcast %12 : vector<1x256xf32> to vector<256x256xf32>
    %14 = arith.addf %11, %13 : vector<256x256xf32>
    %cst_11 = arith.constant 0.000000e+00 : f32
    %15 = vector.broadcast %cst_11 : f32 to vector<256x256xf32>
    %16 = arith.maximumf %14, %15 : vector<256x256xf32>
    %17 = arith.truncf %16 : vector<256x256xf32> to vector<256x256xbf16>
    %c0_12 = arith.constant 0 : index
    %c0_13 = arith.constant 0 : index
    %18 = vector.load %arg6[%c0_12, %c0_13] : memref<256x512xbf16, #tpu.memory_space<vmem>>, vector<256x512xbf16>
    %cst_14 = arith.constant dense<0.000000e+00> : vector<256x512xf32>
    %19 = tpu.matmul %17, %18, %cst_14 {dimension_numbers = #tpu.dot_dimension_numbers<[1], [0], [0], [1], [0, 0, 1, 1], [], []>} : vector<256x256xbf16>, vector<256x512xbf16>, vector<256x512xf32> -> vector<256x512xf32>
    %c0_15 = arith.constant 0 : index
    %c0_16 = arith.constant 0 : index
    %20 = vector.load %arg7[%c0_15, %c0_16] : memref<1x512xf32, #tpu.memory_space<vmem>>, vector<1x512xf32>
    %21 = vector.broadcast %20 : vector<1x512xf32> to vector<256x512xf32>
    %22 = arith.addf %19, %21 : vector<256x512xf32>
    %cst_17 = arith.constant 0.000000e+00 : f32
    %23 = vector.broadcast %cst_17 : f32 to vector<256x512xf32>
    %24 = arith.maximumf %22, %23 : vector<256x512xf32>
    %25 = arith.truncf %24 : vector<256x512xf32> to vector<256x512xbf16>
    %c0_18 = arith.constant 0 : index
    %c0_19 = arith.constant 0 : index
    %26 = vector.load %arg8[%c0_18, %c0_19] : memref<512x768xbf16, #tpu.memory_space<vmem>>, vector<512x768xbf16>
    %cst_20 = arith.constant dense<0.000000e+00> : vector<256x768xf32>
    %27 = tpu.matmul %25, %26, %cst_20 {dimension_numbers = #tpu.dot_dimension_numbers<[1], [0], [0], [1], [0, 0, 1, 1], [], []>} : vector<256x512xbf16>, vector<512x768xbf16>, vector<256x768xf32> -> vector<256x768xf32>
    %c0_21 = arith.constant 0 : index
    %c0_22 = arith.constant 0 : index
    %28 = vector.load %arg9[%c0_21, %c0_22] : memref<1x768xf32, #tpu.memory_space<vmem>>, vector<1x768xf32>
    %29 = vector.broadcast %28 : vector<1x768xf32> to vector<256x768xf32>
    %30 = arith.addf %27, %29 : vector<256x768xf32>
    %c0_23 = arith.constant 0 : index
    %c0_24 = arith.constant 0 : index
    %31 = vector.load %arg10[%c0_23, %c0_24] : memref<256x768xf32, #tpu.memory_space<vmem>>, vector<256x768xf32>
    tpu.vector_store %arg10[%c0_23, %c0_24], %30 {strides = array<i32>} : memref<256x768xf32, #tpu.memory_space<vmem>>, vector<256x768xf32>,
    return
  }
  func.func @transform_0(%arg0: i32) -> (i32, i32) {
    %c0_i32 = arith.constant 0 : i32
    %c0_i32_0 = arith.constant 0 : i32
    return %arg0, %c0_i32 : i32, i32
  }
  func.func @transform_1(%arg0: i32) -> (i32, i32) {
    %c0_i32 = arith.constant 0 : i32
    %c0_i32_0 = arith.constant 0 : i32
    %c0_i32_1 = arith.constant 0 : i32
    return %c0_i32, %c0_i32_0 : i32, i32
  }
  func.func @transform_2(%arg0: i32) -> (i32, i32) {
    %c0_i32 = arith.constant 0 : i32
    %c0_i32_0 = arith.constant 0 : i32
    %c0_i32_1 = arith.constant 0 : i32
    return %c0_i32, %c0_i32_0 : i32, i32
  }
  func.func @transform_3(%arg0: i32) -> (i32, i32) {
    %c0_i32 = arith.constant 0 : i32
    %c0_i32_0 = arith.constant 0 : i32
    %c0_i32_1 = arith.constant 0 : i32
    return %c0_i32, %c0_i32_0 : i32, i32
  }
  func.func @transform_4(%arg0: i32) -> (i32, i32) {
    %c0_i32 = arith.constant 0 : i32
    %c0_i32_0 = arith.constant 0 : i32
    %c0_i32_1 = arith.constant 0 : i32
    return %c0_i32, %c0_i32_0 : i32, i32
  }
  func.func @transform_5(%arg0: i32) -> (i32, i32) {
    %c0_i32 = arith.constant 0 : i32
    %c0_i32_0 = arith.constant 0 : i32
    %c0_i32_1 = arith.constant 0 : i32
    return %c0_i32, %c0_i32_0 : i32, i32
  }
  func.func @transform_6(%arg0: i32) -> (i32, i32) {
    %c0_i32 = arith.constant 0 : i32
    %c0_i32_0 = arith.constant 0 : i32
    %c0_i32_1 = arith.constant 0 : i32
    return %c0_i32, %c0_i32_0 : i32, i32
  }
  func.func @transform_7(%arg0: i32) -> (i32, i32) {
    %c0_i32 = arith.constant 0 : i32
    %c0_i32_0 = arith.constant 0 : i32
    %c0_i32_1 = arith.constant 0 : i32
    return %c0_i32, %c0_i32_0 : i32, i32
  }
  func.func @transform_8(%arg0: i32) -> (i32, i32) {
    %c0_i32 = arith.constant 0 : i32
    %c0_i32_0 = arith.constant 0 : i32
    %c0_i32_1 = arith.constant 0 : i32
    return %c0_i32, %c0_i32_0 : i32, i32
  }
  func.func @transform_9(%arg0: i32) -> (i32, i32) {
    %c0_i32 = arith.constant 0 : i32
    %c0_i32_0 = arith.constant 0 : i32
    return %arg0, %c0_i32 : i32, i32
  }
}

</mosaic_0001>

<bundles_post_ra>
// kernel: tpu_custom_call.1
= control target key start
LH: loop header
LB: loop body
LE: loop exit
PB: predicated region body
PF: predicated region fallthrough
CT: control target
= control target key end

     0   :  { %s8163_s0 = inlined_call_operand.vmem [shape: f32[512,32], index: 0, kind: input, shape index: {}]   ;;  %s8164_s1 = inlined_call_operand.hbm [shape: bf16[32,128], index: 1, kind: input, shape index: {}]   ;;  %s8165_s2 = inlined_call_operand.hbm [shape: f32[1,128], index: 2, kind: input, shape index: {}]   ;;  %s8166_s3 = inlined_call_operand.hbm [shape: bf16[128,256], index: 3, kind: input, shape index: {}]   ;;  %s8167_s4 = inlined_call_operand.hbm [shape: f32[1,256], index: 4, kind: input, shape index: {}]   ;;  %s8168_s5 = inlined_call_operand.hbm [shape: bf16[256,512], index: 5, kind: input, shape index: {}]   ;;  %s8169_s6 = inlined_call_operand.hbm [shape: f32[1,512], index: 6, kind: input, shape index: {}]   ;;  %s8170_s7 = inlined_call_operand.hbm [shape: bf16[512,768], index: 7, kind: input, shape index: {}]   ;;  %s8171_s8 = inlined_call_operand.hbm [shape: f32[1,768], index: 8, kind: input, shape index: {}]   ;;  %s8172_s9 = inlined_call_operand.hbm [shape: f32[512,768], index: 9, kind: output, shape index: {}]  }
   0x1   :  { %8220 = sst [smem:[#allocation64_spill]] %s8165_s2 }
   0x2   :  { %8221 = sst [smem:[#allocation65_spill]] %s8167_s4 }
   0x3   :  { %14 = vsyncpa [#allocation3], 0 }
   0x4   :  { %15 = vsyncpa [#allocation6], 0 }
   0x5   :  { %16 = vsyncpa [#allocation9], 0 }
   0x6   :  { %17 = vsyncpa [#allocation12], 0 }
   0x7   :  { %18 = vsyncpa [#allocation15], 0 }
   0x8   :  { %19 = vsyncpa [#allocation4], 0 }
   0x9   :  { %21 = vsyncpa [#allocation4 + $0x1], 0  ;;  %s6553_s30 = smov 0   ;;  %s6555_s10 = smov 0  }
   0xa   :  { %s6557_s11 = smov 0   ;;  %s6559_s12 = smov 0  }
   0xb LB: > { %8222 = sst [smem:[#allocation23_spill]] %s6477_s11  ;;  %s6574_s13 = sadd.s32 4294967295, %s6481_s12   ;;  %s6481_s12 = sphi %s6559_s12, %s8323_s12   ;;  %s6477_s11 = sphi %s6557_s11, %s8325_s11   ;;  %s6473_s10 = sphi %s6555_s10, %s8327_s10   ;;  %s6469_s30 = sphi %s6553_s30, %s8326_s30  }
   0xc   : > { %s4844_s14 = sadd.s32 4294967294, %s6481_s12   ;;  %s6578_s15 = sadd.s32 1, %s6481_s12  }
   0xd   : > { %8223 = sst [smem:[#allocation24_spill]] %s6578_s15  ;;  %s228_s16 = sadd.s32 1, %s6477_s11 }
   0xe   : > { %s225_s17 = ssub.s32 %s6481_s12, %s6578_s15  ;;  %p238_p0 = scmp.ne.s32.totalorder %s6477_s11, %s6473_s10 }
   0xf   : > { %p226_p1 = scmp.eq.s32.totalorder %s225_s17, 0  ;;  %p239_p2 = scmp.eq.s32.totalorder %s6574_s13, 1 }
  0x10   : > { %p244_p3 = scmp.ne.s32.totalorder %s6473_s10, %s6469_s30  ;;  %p245_p4 = scmp.eq.s32.totalorder %s4844_s14, 1 }
  0x11   : > { %s6589_s18 = scalar_select %p226_p1, %s6477_s11, %s228_s16  }
  0x12   : > { %p6591_p5 = por %p239_p2, %p238_p0  ;;  %p6595_p6 = por %p245_p4, %p244_p3 }
  0x13   : > { %8224 = sst [smem:[#allocation25_spill]] %s6589_s18  ;;  %p4845_p7 = scmp.ge.s32.totalorder %s6481_s12, 1 }
  0x14   : > { %s8225_s19 = scalar_select %p6591_p5, 1, 0 }
  0x15   : > { %s8226_s20 = scalar_select %p6595_p6, 1, 0 }
  0x16   : > { %p252_p8 = scmp.lt.s32.totalorder %s6481_s12, 3  ;;  %p8173_p9 = scmp.eq.s32.totalorder %s6574_s13, 0 }
  0x17   : > { %s6483_s22 = smov [#allocation5]   ;;  %s6484_s24 = smov [#allocation8]  }
  0x18   : > { %p6602_p10 = pnand %p4845_p7, %p252_p8  ;;  %s278_s23 = sshll.u32 %s6483_s22, 4  ;;  %s279_s23 = int_to_ptr.vmem [resolvable:$true] %s278_s23 }
  0x19   : > { %s302_s25 = sshll.u32 %s6484_s24, 4  ;;  %s6485_s27 = smov [#allocation11]   ;;  %s6614_s25 = int_to_ptr.vmem [resolvable:$true] %s302_s25 }
  0x1a   : > { %s8227_s21 = scalar_select %p6602_p10, 1, 0 }
  0x1b   : > { %p5668_p11 = pneg %p6602_p10  ;;  %s326_s28 = sshll.u32 %s6485_s27, 4  ;;  %s6616_s28 = int_to_ptr.vmem [resolvable:$true] %s326_s28 }
  0x1c   : > { %s8229_s2 = sld [smem:[#allocation64_spill]] }
  0x1d   : > { %p6610_p12 = pnand %p8173_p9, %p5668_p11 }
  0x1f   : > { %p6626_p0 = pneg %p6610_p12 }
  0x22   : > { %s6175_s16 = scalar_lea.hbm %s8229_s2, 16 }
  0x23   : > { %p6176_p13 = scmp.ne.s32.totalorder %s8229_s2, %s6175_s16  ;;  %p6182_p3 = scmp.lt.u32.totalorder %s6175_s16, %s8229_s2 }
  0x25   : > { %p6178_p1 = pnand %p6626_p0, %p6176_p13 }
  0x27   : > { %p6179_p2 = pneg %p6178_p1 }
  0x29   : > { %p6184_p4 = pnand %p6182_p3, %p6179_p2 }
  0x2b   : > { %6187 = shalt.err (!%p6184_p4)
}
  0x2c   : > { %s6188_s29 = scalar_lea.vmem %s279_s23, 16  ;;  %s6195_s14 = scalar_lea.vmem %s279_s23, 32 }
  0x2d   : > { %p6189_p7 = scmp.ne.s32.totalorder %s279_s23, %s6188_s29  ;;  %p6196_p9 = scmp.lt.s32.totalorder %s279_s23, %s279_s23 }
  0x2e   : > { %p6197_p6 = scmp.lt.s32.totalorder %s6195_s14, %s6188_s29 }
  0x2f   : > { %p6191_p8 = pnand %p6189_p7, %p6626_p0 }
  0x30   : > { %p6198_p5 = por %p6197_p6, %p6196_p9 }
  0x31   : > { %p6192_p11 = pneg %p6191_p8 }
  0x33   : > { %p6199_p10 = pnand %p6198_p5, %p6192_p11 }
  0x35   : > { %6202 = shalt.err (!%p6199_p10)
}
  0x36   : > { %5674 = dma.hbm_to_vmem [thread:$0]  (!%p6610_p12), %s8229_s2, 16, %s279_s23, [#allocation6]  }
  0x37   : > { %s8231_s4 = sld [smem:[#allocation65_spill]] }
  0x3d   : > { %s6203_s27 = scalar_lea.hbm %s8231_s4, 32 }
  0x3e   : > { %p6204_p13 = scmp.ne.s32.totalorder %s8231_s4, %s6203_s27  ;;  %p6210_p5 = scmp.lt.u32.totalorder %s6203_s27, %s8231_s4 }
  0x40   : > { %p6206_p1 = pnand %p6204_p13, %p6626_p0 }
  0x42   : > { %p6207_p6 = pneg %p6206_p1 }
  0x44   : > { %p6212_p9 = pnand %p6210_p5, %p6207_p6 }
  0x46   : > { %6215 = shalt.err (!%p6212_p9)
}
  0x47   : > { %s6216_s23 = scalar_lea.vmem %s6614_s25, 32  ;;  %p6224_p4 = scmp.lt.s32.totalorder %s6614_s25, %s6614_s25 }
  0x48   : > { %p6217_p10 = scmp.ne.s32.totalorder %s6614_s25, %s6216_s23  ;;  %p6225_p7 = scmp.lt.s32.totalorder %s6216_s23, %s6216_s23 }
  0x4a   : > { %p6219_p2 = pnand %p6217_p10, %p6626_p0  ;;  %p6226_p8 = por %p6225_p7, %p6224_p4 }
  0x4c   : > { %p6220_p3 = pneg %p6219_p2 }
  0x4e   : > { %p6227_p11 = pnand %p6226_p8, %p6220_p3 }
  0x50   : > { %6230 = shalt.err (!%p6227_p11)
}
  0x51   : > { %5680 = dma.hbm_to_vmem [thread:$0]  (!%p6610_p12), %s8231_s4, 32, %s6614_s25, [#allocation9]  }
  0x52   : > { %s6231_s18 = scalar_lea.hbm %s8169_s6, 64 }
  0x53   : > { %p6232_p13 = scmp.ne.s32.totalorder %s8169_s6, %s6231_s18  ;;  %p6238_p5 = scmp.lt.u32.totalorder %s6231_s18, %s8169_s6 }
  0x55   : > { %p6234_p1 = pnand %p6232_p13, %p6626_p0 }
  0x57   : > { %p6235_p6 = pneg %p6234_p1 }
  0x59   : > { %p6240_p9 = pnand %p6238_p5, %p6235_p6 }
  0x5b   : > { %6243 = shalt.err (!%p6240_p9)
}
  0x5c   : > { %s6244_s25 = scalar_lea.vmem %s6616_s28, 64  ;;  %p6252_p4 = scmp.lt.s32.totalorder %s6616_s28, %s6616_s28 }
  0x5d   : > { %p6245_p10 = scmp.ne.s32.totalorder %s6616_s28, %s6244_s25  ;;  %p6253_p7 = scmp.lt.s32.totalorder %s6244_s25, %s6244_s25 }
  0x5f   : > { %p6247_p2 = pnand %p6245_p10, %p6626_p0  ;;  %p6254_p8 = por %p6253_p7, %p6252_p4 }
  0x61   : > { %p6248_p3 = pneg %p6247_p2 }
  0x63   : > { %p6255_p11 = pnand %p6254_p8, %p6248_p3 }
  0x65   : > { %6258 = shalt.err (!%p6255_p11)
}
  0x66   : > { %5686 = dma.hbm_to_vmem [thread:$0]  (!%p6610_p12), %s8169_s6, 64, %s6616_s28, [#allocation12]  }
  0x67   : > { %s6486_s15 = smov [#allocation2]   ;;  %s6259_s16 = scalar_lea.hbm %s8164_s1, 256 }
  0x68   : > { %s264_s17 = sshll.u32 %s6486_s15, 4  ;;  %p6260_p13 = scmp.ne.s32.totalorder %s8164_s1, %s6259_s16  ;;  %s265_s17 = int_to_ptr.vmem [resolvable:$true] %s264_s17 }
  0x69   : > { %p6266_p5 = scmp.lt.u32.totalorder %s6259_s16, %s8164_s1 }
  0x6a   : > { %p6262_p1 = pnand %p6260_p13, %p6626_p0 }
  0x6c   : > { %p6263_p6 = pneg %p6262_p1 }
  0x6e   : > { %p6268_p9 = pnand %p6266_p5, %p6263_p6 }
  0x70   : > { %6271 = shalt.err (!%p6268_p9)
}
  0x71   : > { %s6272_s28 = scalar_lea.vmem %s265_s17, 256  ;;  %p6280_p4 = scmp.lt.s32.totalorder %s265_s17, %s265_s17 }
  0x72   : > { %p6273_p10 = scmp.ne.s32.totalorder %s265_s17, %s6272_s28  ;;  %p6281_p7 = scmp.lt.s32.totalorder %s6272_s28, %s6272_s28 }
  0x74   : > { %p6275_p2 = pnand %p6273_p10, %p6626_p0  ;;  %p6282_p8 = por %p6281_p7, %p6280_p4 }
  0x76   : > { %p6276_p3 = pneg %p6275_p2 }
  0x78   : > { %p6283_p11 = pnand %p6282_p8, %p6276_p3 }
  0x7a   : > { %6286 = shalt.err (!%p6283_p11)
}
  0x7b   : > { %s6487_s23 = smov 64   ;;  %s6488_s11 = smov 4  }
  0x7c   : > { %5671 = dma.hbm_to_vmem [thread:$0]  (!%p6610_p12), %s8164_s1, 256, %s265_s17, [#allocation3], %s6487_s23, %s6487_s23, %s6488_s11  }
  0x7d   : > { %s6489_s18 = smov [#allocation7]   ;;  %s6287_s14 = scalar_lea.hbm %s8166_s3, 2048 }
  0x7e   : > { %s288_s16 = sshll.u32 %s6489_s18, 4  ;;  %p6288_p13 = scmp.ne.s32.totalorder %s8166_s3, %s6287_s14  ;;  %s289_s16 = int_to_ptr.vmem [resolvable:$true] %s288_s16 }
  0x7f   : > { %p6294_p5 = scmp.lt.u32.totalorder %s6287_s14, %s8166_s3 }
  0x80   : > { %p6290_p1 = pnand %p6288_p13, %p6626_p0 }
  0x82   : > { %p6291_p6 = pneg %p6290_p1 }
  0x84   : > { %p6296_p9 = pnand %p6294_p5, %p6291_p6 }
  0x86   : > { %6299 = shalt.err (!%p6296_p9)
}
  0x87   : > { %s6300_s17 = scalar_lea.vmem %s289_s16, 2048  ;;  %p6308_p4 = scmp.lt.s32.totalorder %s289_s16, %s289_s16 }
  0x88   : > { %p6301_p10 = scmp.ne.s32.totalorder %s289_s16, %s6300_s17  ;;  %p6309_p7 = scmp.lt.s32.totalorder %s6300_s17, %s6300_s17 }
  0x8a   : > { %p6303_p2 = pnand %p6301_p10, %p6626_p0  ;;  %p6310_p8 = por %p6309_p7, %p6308_p4 }
  0x8c   : > { %p6304_p3 = pneg %p6303_p2 }
  0x8e   : > { %p6311_p11 = pnand %p6310_p8, %p6304_p3 }
  0x90   : > { %6314 = shalt.err (!%p6311_p11)
}
  0x91   : > { %s6490_s23 = smov 128   ;;  %s6491_s11 = smov 8  }
  0x92   : > { %5677 = dma.hbm_to_vmem [thread:$0]  (!%p6610_p12), %s8166_s3, 2048, %s289_s16, [#allocation6], %s6490_s23, %s6490_s23, %s6491_s11  }
  0x93   : > { %s6492_s15 = smov [#allocation10]   ;;  %s6315_s29 = scalar_lea.hbm %s8168_s5, 8192 }
  0x94   : > { %s312_s22 = sshll.u32 %s6492_s15, 4  ;;  %p6316_p13 = scmp.ne.s32.totalorder %s8168_s5, %s6315_s29  ;;  %s313_s22 = int_to_ptr.vmem [resolvable:$true] %s312_s22 }
  0x95   : > { %p6322_p5 = scmp.lt.u32.totalorder %s6315_s29, %s8168_s5 }
  0x96   : > { %p6318_p1 = pnand %p6316_p13, %p6626_p0 }
  0x98   : > { %p6319_p6 = pneg %p6318_p1 }
  0x9a   : > { %p6324_p9 = pnand %p6322_p5, %p6319_p6 }
  0x9c   : > { %6327 = shalt.err (!%p6324_p9)
}
  0x9d   : > { %s6328_s16 = scalar_lea.vmem %s313_s22, 8192  ;;  %p6336_p4 = scmp.lt.s32.totalorder %s313_s22, %s313_s22 }
  0x9e   : > { %p6329_p10 = scmp.ne.s32.totalorder %s313_s22, %s6328_s16  ;;  %p6337_p7 = scmp.lt.s32.totalorder %s6328_s16, %s6328_s16 }
  0xa0   : > { %p6331_p2 = pnand %p6329_p10, %p6626_p0  ;;  %p6338_p8 = por %p6337_p7, %p6336_p4 }
  0xa2   : > { %p6332_p3 = pneg %p6331_p2 }
  0xa4   : > { %p6339_p11 = pnand %p6338_p8, %p6332_p3 }
  0xa6   : > { %6342 = shalt.err (!%p6339_p11)
}
  0xa7   : > { %s6493_s23 = smov 256   ;;  %s6494_s11 = smov 16  }
  0xa8   : > { %5683 = dma.hbm_to_vmem [thread:$0]  (!%p6610_p12), %s8168_s5, 8192, %s313_s22, [#allocation9], %s6493_s23, %s6493_s23, %s6494_s11  }
  0xa9   : > { %s6495_s15 = smov [#allocation13]   ;;  %s6343_s14 = scalar_lea.hbm %s8170_s7, 24576 }
  0xaa   : > { %s336_s18 = sshll.u32 %s6495_s15, 4  ;;  %p6344_p13 = scmp.ne.s32.totalorder %s8170_s7, %s6343_s14  ;;  %s337_s18 = int_to_ptr.vmem [resolvable:$true] %s336_s18 }
  0xab   : > { %p6350_p5 = scmp.lt.u32.totalorder %s6343_s14, %s8170_s7 }
  0xac   : > { %p6346_p1 = pnand %p6344_p13, %p6626_p0 }
  0xae   : > { %p6347_p6 = pneg %p6346_p1 }
  0xb0   : > { %p6352_p9 = pnand %p6350_p5, %p6347_p6 }
  0xb2   : > { %6355 = shalt.err (!%p6352_p9)
}
  0xb3   : > { %s6356_s22 = scalar_lea.vmem %s337_s18, 24576  ;;  %p6364_p4 = scmp.lt.s32.totalorder %s337_s18, %s337_s18 }
  0xb4   : > { %p6357_p10 = scmp.ne.s32.totalorder %s337_s18, %s6356_s22  ;;  %p6365_p7 = scmp.lt.s32.totalorder %s6356_s22, %s6356_s22 }
  0xb6   : > { %p6359_p2 = pnand %p6357_p10, %p6626_p0  ;;  %p6366_p8 = por %p6365_p7, %p6364_p4 }
  0xb8   : > { %p6360_p3 = pneg %p6359_p2 }
  0xba   : > { %p6367_p11 = pnand %p6366_p8, %p6360_p3 }
  0xbc   : > { %6370 = shalt.err (!%p6367_p11)
}
  0xbd   : > { %s6496_s23 = smov 384   ;;  %s6497_s11 = smov 24  }
  0xbe   : > { %5689 = dma.hbm_to_vmem [thread:$0]  (!%p6610_p12), %s8170_s7, 24576, %s337_s18, [#allocation12], %s6496_s23, %s6496_s23, %s6497_s11  }
  0xbf   : > { %s6498_s15 = smov [#allocation14]   ;;  %s6371_s25 = scalar_lea.hbm %s8171_s8, 96 }
  0xc0   : > { %s350_s27 = sshll.u32 %s6498_s15, 4  ;;  %p6372_p13 = scmp.ne.s32.totalorder %s8171_s8, %s6371_s25  ;;  %s351_s27 = int_to_ptr.vmem [resolvable:$true] %s350_s27 }
  0xc1   : > { %p6378_p5 = scmp.lt.u32.totalorder %s6371_s25, %s8171_s8 }
  0xc2   : > { %p6374_p1 = pnand %p6372_p13, %p6626_p0 }
  0xc4   : > { %p6375_p6 = pneg %p6374_p1 }
  0xc6   : > { %p6380_p9 = pnand %p6378_p5, %p6375_p6 }
  0xc8   : > { %6383 = shalt.err (!%p6380_p9)
}
  0xc9   : > { %s6384_s18 = scalar_lea.vmem %s351_s27, 96  ;;  %p6392_p4 = scmp.lt.s32.totalorder %s351_s27, %s351_s27 }
  0xca   : > { %p6385_p10 = scmp.ne.s32.totalorder %s351_s27, %s6384_s18  ;;  %p6393_p7 = scmp.lt.s32.totalorder %s6384_s18, %s6384_s18 }
  0xcc   : > { %p6387_p2 = pnand %p6385_p10, %p6626_p0  ;;  %p6394_p8 = por %p6393_p7, %p6392_p4 }
  0xce   : > { %p6388_p3 = pneg %p6387_p2 }
  0xd0   : > { %p6395_p11 = pnand %p6394_p8, %p6388_p3 }
  0xd2   : > { %6398 = shalt.err (!%p6395_p11)
}
  0xd3   : > { %5692 = dma.hbm_to_vmem [thread:$0]  (!%p6610_p12), %s8171_s8, 96, %s351_s27, [#allocation15]  }
  0xd4   : > { %p8232_p13 = scmp.ne.s32.totalorder %s8227_s21, 0 }
  0xd6   : > { %372 = sbr.rel (%p8232_p13) target bundleno = 1568 (0x620), region = 56 }
  0xdd   : > { %p8233_p1 = scmp.eq.s32.totalorder %s6574_s13, 0 }
  0xdf   : > { %6444 = dma.done.wait (%p8233_p1), [#allocation3], 256   ;;  %p8234_p0 = pmov %p8233_p1 }
  0xe1   : > { %6446 = vsyncadd (%p8234_p0), [#allocation3], 4294967040  ;;  %p8235_p6 = pmov %p8234_p0 }
  0xe2   : > { %p8236_p5 = pmov %p8234_p0 }
  0xe3   : > { %6448 = dma.done.wait (%p8235_p6), [#allocation6], 2064  }
  0xe4   : > { %6450 = vsyncadd (%p8236_p5), [#allocation6], 4294965232  ;;  %p8237_p9 = pmov %p8234_p0 }
  0xe5   : > { %p8238_p12 = pmov %p8234_p0 }
  0xe6   : > { %6452 = dma.done.wait (%p8237_p9), [#allocation9], 8224  }
  0xe7   : > { %6454 = vsyncadd (%p8238_p12), [#allocation9], 4294959072  ;;  %p8239_p10 = pmov %p8234_p0 }
  0xe8   : > { %p8240_p2 = pmov %p8234_p0 }
  0xe9   : > { %6456 = dma.done.wait (%p8239_p10), [#allocation12], 24640  }
  0xea   : > { %6458 = vsyncadd (%p8240_p2), [#allocation12], 4294942656  ;;  %p8241_p3 = pmov %p8234_p0 }
  0xeb   : > { %p8242_p4 = pmov %p8234_p0 }
  0xec   : > { %6460 = dma.done.wait (%p8241_p3), [#allocation15], 96  }
  0xed   : > { %6462 = vsyncadd (%p8242_p4), [#allocation15], 4294967200  ;;  %s4864_s21 = sshll.u32 %s6574_s13, 5  ;;  %v5765_v0 = vld [vmem:[#allocation2] sm:$0xff]   ;;  %v5766_v1 = vld [vmem:[#allocation2 + $0x8] sm:$0xff]   ;;  %vm515_vm0 = vcmask 261120  }
  0xee   : > { %p437_p7 = scmp.lt.s32.totalorder %s4864_s21, 63  ;;  %5180 = vmatprep.subr.bf16.mxu0 %v5765_v0  ;;  %v5767_v15 = vld [vmem:[#allocation7 + $0x4] ss:$8 sps:$4 sm:$0xff]   ;;  %v5769_v16 = vld [vmem:[#allocation7] ss:$8 sps:$4 sm:$0xff]   ;;  %s433_s15 = sand.u32 1, %s6473_s10  }
  0xef   : > { %5181 = vmatpush3.bf16.msra.mxu0 %v5765_v0  ;;  %v5770_v18 = vld [vmem:[#allocation7 + $0x14] ss:$8 sps:$4 sm:$0xff]   ;;  %881 = vmatprep.subr.bf16.mxu1 %v5767_v15  ;;  %v5772_v20 = vld [vmem:[#allocation7 + $0x10] ss:$8 sps:$4 sm:$0xff]   ;;  %v5773_v23 = vld [vmem:[#allocation7 + $0x24] ss:$8 sps:$4 sm:$0xff]  }
  0xf0   : > { %s8329_s21 = smov (!%p437_p7, %s4864_s21), 63  ;;  %5182 = vmatprep.subr.bf16.mxu0 %v5766_v1  ;;  %882 = vmatpush1.bf16.msra.mxu1 %v5769_v16  ;;  %v5775_v26 = vld [vmem:[#allocation7 + $0x20] ss:$8 sps:$4 sm:$0xff]   ;;  %v5776_v27 = vld [vmem:[#allocation7 + $0x34] ss:$8 sps:$4 sm:$0xff]   ;;  %s5632_s27 = smul.u32 1536, %s433_s15 }
  0xf1   : > { %s4865_s26 = sshll.u32 %s8329_s21, 3  ;;  %883 = vmatprep.subr.bf16.mxu1 %v5770_v18  ;;  %v5778_v29 = vld [vmem:[#allocation7 + $0x30] ss:$8 sps:$4 sm:$0xff]   ;;  %v5779_v31 = vld [vmem:[#allocation7 + $0x44] ss:$8 sps:$4 sm:$0xff]   ;;  %s5633_s14 = smul.u32 24576, %s6574_s13 }
  0xf2   : > { %s6804_s4 = scalar_lea.vmem %s8163_s0, %s4865_s26  ;;  %v5781_v36 = vld [vmem:[#allocation7 + $0x40] ss:$8 sps:$4 sm:$0xff]   ;;  %v5782_v37 = vld [vmem:[#allocation7 + $0x54] ss:$8 sps:$4 sm:$0xff]   ;;  %v5784_v39 = vld [vmem:[#allocation7 + $0x50] ss:$8 sps:$4 sm:$0xff]  }
  0xf3   : > { %v444_v2 = vld [vmem:[%s6804_s4] sm:$0xff]  ;;  %v445_v3 = vld [vmem:[%s6804_s4 + $0x8] sm:$0xff]  ;;  %v446_v5 = vld [vmem:[%s6804_s4 + $0x10] sm:$0xff]  ;;  %5183 = vmatpush3.bf16.msra.mxu0 %v5766_v1  ;;  %s7604_s29 = scalar_lea.vmem [#allocation16], %s5632_s27  ;;  %s8112_s16 = scalar_lea.hbm %s8172_s9, %s5633_s14 }
  0xf4   : > { %v476_v4 = vpack.c.bf16 %v445_v3, %v444_v2  ;;  %v447_v6 = vld [vmem:[%s6804_s4 + $0x18] sm:$0xff]  ;;  %v448_v7 = vld [vmem:[%s6804_s4 + $0x20] sm:$0xff]  ;;  %v449_v8 = vld [vmem:[%s6804_s4 + $0x28] sm:$0xff]  ;;  %884 = vmatpush1.bf16.msra.mxu1 %v5772_v20  ;;  %v6499_v2 = vmov 0   ;;  %s4703_s25 = sshll.u32 %s7604_s29, 4  ;;  %s8122_s13 = scalar_lea.sflag [#allocation4], %s433_s15  ;;  %s8114_s25 = int_to_ptr.vmem [resolvable:$true] %s4703_s25 }
  0xf5   : > { %v477_v9 = vpack.c.bf16 %v447_v6, %v446_v5  ;;  %v478_v10 = vpack.c.bf16 %v449_v8, %v448_v7  ;;  %v450_v11 = vld [vmem:[%s6804_s4 + $0x30] sm:$0xff]  ;;  %v451_v12 = vld [vmem:[%s6804_s4 + $0x38] sm:$0xff]  ;;  %v452_v13 = vld [vmem:[%s6804_s4 + $0x40] sm:$0xff]  ;;  %885 = vmatprep.subr.bf16.mxu1 %v5773_v23  ;;  %913 = vmatprep.mubr.bf16.mxu1 %v6499_v2  ;;  %s6399_s22 = scalar_lea.vmem %s8114_s25, 24576  ;;  %p8321_p11 = scmp.ne.s32.totalorder %s8225_s19, 0 }
  0xf6   : > { %5184 = vmatprep.mubr.msk.bf16.mxu0 %vm515_vm0, %v476_v4  ;;  %v453_v14 = vld [vmem:[%s6804_s4 + $0x48] sm:$0xff]  ;;  %v479_v17 = vpack.c.bf16 %v451_v12, %v450_v11  ;;  %v454_v21 = vld [vmem:[%s6804_s4 + $0x50] sm:$0xff]  ;;  %v455_v22 = vld [vmem:[%s6804_s4 + $0x58] sm:$0xff]  ;;  %p6400_p8 = scmp.ne.s32.totalorder %s8114_s25, %s6399_s22  ;;  %s6500_s18 = smov [#allocation16]  }
  0xf7   : > { %5185 = vmatmul.mubr.msk.bf16.vlgmr.msra.gmra.mrb[0].mxu0 %vm515_vm0, %v477_v9  ;;  %v480_v19 = vpack.c.bf16 %v453_v14, %v452_v13  ;;  %v456_v24 = vld [vmem:[%s6804_s4 + $0x60] sm:$0xff]  ;;  %v457_v25 = vld [vmem:[%s6804_s4 + $0x68] sm:$0xff]  ;;  %v481_v28 = vpack.c.bf16 %v455_v22, %v454_v21  ;;  %v458_v32 = vld [vmem:[%s6804_s4 + $0x70] sm:$0xff]  ;;  %s6403_s23 = sshll.u32 %s6500_s18, 4  ;;  %s6404_s23 = int_to_ptr.vmem [resolvable:$false] %s6403_s23 }
  0xf8   : > { %5188 = vmatprep.mubr.msk.bf16.mxu0 %vm515_vm0, %v478_v10  ;;  %v482_v30 = vpack.c.bf16 %v457_v25, %v456_v24  ;;  %886 = vmatpush1.bf16.msra.mxu1 %v5775_v26  ;;  %v459_v33 = vld [vmem:[%s6804_s4 + $0x78] sm:$0xff]  ;;  %v460_v34 = vld [vmem:[%s6804_s4 + $0x80] sm:$0xff]  ;;  %v461_v35 = vld [vmem:[%s6804_s4 + $0x88] sm:$0xff]  ;;  %p6401_p13 = pnand %p6400_p8, %p8321_p11  ;;  %s6405_s11 = scalar_lea.vmem %s6404_s23, 49152 }
  0xf9   : > { %887 = vmatprep.subr.bf16.mxu1 %v5776_v27  ;;  %v483_v38 = vpack.c.bf16 %v459_v33, %v458_v32  ;;  %v484_v40 = vpack.c.bf16 %v461_v35, %v460_v34  ;;  %v462_v41 = vld [vmem:[%s6804_s4 + $0x90] sm:$0xff]  ;;  %v463_v42 = vld [vmem:[%s6804_s4 + $0x98] sm:$0xff]  ;;  %v464_v43 = vld [vmem:[%s6804_s4 + $0xa0] sm:$0xff]  ;;  %p6406_p0 = scmp.lt.s32.totalorder %s8114_s25, %s6404_s23  ;;  %p6407_p6 = scmp.lt.s32.totalorder %s6405_s11, %s6399_s22 }
  0xfa   : > { %v465_v44 = vld [vmem:[%s6804_s4 + $0xa8] sm:$0xff]  ;;  %v485_v45 = vpack.c.bf16 %v463_v42, %v462_v41  ;;  %v466_v47 = vld [vmem:[%s6804_s4 + $0xb0] sm:$0xff]  ;;  %v467_v48 = vld [vmem:[%s6804_s4 + $0xb8] sm:$0xff]  ;;  %p6402_p1 = pneg %p6401_p13 }
  0xfb   : > { %v486_v46 = vpack.c.bf16 %v465_v44, %v464_v43  ;;  %v468_v49 = vld [vmem:[%s6804_s4 + $0xc0] sm:$0xff]  ;;  %v469_v50 = vld [vmem:[%s6804_s4 + $0xc8] sm:$0xff]  ;;  %v487_v51 = vpack.c.bf16 %v467_v48, %v466_v47  ;;  %v470_v53 = vld [vmem:[%s6804_s4 + $0xd0] sm:$0xff]  ;;  %p6408_p5 = por %p6407_p6, %p6406_p0 }
  0xfc   : > { %888 = vmatpush1.bf16.msra.mxu1 %v5778_v29  ;;  %v488_v52 = vpack.c.bf16 %v469_v50, %v468_v49  ;;  %v471_v54 = vld [vmem:[%s6804_s4 + $0xd8] sm:$0xff]  ;;  %v472_v55 = vld [vmem:[%s6804_s4 + $0xe0] sm:$0xff]  ;;  %v473_v56 = vld [vmem:[%s6804_s4 + $0xe8] sm:$0xff] }
  0xfd   : > { %889 = vmatprep.subr.bf16.mxu1 %v5779_v31  ;;  %v489_v57 = vpack.c.bf16 %v471_v54, %v470_v53  ;;  %v490_v58 = vpack.c.bf16 %v473_v56, %v472_v55  ;;  %v474_v59 = vld [vmem:[%s6804_s4 + $0xf0] sm:$0xff]  ;;  %v475_v60 = vld [vmem:[%s6804_s4 + $0xf8] sm:$0xff]  ;;  %v5790_v1 = vld [vmem:[#allocation7 + $0x70] ss:$8 sps:$4 sm:$0xff]   ;;  %p6409_p9 = pnand %p6408_p5, %p6402_p1 }
  0xfe   : > { %v491_v61 = vpack.c.bf16 %v475_v60, %v474_v59  ;;  %v5785_v62 = vld [vmem:[#allocation7 + $0x64] ss:$8 sps:$4 sm:$0xff]   ;;  %v5787_v63 = vld [vmem:[#allocation7 + $0x60] ss:$8 sps:$4 sm:$0xff]   ;;  %v5788_v0 = vld [vmem:[#allocation7 + $0x74] ss:$8 sps:$4 sm:$0xff]  }
  0xff   : > { %5189 = vmatmul.mubr.msk.bf16.gmra.mrb[4].mxu0 %vm515_vm0, %v479_v17  ;;  %v6855_v3 = vld [vmem:[#allocation5] ss:$0 sm:$0xff]  ;;  %v5791_v9 = vld [vmem:[#allocation10] ss:$16 sps:$4 sm:$0xff]   ;;  %v5793_v10 = vld [vmem:[#allocation10 + $0x4] ss:$16 sps:$4 sm:$0xff]  }
 0x100   : > { %5192 = vmatprep.mubr.msk.bf16.mxu0 %vm515_vm0, %v480_v19  ;;  %890 = vmatpush1.bf16.msra.mxu1 %v5781_v36  ;;  %v5796_v13 = vld [vmem:[#allocation10 + $0xc] ss:$16 sps:$4 sm:$0xff]   ;;  %v5799_v15 = vld [vmem:[#allocation10 + $0x24] ss:$16 sps:$4 sm:$0xff]   ;;  %v5797_v18 = vld [vmem:[#allocation10 + $0x20] ss:$16 sps:$4 sm:$0xff]  }
 0x101   : > { %891 = vmatprep.subr.bf16.mxu1 %v5782_v37  ;;  %1576 = vmatprep.subr.bf16.mxu0 %v5793_v10  ;;  %v5805_v21 = vld [vmem:[#allocation10 + $0x44] ss:$16 sps:$4 sm:$0xff]   ;;  %v5794_v23 = vld [vmem:[#allocation10 + $0x8] ss:$16 sps:$4 sm:$0xff]   ;;  %v5802_v26 = vld [vmem:[#allocation10 + $0x2c] ss:$16 sps:$4 sm:$0xff]  }
 0x102   : > { %1577 = vmatpush1.bf16.msra.mxu0 %v5791_v9  ;;  %v5803_v29 = vld [vmem:[#allocation10 + $0x40] ss:$16 sps:$4 sm:$0xff]   ;;  %v5811_v32 = vld [vmem:[#allocation10 + $0x64] ss:$16 sps:$4 sm:$0xff]   ;;  %v5800_v36 = vld [vmem:[#allocation10 + $0x28] ss:$16 sps:$4 sm:$0xff]  }
 0x103   : > { %1578 = vmatprep.subr.bf16.mxu0 %v5799_v15  ;;  %v5809_v41 = vld [vmem:[#allocation10 + $0x60] ss:$16 sps:$4 sm:$0xff]   ;;  %v5817_v43 = vld [vmem:[#allocation10 + $0x84] ss:$16 sps:$4 sm:$0xff]   ;;  %v5814_v48 = vld [vmem:[#allocation10 + $0x6c] ss:$16 sps:$4 sm:$0xff]  }
 0x104   : > { %892 = vmatpush1.bf16.msra.mxu1 %v5784_v39  ;;  %v5808_v39 = vld [vmem:[#allocation10 + $0x4c] ss:$16 sps:$4 sm:$0xff]   ;;  %v5823_v54 = vld [vmem:[#allocation10 + $0xa4] ss:$16 sps:$4 sm:$0xff]  }
 0x105   : > { %893 = vmatprep.subr.bf16.mxu1 %v5785_v62 }
 0x106   : > { %1579 = vmatpush1.bf16.msra.mxu0 %v5797_v18  ;;  %v5824_v18 = vld [vmem:[#allocation10 + $0xa8] ss:$16 sps:$4 sm:$0xff]  }
 0x107   : > { %5193 = vmatmul.mubr.msk.bf16.gmra.mrb[8].mxu0 %vm515_vm0, %v481_v28  ;;  %1580 = vmatprep.subr.bf16.mxu0 %v5805_v21  ;;  %v5832_v21 = vld [vmem:[#allocation10 + $0xcc] ss:$16 sps:$4 sm:$0xff]  }
 0x108   : > { %5196 = vmatprep.mubr.msk.bf16.mxu0 %vm515_vm0, %v482_v30  ;;  %894 = vmatpush1.bf16.msra.mxu1 %v5787_v63  ;;  %v5821_v63 = vld [vmem:[#allocation10 + $0xa0] ss:$16 sps:$4 sm:$0xff]  }
 0x109   : > { %895 = vmatprep.subr.bf16.mxu1 %v5788_v0 }
 0x10a   : > { %1581 = vmatpush1.bf16.msra.mxu0 %v5803_v29 }
 0x10b   : > { %1582 = vmatprep.subr.bf16.mxu0 %v5811_v32 }
 0x10c   : > { %896 = vmatpush1.bf16.msra.mxu1 %v5790_v1  ;;  %v5829_v1 = vld [vmem:[#allocation10 + $0xc4] ss:$16 sps:$4 sm:$0xff]  }
 0x10d   : > { %1769 = vmatprep.subr.bf16.mxu1 %v5796_v13 }
 0x10e   : > { %1583 = vmatpush1.bf16.msra.mxu0 %v5809_v41 }
 0x10f   : > { %5197 = vmatmul.mubr.msk.bf16.gmra.mrb[12].mxu0 %vm515_vm0, %v483_v38  ;;  %1584 = vmatprep.subr.bf16.mxu0 %v5817_v43  ;;  %v5844_v43 = vld [vmem:[#allocation10 + $0x10c] ss:$16 sps:$4 sm:$0xff]  }
 0x110   : > { %5200 = vmatprep.mubr.msk.bf16.mxu0 %vm515_vm0, %v484_v40 }
 0x117   : > { %5201 = vmatmul.mubr.msk.bf16.gmra.mrb[16].mxu0 %vm515_vm0, %v485_v45  ;;  %v5806_v45 = vld [vmem:[#allocation10 + $0x48] ss:$16 sps:$4 sm:$0xff]  }
 0x118   : > { %5204 = vmatprep.mubr.msk.bf16.mxu0 %vm515_vm0, %v486_v46 }
 0x11f   : > { %5205 = vmatmul.mubr.msk.bf16.gmra.mrb[20].mxu0 %vm515_vm0, %v487_v51  ;;  %v5815_v51 = vld [vmem:[#allocation10 + $0x80] ss:$16 sps:$4 sm:$0xff]  }
 0x120   : > { %5208 = vmatprep.mubr.msk.bf16.mxu0 %vm515_vm0, %v488_v52  ;;  %1585 = vmatpush1.bf16.msra.mxu0 %v5815_v51 }
 0x121   : > { %1586 = vmatprep.subr.bf16.mxu0 %v5823_v54 }
 0x124   : > { %1587 = vmatpush1.bf16.msra.mxu0 %v5821_v63 }
 0x125   : > { %1588 = vmatprep.subr.bf16.mxu0 %v5829_v1  ;;  %v5856_v1 = vld [vmem:[#allocation10 + $0x14c] ss:$16 sps:$4 sm:$0xff]  }
 0x127   : > { %5209 = vmatmul.mubr.msk.bf16.gmra.mrb[24].mxu0 %vm515_vm0, %v489_v57 }
 0x128   : > { %5212 = vmatprep.mubr.msk.bf16.mxu0 %vm515_vm0, %v490_v58  ;;  %v5812_v58 = vld [vmem:[#allocation10 + $0x68] ss:$16 sps:$4 sm:$0xff]  }
 0x12f   : > { %5213 = vmatmul.mubr.msk.bf16.gmra.mrb[28].mxu0 %vm515_vm0, %v491_v61  ;;  %v5820_v61 = vld [vmem:[#allocation10 + $0x8c] ss:$16 sps:$4 sm:$0xff]  }
 0x1ca   : > { %v5186_v4 = vpop.f32.mrb[0].mxu0 }
 0x1cb   : > { %v607_v5 = vadd.f32 %v5186_v4, %v6855_v3  ;;  %v598_v6 = vpop.f32.mrb[1].mxu0 }
 0x1cc   : > { %v599_v7 = vadd.f32 %v6855_v3, %v598_v6  ;;  %v5187_v8 = vpop.f32.mrb[2].mxu0 }
 0x1cd   : > { %v610_v11 = vadd.f32 %v5187_v8, %v6855_v3  ;;  %v601_v12 = vpop.f32.mrb[3].mxu0  ;;  %v727_v16 = vmax.f32 %v607_v5, 0.0  ;;  %v5818_v5 = vld [vmem:[#allocation10 + $0x88] ss:$16 sps:$4 sm:$0xff]   ;;  %v5826_v8 = vld [vmem:[#allocation10 + $0xac] ss:$16 sps:$4 sm:$0xff]  }
 0x1ce   : > { %v602_v14 = vadd.f32 %v6855_v3, %v601_v12  ;;  %v725_v19 = vmax.f32 %v599_v7, 0.0 }
 0x1cf   : > { %v728_v17 = vmax.f32 %v610_v11, 0.0  ;;  %v5827_v11 = vld [vmem:[#allocation10 + $0xc0] ss:$16 sps:$4 sm:$0xff]  }
 0x1d0   : > { %v726_v20 = vmax.f32 %v602_v14, 0.0  ;;  %v5835_v14 = vld [vmem:[#allocation10 + $0xe4] ss:$16 sps:$4 sm:$0xff]   ;;  %1589 = vmatpush1.bf16.msra.mxu0 %v5827_v11 }
 0x1d1   : > { %v758_v22 = vpack.c.bf16 %v728_v17, %v727_v16  ;;  %1590 = vmatprep.subr.bf16.mxu0 %v5835_v14 }
 0x1d2   : > { %v757_v24 = vpack.c.bf16 %v726_v20, %v725_v19  ;;  %v5190_v25 = vpop.f32.mrb[4].mxu0 }
 0x1d3   : > { %v623_v27 = vadd.f32 %v5190_v25, %v6855_v3  ;;  %v614_v28 = vpop.f32.mrb[5].mxu0  ;;  %v5841_v25 = vld [vmem:[#allocation10 + $0x104] ss:$16 sps:$4 sm:$0xff]  }
 0x1d4   : > { %914 = vmatmul.mubr.bf16.vlgmr.msra.gmra.mrb[0].mxu1 %v757_v24  ;;  %v615_v30 = vadd.f32 %v6855_v3, %v614_v28  ;;  %v5191_v31 = vpop.f32.mrb[6].mxu0 }
 0x1d5   : > { %v731_v33 = vmax.f32 %v623_v27, 0.0  ;;  %v626_v34 = vadd.f32 %v5191_v31, %v6855_v3  ;;  %v617_v35 = vpop.f32.mrb[7].mxu0  ;;  %923 = vmatprep.mubr.bf16.mxu1 %v6499_v2  ;;  %1770 = vmatpush1.bf16.msra.mxu1 %v5794_v23  ;;  %v5833_v23 = vld [vmem:[#allocation10 + $0xe0] ss:$16 sps:$4 sm:$0xff]   ;;  %v5830_v27 = vld [vmem:[#allocation10 + $0xc8] ss:$16 sps:$4 sm:$0xff]  }
 0x1d6   : > { %v729_v37 = vmax.f32 %v615_v30, 0.0  ;;  %v618_v38 = vadd.f32 %v6855_v3, %v617_v35  ;;  %1771 = vmatprep.subr.bf16.mxu1 %v5802_v26  ;;  %v5838_v30 = vld [vmem:[#allocation10 + $0xec] ss:$16 sps:$4 sm:$0xff]   ;;  %1591 = vmatpush1.bf16.msra.mxu0 %v5833_v23  ;;  %v5860_v23 = vld [vmem:[#allocation10 + $0x168] ss:$16 sps:$4 sm:$0xff]  }
 0x1d7   : > { %v732_v40 = vmax.f32 %v626_v34, 0.0  ;;  %1592 = vmatprep.subr.bf16.mxu0 %v5841_v25 }
 0x1d8   : > { %v730_v42 = vmax.f32 %v618_v38, 0.0 }
 0x1d9   : > { %v6866_v44 = vpack.c.bf16 %v732_v40, %v731_v33  ;;  %1772 = vmatpush1.bf16.msra.mxu1 %v5800_v36  ;;  %v5839_v33 = vld [vmem:[#allocation10 + $0x100] ss:$16 sps:$4 sm:$0xff]   ;;  %v5847_v36 = vld [vmem:[#allocation10 + $0x124] ss:$16 sps:$4 sm:$0xff]   ;;  %v5836_v40 = vld [vmem:[#allocation10 + $0xe8] ss:$16 sps:$4 sm:$0xff]  }
 0x1da   : > { %v759_v46 = vpack.c.bf16 %v730_v42, %v729_v37  ;;  %v5194_v47 = vpop.f32.mrb[8].mxu0  ;;  %1773 = vmatprep.subr.bf16.mxu1 %v5808_v39  ;;  %1593 = vmatpush1.bf16.msra.mxu0 %v5839_v33 }
 0x1db   : > { %v639_v49 = vadd.f32 %v5194_v47, %v6855_v3  ;;  %v630_v50 = vpop.f32.mrb[9].mxu0  ;;  %1594 = vmatprep.subr.bf16.mxu0 %v5847_v36  ;;  %v5853_v47 = vld [vmem:[#allocation10 + $0x144] ss:$16 sps:$4 sm:$0xff]  }
 0x1dc   : > { %924 = vmatmul.mubr.bf16.gmra.mrb[4].mxu1 %v758_v22  ;;  %v631_v52 = vadd.f32 %v6855_v3, %v630_v50  ;;  %v5195_v53 = vpop.f32.mrb[10].mxu0 }
 0x1dd   : > { %933 = vmatprep.mubr.bf16.mxu1 %v6499_v2  ;;  %v735_v55 = vmax.f32 %v639_v49, 0.0  ;;  %v642_v56 = vadd.f32 %v5195_v53, %v6855_v3  ;;  %v633_v57 = vpop.f32.mrb[11].mxu0  ;;  %1774 = vmatpush1.bf16.msra.mxu1 %v5806_v45  ;;  %v5842_v49 = vld [vmem:[#allocation10 + $0x108] ss:$16 sps:$4 sm:$0xff]  }
 0x1de   : > { %v733_v59 = vmax.f32 %v631_v52, 0.0  ;;  %v634_v60 = vadd.f32 %v6855_v3, %v633_v57  ;;  %1775 = vmatprep.subr.bf16.mxu1 %v5814_v48  ;;  %v5850_v52 = vld [vmem:[#allocation10 + $0x12c] ss:$16 sps:$4 sm:$0xff]  }
 0x1df   : > { %v736_v62 = vmax.f32 %v642_v56, 0.0 }
 0x1e0   : > { %v734_v0 = vmax.f32 %v634_v60, 0.0 }
 0x1e1   : > { %v6873_v4 = vpack.c.bf16 %v736_v62, %v735_v55  ;;  %1776 = vmatpush1.bf16.msra.mxu1 %v5812_v58  ;;  %v5851_v55 = vld [vmem:[#allocation10 + $0x140] ss:$16 sps:$4 sm:$0xff]   ;;  %v5859_v58 = vld [vmem:[#allocation10 + $0x164] ss:$16 sps:$4 sm:$0xff]   ;;  %v5848_v62 = vld [vmem:[#allocation10 + $0x128] ss:$16 sps:$4 sm:$0xff]  }
 0x1e2   : > { %v6875_v6 = vpack.c.bf16 %v734_v0, %v733_v59  ;;  %v5198_v7 = vpop.f32.mrb[12].mxu0  ;;  %1777 = vmatprep.subr.bf16.mxu1 %v5820_v61 }
 0x1e3   : > { %v655_v9 = vadd.f32 %v5198_v7, %v6855_v3  ;;  %v646_v10 = vpop.f32.mrb[13].mxu0 }
 0x1e4   : > { %934 = vmatmul.mubr.bf16.gmra.mrb[8].mxu1 %v759_v46  ;;  %v647_v12 = vadd.f32 %v6855_v3, %v646_v10  ;;  %v5199_v13 = vpop.f32.mrb[14].mxu0  ;;  %v5854_v10 = vld [vmem:[#allocation10 + $0x148] ss:$16 sps:$4 sm:$0xff]  }
 0x1e5   : > { %943 = vmatprep.mubr.bf16.mxu1 %v6499_v2  ;;  %v739_v15 = vmax.f32 %v655_v9, 0.0  ;;  %v658_v16 = vadd.f32 %v5199_v13, %v6855_v3  ;;  %v649_v17 = vpop.f32.mrb[15].mxu0  ;;  %1778 = vmatpush1.bf16.msra.mxu1 %v5818_v5  ;;  %v5862_v13 = vld [vmem:[#allocation10 + $0x16c] ss:$16 sps:$4 sm:$0xff]  }
 0x1e6   : > { %v737_v19 = vmax.f32 %v647_v12, 0.0  ;;  %v650_v20 = vadd.f32 %v6855_v3, %v649_v17  ;;  %1779 = vmatprep.subr.bf16.mxu1 %v5826_v8  ;;  %v5865_v8 = vld [vmem:[#allocation10 + $0x184] ss:$16 sps:$4 sm:$0xff]  }
 0x1e7   : > { %v740_v22 = vmax.f32 %v658_v16, 0.0  ;;  %v5863_v16 = vld [vmem:[#allocation10 + $0x180] ss:$16 sps:$4 sm:$0xff]  }
 0x1e8   : > { %v738_v24 = vmax.f32 %v650_v20, 0.0 }
 0x1e9   : > { %v6882_v26 = vpack.c.bf16 %v740_v22, %v739_v15  ;;  %1780 = vmatpush1.bf16.msra.mxu1 %v5824_v18 }
 0x1ea   : > { %v6884_v28 = vpack.c.bf16 %v738_v24, %v737_v19  ;;  %v5202_v29 = vpop.f32.mrb[16].mxu0  ;;  %1781 = vmatprep.subr.bf16.mxu1 %v5832_v21  ;;  %v5871_v19 = vld [vmem:[#allocation10 + $0x1a4] ss:$16 sps:$4 sm:$0xff]  }
 0x1eb   : > { %v671_v31 = vadd.f32 %v5202_v29, %v6855_v3  ;;  %v662_v32 = vpop.f32.mrb[17].mxu0 }
 0x1ec   : > { %944 = vmatmul.mubr.bf16.gmra.mrb[12].mxu1 %v6866_v44  ;;  %v663_v34 = vadd.f32 %v6855_v3, %v662_v32  ;;  %v5203_v35 = vpop.f32.mrb[18].mxu0  ;;  %v5845_v44 = vld [vmem:[#allocation10 + $0x120] ss:$16 sps:$4 sm:$0xff]   ;;  %v5866_v32 = vld [vmem:[#allocation10 + $0x188] ss:$16 sps:$4 sm:$0xff]  }
 0x1ed   : > { %953 = vmatprep.mubr.bf16.mxu1 %v6499_v2  ;;  %v743_v37 = vmax.f32 %v671_v31, 0.0  ;;  %v674_v38 = vadd.f32 %v5203_v35, %v6855_v3  ;;  %v665_v39 = vpop.f32.mrb[19].mxu0  ;;  %1782 = vmatpush1.bf16.msra.mxu1 %v5830_v27  ;;  %v5868_v27 = vld [vmem:[#allocation10 + $0x18c] ss:$16 sps:$4 sm:$0xff]  }
 0x1ee   : > { %v741_v41 = vmax.f32 %v663_v34, 0.0  ;;  %v666_v42 = vadd.f32 %v6855_v3, %v665_v39  ;;  %1783 = vmatprep.subr.bf16.mxu1 %v5838_v30  ;;  %1595 = vmatpush1.bf16.msra.mxu0 %v5845_v44  ;;  %v5874_v35 = vld [vmem:[#allocation10 + $0x1ac] ss:$16 sps:$4 sm:$0xff]  }
 0x1ef   : > { %v744_v45 = vmax.f32 %v674_v38, 0.0  ;;  %1596 = vmatprep.subr.bf16.mxu0 %v5853_v47 }
 0x1f0   : > { %v742_v46 = vmax.f32 %v666_v42, 0.0 }
 0x1f1   : > { %v6892_v48 = vpack.c.bf16 %v744_v45, %v743_v37  ;;  %1784 = vmatpush1.bf16.msra.mxu1 %v5836_v40 }
 0x1f2   : > { %v6894_v50 = vpack.c.bf16 %v742_v46, %v741_v41  ;;  %v5206_v51 = vpop.f32.mrb[20].mxu0  ;;  %1785 = vmatprep.subr.bf16.mxu1 %v5844_v43  ;;  %1597 = vmatpush1.bf16.msra.mxu0 %v5851_v55  ;;  %v5872_v43 = vld [vmem:[#allocation10 + $0x1a8] ss:$16 sps:$4 sm:$0xff]  }
 0x1f3   : > { %v687_v53 = vadd.f32 %v5206_v51, %v6855_v3  ;;  %v678_v54 = vpop.f32.mrb[21].mxu0  ;;  %1598 = vmatprep.subr.bf16.mxu0 %v5859_v58  ;;  %v5880_v51 = vld [vmem:[#allocation10 + $0x1cc] ss:$16 sps:$4 sm:$0xff]   ;;  %v5889_v55 = vld [vmem:[#allocation13 + $0x4] ss:$24 sps:$4 sm:$0xff]  }
 0x1f4   : > { %954 = vmatmul.mubr.bf16.gmra.mrb[16].mxu1 %v6875_v6  ;;  %v679_v56 = vadd.f32 %v6855_v3, %v678_v54  ;;  %v5207_v57 = vpop.f32.mrb[22].mxu0  ;;  %v5857_v6 = vld [vmem:[#allocation10 + $0x160] ss:$16 sps:$4 sm:$0xff]   ;;  %v5884_v54 = vld [vmem:[#allocation10 + $0x1e8] ss:$16 sps:$4 sm:$0xff]  }
 0x1f5   : > { %963 = vmatprep.mubr.bf16.mxu1 %v6499_v2  ;;  %v747_v59 = vmax.f32 %v687_v53, 0.0  ;;  %v690_v60 = vadd.f32 %v5207_v57, %v6855_v3  ;;  %v681_v61 = vpop.f32.mrb[23].mxu0  ;;  %1786 = vmatpush1.bf16.msra.mxu1 %v5842_v49  ;;  %v5878_v53 = vld [vmem:[#allocation10 + $0x1c8] ss:$16 sps:$4 sm:$0xff]  }
 0x1f6   : > { %v745_v63 = vmax.f32 %v679_v56, 0.0  ;;  %v682_v0 = vadd.f32 %v6855_v3, %v681_v61  ;;  %1787 = vmatprep.subr.bf16.mxu1 %v5850_v52  ;;  %1599 = vmatpush1.bf16.msra.mxu0 %v5857_v6  ;;  %v5875_v52 = vld [vmem:[#allocation10 + $0x1c0] ss:$16 sps:$4 sm:$0xff]   ;;  %v791_v56 = vlaneseq }
 0x1f7   : > { %v748_v5 = vmax.f32 %v690_v60, 0.0  ;;  %1600 = vmatprep.subr.bf16.mxu0 %v5865_v8 }
 0x1f8   : > { %v746_v7 = vmax.f32 %v682_v0, 0.0  ;;  %v6928_v57 = vshrl.u32 %v791_v56, 7 }
 0x1f9   : > { %v6902_v9 = vpack.c.bf16 %v748_v5, %v747_v59  ;;  %1788 = vmatpush1.bf16.msra.mxu1 %v5848_v62  ;;  %v789_v59 = vld [vmem:[#allocation8] sm:$0x3] }
 0x1fa   : > { %v767_v11 = vpack.c.bf16 %v746_v7, %v745_v63  ;;  %v5210_v12 = vpop.f32.mrb[24].mxu0  ;;  %1789 = vmatprep.subr.bf16.mxu1 %v5856_v1  ;;  %1601 = vmatpush1.bf16.msra.mxu0 %v5863_v16  ;;  %8243 = vst [vmem:[#allocation26_spill] sm:$0xff] %v6928_v57  ;;  %v6931_v58 = vsub.s32 0, %v6928_v57  ;;  %v6934_v60 = vsub.s32 1, %v6928_v57  ;;  %v5887_v16 = vld [vmem:[#allocation13] ss:$24 sps:$4 sm:$0xff]  }
 0x1fb   : > { %v703_v14 = vadd.f32 %v5210_v12, %v6855_v3  ;;  %v694_v15 = vpop.f32.mrb[25].mxu0  ;;  %1602 = vmatprep.subr.bf16.mxu0 %v5871_v19 }
 0x1fc   : > { %964 = vmatmul.mubr.bf16.gmra.mrb[20].mxu1 %v6873_v4  ;;  %v695_v17 = vadd.f32 %v6855_v3, %v694_v15  ;;  %v5211_v18 = vpop.f32.mrb[26].mxu0  ;;  %v5869_v4 = vld [vmem:[#allocation10 + $0x1a0] ss:$16 sps:$4 sm:$0xff]   ;;  %8244 = vst [vmem:[#allocation27_spill] sm:$0xff] %v6931_v58  ;;  %8245 = vst [vmem:[#allocation28_spill] sm:$0xff] %v6934_v60  ;;  %v6937_v61 = vrot.slane %v789_v59, %v6931_v58  ;;  %v6940_v62 = vrot.slane %v789_v59, %v6934_v60 }
 0x1fd   : > { %973 = vmatprep.mubr.bf16.mxu1 %v6499_v2  ;;  %v751_v20 = vmax.f32 %v703_v14, 0.0  ;;  %v706_v21 = vadd.f32 %v5211_v18, %v6855_v3  ;;  %v697_v22 = vpop.f32.mrb[27].mxu0  ;;  %1790 = vmatpush1.bf16.msra.mxu1 %v5854_v10 }
 0x1fe   : > { %v749_v24 = vmax.f32 %v695_v17, 0.0  ;;  %v698_v25 = vadd.f32 %v6855_v3, %v697_v22  ;;  %1791 = vmatprep.subr.bf16.mxu1 %v5862_v13  ;;  %1603 = vmatpush1.bf16.msra.mxu0 %v5869_v4  ;;  %v5916_v17 = vld [vmem:[#allocation13 + $0xc] ss:$24 sps:$4 sm:$0xff]   ;;  %v5890_v4 = vld [vmem:[#allocation13 + $0x30] ss:$24 sps:$4 sm:$0xff]  }
 0x1ff   : > { %v752_v29 = vmax.f32 %v706_v21, 0.0  ;;  %v5914_v21 = vld [vmem:[#allocation13 + $0x8] ss:$24 sps:$4 sm:$0xff]  }
 0x200   : > { %v750_v30 = vmax.f32 %v698_v25, 0.0 }
 0x201   : > { %v770_v31 = vpack.c.bf16 %v752_v29, %v751_v20  ;;  %1792 = vmatpush1.bf16.msra.mxu1 %v5860_v23  ;;  %v5892_v20 = vld [vmem:[#allocation13 + $0x34] ss:$24 sps:$4 sm:$0xff]  }
 0x202   : > { %v769_v33 = vpack.c.bf16 %v750_v30, %v749_v24  ;;  %v5214_v34 = vpop.f32.mrb[28].mxu0  ;;  %1793 = vmatprep.subr.bf16.mxu1 %v5868_v27  ;;  %v5919_v24 = vld [vmem:[#allocation13 + $0x3c] ss:$24 sps:$4 sm:$0xff]  }
 0x203   : > { %v719_v36 = vadd.f32 %v5214_v34, %v6855_v3  ;;  %v710_v37 = vpop.f32.mrb[29].mxu0 }
 0x204   : > { %974 = vmatmul.mubr.bf16.gmra.mrb[24].mxu1 %v6884_v28  ;;  %v711_v38 = vadd.f32 %v6855_v3, %v710_v37  ;;  %v5215_v39 = vpop.f32.mrb[30].mxu0 }
 0x205   : > { %983 = vmatprep.mubr.bf16.mxu1 %v6499_v2  ;;  %v755_v40 = vmax.f32 %v719_v36, 0.0  ;;  %v722_v41 = vadd.f32 %v5215_v39, %v6855_v3  ;;  %v713_v42 = vpop.f32.mrb[31].mxu0  ;;  %1794 = vmatpush1.bf16.msra.mxu1 %v5866_v32  ;;  %v5895_v32 = vld [vmem:[#allocation13 + $0x64] ss:$24 sps:$4 sm:$0xff]   ;;  %v5893_v39 = vld [vmem:[#allocation13 + $0x60] ss:$24 sps:$4 sm:$0xff]  }
 0x206   : > { %v753_v45 = vmax.f32 %v711_v38, 0.0  ;;  %v714_v44 = vadd.f32 %v6855_v3, %v713_v42  ;;  %1795 = vmatprep.subr.bf16.mxu1 %v5874_v35  ;;  %v5877_v3 = vld [vmem:[#allocation10 + $0x1c4] ss:$16 sps:$4 sm:$0xff]  }
 0x207   : > { %v756_v46 = vmax.f32 %v722_v41, 0.0  ;;  %1604 = vmatprep.subr.bf16.mxu0 %v5877_v3 }
 0x208   : > { %v754_v47 = vmax.f32 %v714_v44, 0.0  ;;  %1605 = vmatpush1.bf16.msra.mxu0 %v5875_v52 }
 0x209   : > { %v772_v49 = vpack.c.bf16 %v756_v46, %v755_v40  ;;  %1796 = vmatpush1.bf16.msra.mxu1 %v5872_v43  ;;  %v5925_v40 = vld [vmem:[#allocation13 + $0x6c] ss:$24 sps:$4 sm:$0xff]  }
 0x20a   : > { %v771_v28 = vpack.c.bf16 %v754_v47, %v753_v45  ;;  %1797 = vmatprep.subr.bf16.mxu1 %v5880_v51  ;;  %v5898_v43 = vld [vmem:[#allocation13 + $0x94] ss:$24 sps:$4 sm:$0xff]   ;;  %v5923_v45 = vld [vmem:[#allocation13 + $0x68] ss:$24 sps:$4 sm:$0xff]  }
 0x20b   : > { %v5928_v47 = vld [vmem:[#allocation13 + $0x9c] ss:$24 sps:$4 sm:$0xff]   ;;  %v5896_v51 = vld [vmem:[#allocation13 + $0x90] ss:$24 sps:$4 sm:$0xff]  }
 0x20c   : > { %984 = vmatmul.mubr.bf16.gmra.mrb[28].mxu1 %v6882_v26  ;;  %v5883_v26 = vld [vmem:[#allocation10 + $0x1e4] ss:$16 sps:$4 sm:$0xff]  }
 0x20d   : > { %993 = vmatprep.mubr.bf16.mxu1 %v6499_v2  ;;  %1798 = vmatpush1.bf16.msra.mxu1 %v5878_v53 }
 0x20e   : > { %1606 = vmatprep.subr.bf16.mxu0 %v5883_v26  ;;  %v5901_v26 = vld [vmem:[#allocation13 + $0xc4] ss:$24 sps:$4 sm:$0xff]  }
 0x214   : > { %994 = vmatmul.mubr.bf16.gmra.mrb[32].mxu1 %v6894_v50  ;;  %v5886_v50 = vld [vmem:[#allocation10 + $0x1ec] ss:$16 sps:$4 sm:$0xff]  }
 0x215   : > { %1003 = vmatprep.mubr.bf16.mxu1 %v6499_v2  ;;  %1799 = vmatprep.subr.bf16.mxu1 %v5886_v50  ;;  %v5926_v50 = vld [vmem:[#allocation13 + $0x98] ss:$24 sps:$4 sm:$0xff]  }
 0x216   : > { %1800 = vmatpush1.bf16.msra.mxu1 %v5884_v54 }
 0x217   : > { %3724 = vmatprep.subr.bf16.mxu1 %v5916_v17  ;;  %v5935_v17 = vld [vmem:[#allocation13 + $0xf8] ss:$24 sps:$4 sm:$0xff]  }
 0x21c   : > { %1004 = vmatmul.mubr.bf16.gmra.mrb[36].mxu1 %v6892_v48  ;;  %v5881_v48 = vld [vmem:[#allocation10 + $0x1e0] ss:$16 sps:$4 sm:$0xff]  }
 0x21d   : > { %1013 = vmatprep.mubr.bf16.mxu1 %v6499_v2  ;;  %1607 = vmatpush1.bf16.msra.mxu0 %v5881_v48 }
 0x21e   : > { %3338 = vmatprep.subr.bf16.mxu0 %v5889_v55 }
 0x224   : > { %1014 = vmatmul.mubr.bf16.gmra.mrb[40].mxu1 %v767_v11 }
 0x225   : > { %1023 = vmatprep.mubr.bf16.mxu1 %v6499_v2 }
 0x22c   : > { %1024 = vmatmul.mubr.bf16.gmra.mrb[44].mxu1 %v6902_v9 }
 0x22d   : > { %1033 = vmatprep.mubr.bf16.mxu1 %v6499_v2 }
 0x234   : > { %1034 = vmatmul.mubr.bf16.gmra.mrb[48].mxu1 %v769_v33  ;;  %v5917_v33 = vld [vmem:[#allocation13 + $0x38] ss:$24 sps:$4 sm:$0xff]  }
 0x235   : > { %1043 = vmatprep.mubr.bf16.mxu1 %v6499_v2 }
 0x23c   : > { %1044 = vmatmul.mubr.bf16.gmra.mrb[52].mxu1 %v770_v31 }
 0x23d   : > { %1053 = vmatprep.mubr.bf16.mxu1 %v6499_v2 }
 0x244   : > { %1054 = vmatmul.mubr.bf16.gmra.mrb[56].mxu1 %v771_v28 }
 0x245   : > { %1063 = vmatprep.mubr.bf16.mxu1 %v6499_v2 }
 0x24c   : > { %1064 = vmatmul.mubr.bf16.gmra.mrb[60].mxu1 %v772_v49 }
 0x2a7   : > { %v915_v2 = vpop.f32.mrb[0].mxu1 }
 0x2a8   : > { %v916_v63 = vadd.f32 %v915_v2, %v6937_v61  ;;  %v917_v0 = vpop.f32.mrb[1].mxu1  ;;  %v5899_v2 = vld [vmem:[#allocation13 + $0xc0] ss:$24 sps:$4 sm:$0xff]  }
 0x2a9   : > { %v918_v1 = vadd.f32 %v917_v0, %v6940_v62  ;;  %v919_v5 = vpop.f32.mrb[2].mxu1 }
 0x2aa   : > { %v920_v6 = vadd.f32 %v919_v5, %v6937_v61  ;;  %v921_v7 = vpop.f32.mrb[3].mxu1  ;;  %v1074_v9 = vmax.f32 %v916_v63, 0.0  ;;  %v5934_v63 = vld [vmem:[#allocation13 + $0xcc] ss:$24 sps:$4 sm:$0xff]  }
 0x2ab   : > { %v922_v8 = vadd.f32 %v921_v7, %v6940_v62  ;;  %v1075_v11 = vmax.f32 %v918_v1, 0.0  ;;  %v5904_v5 = vld [vmem:[#allocation13 + $0xf4] ss:$24 sps:$4 sm:$0xff]  }
 0x2ac   : > { %v1076_v10 = vmax.f32 %v920_v6, 0.0  ;;  %v5932_v6 = vld [vmem:[#allocation13 + $0xc8] ss:$24 sps:$4 sm:$0xff]  }
 0x2ad   : > { %v1077_v12 = vmax.f32 %v922_v8, 0.0 }
 0x2ae   : > { %v1138_v13 = vpack.c.bf16 %v1076_v10, %v1074_v9  ;;  %v5937_v9 = vld [vmem:[#allocation13 + $0xfc] ss:$24 sps:$4 sm:$0xff]  }
 0x2af   : > { %v1139_v14 = vpack.c.bf16 %v1077_v12, %v1075_v11  ;;  %v925_v15 = vpop.f32.mrb[4].mxu1 }
 0x2b0   : > { %v926_v18 = vadd.f32 %v925_v15, %v6937_v61  ;;  %v927_v19 = vpop.f32.mrb[5].mxu1 }
 0x2b1   : > { %v928_v22 = vadd.f32 %v927_v19, %v6940_v62  ;;  %v929_v23 = vpop.f32.mrb[6].mxu1  ;;  %1608 = vmatprep.mubr.bf16.mxu0 %v1139_v14  ;;  %1801 = vmatprep.mubr.bf16.mxu1 %v1139_v14 }
 0x2b2   : > { %v930_v25 = vadd.f32 %v929_v23, %v6937_v61  ;;  %v931_v27 = vpop.f32.mrb[7].mxu1  ;;  %1609 = vmatmul.mubr.bf16.vlgmr.msra.gmra.mrb[32].mxu0 %v1138_v13  ;;  %1802 = vmatmul.mubr.bf16.vlgmr.msra.gmra.mrb[64].mxu1 %v1138_v13  ;;  %v1078_v30 = vmax.f32 %v926_v18, 0.0  ;;  %v5902_v13 = vld [vmem:[#allocation13 + $0xf0] ss:$24 sps:$4 sm:$0xff]   ;;  %v5905_v23 = vld [vmem:[#allocation13 + $0x120] ss:$24 sps:$4 sm:$0xff]  }
 0x2b3   : > { %v932_v29 = vadd.f32 %v931_v27, %v6940_v62  ;;  %3339 = vmatpush1.bf16.msra.mxu0 %v5887_v16  ;;  %3725 = vmatpush1.bf16.msra.mxu1 %v5914_v21  ;;  %v1079_v34 = vmax.f32 %v928_v22, 0.0  ;;  %v5907_v16 = vld [vmem:[#allocation13 + $0x124] ss:$24 sps:$4 sm:$0xff]  }
 0x2b4   : > { %v1080_v31 = vmax.f32 %v930_v25, 0.0  ;;  %3340 = vmatprep.subr.bf16.mxu0 %v5892_v20  ;;  %3726 = vmatprep.subr.bf16.mxu1 %v5919_v24  ;;  %v5943_v24 = vld [vmem:[#allocation13 + $0x12c] ss:$24 sps:$4 sm:$0xff]  }
 0x2b5   : > { %v1081_v35 = vmax.f32 %v932_v29, 0.0  ;;  %v5910_v29 = vld [vmem:[#allocation13 + $0x154] ss:$24 sps:$4 sm:$0xff]  }
 0x2b6   : > { %v1140_v36 = vpack.c.bf16 %v1080_v31, %v1078_v30 }
 0x2b7   : > { %v1141_v37 = vpack.c.bf16 %v1081_v35, %v1079_v34  ;;  %v935_v38 = vpop.f32.mrb[8].mxu1  ;;  %3341 = vmatpush1.bf16.msra.mxu0 %v5890_v4  ;;  %3727 = vmatpush1.bf16.msra.mxu1 %v5917_v33  ;;  %v5941_v4 = vld [vmem:[#allocation13 + $0x128] ss:$24 sps:$4 sm:$0xff]  }
 0x2b8   : > { %v936_v41 = vadd.f32 %v935_v38, %v6937_v61  ;;  %v937_v42 = vpop.f32.mrb[9].mxu1  ;;  %3342 = vmatprep.subr.bf16.mxu0 %v5895_v32  ;;  %3728 = vmatprep.subr.bf16.mxu1 %v5925_v40  ;;  %v5946_v32 = vld [vmem:[#allocation13 + $0x15c] ss:$24 sps:$4 sm:$0xff]   ;;  %v5944_v40 = vld [vmem:[#allocation13 + $0x158] ss:$24 sps:$4 sm:$0xff]  }
 0x2b9   : > { %v938_v44 = vadd.f32 %v937_v42, %v6940_v62  ;;  %v939_v46 = vpop.f32.mrb[10].mxu1  ;;  %1618 = vmatprep.mubr.bf16.mxu0 %v1141_v37  ;;  %1811 = vmatprep.mubr.bf16.mxu1 %v1141_v37 }
 0x2ba   : > { %v940_v49 = vadd.f32 %v939_v46, %v6937_v61  ;;  %v941_v28 = vpop.f32.mrb[11].mxu1  ;;  %1619 = vmatmul.mubr.bf16.gmra.mrb[36].mxu0 %v1140_v36  ;;  %1812 = vmatmul.mubr.bf16.gmra.mrb[68].mxu1 %v1140_v36  ;;  %v1082_v52 = vmax.f32 %v936_v41, 0.0  ;;  %v5908_v36 = vld [vmem:[#allocation13 + $0x150] ss:$24 sps:$4 sm:$0xff]   ;;  %v5911_v46 = vld [vmem:[#allocation13 + $0x180] ss:$24 sps:$4 sm:$0xff]  }
 0x2bb   : > { %v942_v3 = vadd.f32 %v941_v28, %v6940_v62  ;;  %3343 = vmatpush1.bf16.msra.mxu0 %v5893_v39  ;;  %3729 = vmatpush1.bf16.msra.mxu1 %v5923_v45  ;;  %v1083_v48 = vmax.f32 %v938_v44, 0.0  ;;  %v5913_v39 = vld [vmem:[#allocation13 + $0x184] ss:$24 sps:$4 sm:$0xff]  }
 0x2bc   : > { %v1084_v53 = vmax.f32 %v940_v49, 0.0  ;;  %3344 = vmatprep.subr.bf16.mxu0 %v5898_v43  ;;  %3730 = vmatprep.subr.bf16.mxu1 %v5928_v47  ;;  %v5952_v47 = vld [vmem:[#allocation13 + $0x18c] ss:$24 sps:$4 sm:$0xff]  }
 0x2bd   : > { %v1085_v54 = vmax.f32 %v942_v3, 0.0  ;;  %v5922_v3 = vld [vmem:[#allocation13 + $0x1b4] ss:$24 sps:$4 sm:$0xff]  }
 0x2be   : > { %v1142_v55 = vpack.c.bf16 %v1084_v53, %v1082_v52 }
 0x2bf   : > { %v1143_v56 = vpack.c.bf16 %v1085_v54, %v1083_v48  ;;  %v945_v59 = vpop.f32.mrb[12].mxu1  ;;  %3345 = vmatpush1.bf16.msra.mxu0 %v5896_v51  ;;  %3731 = vmatpush1.bf16.msra.mxu1 %v5926_v50  ;;  %v5950_v51 = vld [vmem:[#allocation13 + $0x188] ss:$24 sps:$4 sm:$0xff]  }
 0x2c0   : > { %v946_v0 = vadd.f32 %v945_v59, %v6937_v61  ;;  %v947_v1 = vpop.f32.mrb[13].mxu1  ;;  %3346 = vmatprep.subr.bf16.mxu0 %v5901_v26  ;;  %3732 = vmatprep.subr.bf16.mxu1 %v5934_v63  ;;  %v5955_v26 = vld [vmem:[#allocation13 + $0x1bc] ss:$24 sps:$4 sm:$0xff]   ;;  %v5953_v63 = vld [vmem:[#allocation13 + $0x1b8] ss:$24 sps:$4 sm:$0xff]  }
 0x2c1   : > { %v948_v7 = vadd.f32 %v947_v1, %v6940_v62  ;;  %v949_v8 = vpop.f32.mrb[14].mxu1  ;;  %1628 = vmatprep.mubr.bf16.mxu0 %v1143_v56  ;;  %1821 = vmatprep.mubr.bf16.mxu1 %v1143_v56 }
 0x2c2   : > { %v950_v10 = vadd.f32 %v949_v8, %v6937_v61  ;;  %v951_v11 = vpop.f32.mrb[15].mxu1  ;;  %1629 = vmatmul.mubr.bf16.gmra.mrb[40].mxu0 %v1142_v55  ;;  %1822 = vmatmul.mubr.bf16.gmra.mrb[72].mxu1 %v1142_v55  ;;  %v1086_v14 = vmax.f32 %v946_v0, 0.0  ;;  %v5920_v55 = vld [vmem:[#allocation13 + $0x1b0] ss:$24 sps:$4 sm:$0xff]   ;;  %v5929_v8 = vld [vmem:[#allocation13 + $0x1e0] ss:$24 sps:$4 sm:$0xff]  }
 0x2c3   : > { %v952_v12 = vadd.f32 %v951_v11, %v6940_v62  ;;  %3347 = vmatpush1.bf16.msra.mxu0 %v5899_v2  ;;  %3733 = vmatpush1.bf16.msra.mxu1 %v5932_v6  ;;  %v1087_v18 = vmax.f32 %v948_v7, 0.0  ;;  %v5931_v2 = vld [vmem:[#allocation13 + $0x1e4] ss:$24 sps:$4 sm:$0xff]  }
 0x2c4   : > { %v1088_v15 = vmax.f32 %v950_v10, 0.0  ;;  %3348 = vmatprep.subr.bf16.mxu0 %v5904_v5  ;;  %3734 = vmatprep.subr.bf16.mxu1 %v5937_v9  ;;  %v5961_v9 = vld [vmem:[#allocation13 + $0x1ec] ss:$24 sps:$4 sm:$0xff]  }
 0x2c5   : > { %v1089_v19 = vmax.f32 %v952_v12, 0.0  ;;  %v5940_v12 = vld [vmem:[#allocation13 + $0x214] ss:$24 sps:$4 sm:$0xff]  }
 0x2c6   : > { %v1144_v20 = vpack.c.bf16 %v1088_v15, %v1086_v14 }
 0x2c7   : > { %v1145_v21 = vpack.c.bf16 %v1089_v19, %v1087_v18  ;;  %v955_v22 = vpop.f32.mrb[16].mxu1  ;;  %3349 = vmatpush1.bf16.msra.mxu0 %v5902_v13  ;;  %3735 = vmatpush1.bf16.msra.mxu1 %v5935_v17  ;;  %v5959_v13 = vld [vmem:[#allocation13 + $0x1e8] ss:$24 sps:$4 sm:$0xff]  }
 0x2c8   : > { %v956_v25 = vadd.f32 %v955_v22, %v6937_v61  ;;  %v957_v27 = vpop.f32.mrb[17].mxu1  ;;  %3350 = vmatprep.subr.bf16.mxu0 %v5907_v16  ;;  %3736 = vmatprep.subr.bf16.mxu1 %v5943_v24  ;;  %v5964_v16 = vld [vmem:[#allocation13 + $0x21c] ss:$24 sps:$4 sm:$0xff]   ;;  %v5962_v24 = vld [vmem:[#allocation13 + $0x218] ss:$24 sps:$4 sm:$0xff]  }
 0x2c9   : > { %v958_v30 = vadd.f32 %v957_v27, %v6940_v62  ;;  %v959_v31 = vpop.f32.mrb[18].mxu1  ;;  %1638 = vmatprep.mubr.bf16.mxu0 %v1145_v21  ;;  %1831 = vmatprep.mubr.bf16.mxu1 %v1145_v21 }
 0x2ca   : > { %v960_v33 = vadd.f32 %v959_v31, %v6937_v61  ;;  %v961_v34 = vpop.f32.mrb[19].mxu1  ;;  %1639 = vmatmul.mubr.bf16.gmra.mrb[44].mxu0 %v1144_v20  ;;  %1832 = vmatmul.mubr.bf16.gmra.mrb[76].mxu1 %v1144_v20  ;;  %v1090_v37 = vmax.f32 %v956_v25, 0.0  ;;  %v5938_v20 = vld [vmem:[#allocation13 + $0x210] ss:$24 sps:$4 sm:$0xff]   ;;  %v5947_v31 = vld [vmem:[#allocation13 + $0x240] ss:$24 sps:$4 sm:$0xff]  }
 0x2cb   : > { %v962_v35 = vadd.f32 %v961_v34, %v6940_v62  ;;  %3351 = vmatpush1.bf16.msra.mxu0 %v5905_v23  ;;  %3737 = vmatpush1.bf16.msra.mxu1 %v5941_v4  ;;  %v1091_v41 = vmax.f32 %v958_v30, 0.0  ;;  %v5949_v23 = vld [vmem:[#allocation13 + $0x244] ss:$24 sps:$4 sm:$0xff]  }
 0x2cc   : > { %v1092_v38 = vmax.f32 %v960_v33, 0.0  ;;  %3352 = vmatprep.subr.bf16.mxu0 %v5910_v29  ;;  %3738 = vmatprep.subr.bf16.mxu1 %v5946_v32  ;;  %v5970_v32 = vld [vmem:[#allocation13 + $0x24c] ss:$24 sps:$4 sm:$0xff]  }
 0x2cd   : > { %v1093_v42 = vmax.f32 %v962_v35, 0.0  ;;  %v5958_v35 = vld [vmem:[#allocation13 + $0x274] ss:$24 sps:$4 sm:$0xff]  }
 0x2ce   : > { %v1146_v43 = vpack.c.bf16 %v1092_v38, %v1090_v37 }
 0x2cf   : > { %v1147_v45 = vpack.c.bf16 %v1093_v42, %v1091_v41  ;;  %v965_v44 = vpop.f32.mrb[20].mxu1  ;;  %3353 = vmatpush1.bf16.msra.mxu0 %v5908_v36  ;;  %3739 = vmatpush1.bf16.msra.mxu1 %v5944_v40  ;;  %v5968_v36 = vld [vmem:[#allocation13 + $0x248] ss:$24 sps:$4 sm:$0xff]  }
 0x2d0   : > { %v966_v49 = vadd.f32 %v965_v44, %v6937_v61  ;;  %v967_v28 = vpop.f32.mrb[21].mxu1  ;;  %3354 = vmatprep.subr.bf16.mxu0 %v5913_v39  ;;  %3740 = vmatprep.subr.bf16.mxu1 %v5952_v47  ;;  %v5973_v39 = vld [vmem:[#allocation13 + $0x27c] ss:$24 sps:$4 sm:$0xff]   ;;  %v5971_v47 = vld [vmem:[#allocation13 + $0x278] ss:$24 sps:$4 sm:$0xff]  }
 0x2d1   : > { %v968_v52 = vadd.f32 %v967_v28, %v6940_v62  ;;  %v969_v53 = vpop.f32.mrb[22].mxu1  ;;  %1648 = vmatprep.mubr.bf16.mxu0 %v1147_v45  ;;  %1841 = vmatprep.mubr.bf16.mxu1 %v1147_v45 }
 0x2d2   : > { %v970_v50 = vadd.f32 %v969_v53, %v6937_v61  ;;  %v971_v48 = vpop.f32.mrb[23].mxu1  ;;  %1649 = vmatmul.mubr.bf16.gmra.mrb[48].mxu0 %v1146_v43  ;;  %1842 = vmatmul.mubr.bf16.gmra.mrb[80].mxu1 %v1146_v43  ;;  %v1094_v56 = vmax.f32 %v966_v49, 0.0  ;;  %v5956_v43 = vld [vmem:[#allocation13 + $0x270] ss:$24 sps:$4 sm:$0xff]   ;;  %v5965_v53 = vld [vmem:[#allocation13 + $0x2a0] ss:$24 sps:$4 sm:$0xff]  }
 0x2d3   : > { %v972_v54 = vadd.f32 %v971_v48, %v6940_v62  ;;  %3355 = vmatpush1.bf16.msra.mxu0 %v5911_v46  ;;  %3741 = vmatpush1.bf16.msra.mxu1 %v5950_v51  ;;  %v1095_v0 = vmax.f32 %v968_v52, 0.0  ;;  %v5967_v46 = vld [vmem:[#allocation13 + $0x2a4] ss:$24 sps:$4 sm:$0xff]  }
 0x2d4   : > { %v1096_v59 = vmax.f32 %v970_v50, 0.0  ;;  %3356 = vmatprep.subr.bf16.mxu0 %v5922_v3  ;;  %3742 = vmatprep.subr.bf16.mxu1 %v5955_v26 }
 0x2d5   : > { %v1097_v1 = vmax.f32 %v972_v54, 0.0 }
 0x2d6   : > { %v1148_v5 = vpack.c.bf16 %v1096_v59, %v1094_v56 }
 0x2d7   : > { %v1149_v6 = vpack.c.bf16 %v1097_v1, %v1095_v0  ;;  %v975_v7 = vpop.f32.mrb[24].mxu1  ;;  %3357 = vmatpush1.bf16.msra.mxu0 %v5920_v55  ;;  %3743 = vmatpush1.bf16.msra.mxu1 %v5953_v63 }
 0x2d8   : > { %v976_v10 = vadd.f32 %v975_v7, %v6937_v61  ;;  %v977_v11 = vpop.f32.mrb[25].mxu1  ;;  %3358 = vmatprep.subr.bf16.mxu0 %v5931_v2  ;;  %3744 = vmatprep.subr.bf16.mxu1 %v5961_v9 }
 0x2d9   : > { %v978_v14 = vadd.f32 %v977_v11, %v6940_v62  ;;  %v979_v15 = vpop.f32.mrb[26].mxu1  ;;  %1658 = vmatprep.mubr.bf16.mxu0 %v1149_v6  ;;  %1851 = vmatprep.mubr.bf16.mxu1 %v1149_v6 }
 0x2da   : > { %v980_v17 = vadd.f32 %v979_v15, %v6937_v61  ;;  %v981_v18 = vpop.f32.mrb[27].mxu1  ;;  %1659 = vmatmul.mubr.bf16.gmra.mrb[52].mxu0 %v1148_v5  ;;  %1852 = vmatmul.mubr.bf16.gmra.mrb[84].mxu1 %v1148_v5  ;;  %v1098_v21 = vmax.f32 %v976_v10, 0.0 }
 0x2db   : > { %v982_v19 = vadd.f32 %v981_v18, %v6940_v62  ;;  %3359 = vmatpush1.bf16.msra.mxu0 %v5929_v8  ;;  %3745 = vmatpush1.bf16.msra.mxu1 %v5959_v13  ;;  %v1099_v25 = vmax.f32 %v978_v14, 0.0 }
 0x2dc   : > { %v1100_v22 = vmax.f32 %v980_v17, 0.0  ;;  %3360 = vmatprep.subr.bf16.mxu0 %v5940_v12  ;;  %3746 = vmatprep.subr.bf16.mxu1 %v5964_v16 }
 0x2dd   : > { %v1101_v27 = vmax.f32 %v982_v19, 0.0 }
 0x2de   : > { %v1150_v29 = vpack.c.bf16 %v1100_v22, %v1098_v21 }
 0x2df   : > { %v1151_v4 = vpack.c.bf16 %v1101_v27, %v1099_v25  ;;  %v985_v30 = vpop.f32.mrb[28].mxu1  ;;  %3361 = vmatpush1.bf16.msra.mxu0 %v5938_v20  ;;  %3747 = vmatpush1.bf16.msra.mxu1 %v5962_v24 }
 0x2e0   : > { %v986_v33 = vadd.f32 %v985_v30, %v6937_v61  ;;  %v987_v34 = vpop.f32.mrb[29].mxu1  ;;  %3362 = vmatprep.subr.bf16.mxu0 %v5949_v23  ;;  %3748 = vmatprep.subr.bf16.mxu1 %v5970_v32 }
 0x2e1   : > { %v988_v37 = vadd.f32 %v987_v34, %v6940_v62  ;;  %v989_v38 = vpop.f32.mrb[30].mxu1  ;;  %1668 = vmatprep.mubr.bf16.mxu0 %v1151_v4  ;;  %1861 = vmatprep.mubr.bf16.mxu1 %v1151_v4 }
 0x2e2   : > { %v990_v40 = vadd.f32 %v989_v38, %v6937_v61  ;;  %v991_v41 = vpop.f32.mrb[31].mxu1  ;;  %1669 = vmatmul.mubr.bf16.gmra.mrb[56].mxu0 %v1150_v29  ;;  %1862 = vmatmul.mubr.bf16.gmra.mrb[88].mxu1 %v1150_v29  ;;  %v1102_v45 = vmax.f32 %v986_v33, 0.0 }
 0x2e3   : > { %v992_v42 = vadd.f32 %v991_v41, %v6940_v62  ;;  %3363 = vmatpush1.bf16.msra.mxu0 %v5947_v31  ;;  %3749 = vmatpush1.bf16.msra.mxu1 %v5968_v36  ;;  %v1103_v49 = vmax.f32 %v988_v37, 0.0 }
 0x2e4   : > { %v1104_v44 = vmax.f32 %v990_v40, 0.0  ;;  %3364 = vmatprep.subr.bf16.mxu0 %v5958_v35  ;;  %3750 = vmatprep.subr.bf16.mxu1 %v5973_v39 }
 0x2e5   : > { %v1105_v28 = vmax.f32 %v992_v42, 0.0 }
 0x2e6   : > { %v1152_v3 = vpack.c.bf16 %v1104_v44, %v1102_v45 }
 0x2e7   : > { %v1153_v51 = vpack.c.bf16 %v1105_v28, %v1103_v49  ;;  %v995_v52 = vpop.f32.mrb[32].mxu1  ;;  %3365 = vmatpush1.bf16.msra.mxu0 %v5956_v43  ;;  %3751 = vmatpush1.bf16.msra.mxu1 %v5971_v47  ;;  %v5979_v28 = vld [vmem:[#allocation13 + $0x2ac] ss:$24 sps:$4 sm:$0xff]  }
 0x2e8   : > { %v996_v26 = vadd.f32 %v995_v52, %v6937_v61  ;;  %v997_v50 = vpop.f32.mrb[33].mxu1  ;;  %3366 = vmatprep.subr.bf16.mxu0 %v5967_v46  ;;  %v5977_v52 = vld [vmem:[#allocation13 + $0x2a8] ss:$24 sps:$4 sm:$0xff]   ;;  %3752 = vmatprep.subr.bf16.mxu1 %v5979_v28 }
 0x2e9   : > { %v998_v48 = vadd.f32 %v997_v50, %v6940_v62  ;;  %v999_v54 = vpop.f32.mrb[34].mxu1  ;;  %1678 = vmatprep.mubr.bf16.mxu0 %v1153_v51  ;;  %1871 = vmatprep.mubr.bf16.mxu1 %v1153_v51 }
 0x2ea   : > { %v1000_v55 = vadd.f32 %v999_v54, %v6937_v61  ;;  %v1001_v56 = vpop.f32.mrb[35].mxu1  ;;  %1679 = vmatmul.mubr.bf16.gmra.mrb[60].mxu0 %v1152_v3  ;;  %1872 = vmatmul.mubr.bf16.gmra.mrb[92].mxu1 %v1152_v3  ;;  %v1106_v2 = vmax.f32 %v996_v26, 0.0 }
 0x2eb   : > { %v1002_v59 = vadd.f32 %v1001_v56, %v6940_v62  ;;  %3367 = vmatpush1.bf16.msra.mxu0 %v5965_v53  ;;  %v1107_v0 = vmax.f32 %v998_v48, 0.0  ;;  %v5976_v56 = vld [vmem:[#allocation13 + $0x2d4] ss:$24 sps:$4 sm:$0xff]   ;;  %3753 = vmatpush1.bf16.msra.mxu1 %v5977_v52 }
 0x2ec   : > { %v1108_v63 = vmax.f32 %v1000_v55, 0.0  ;;  %3368 = vmatprep.subr.bf16.mxu0 %v5976_v56 }
 0x2ed   : > { %v1109_v1 = vmax.f32 %v1002_v59, 0.0  ;;  %v5982_v59 = vld [vmem:[#allocation13 + $0x2dc] ss:$24 sps:$4 sm:$0xff]  }
 0x2ee   : > { %v1154_v5 = vpack.c.bf16 %v1108_v63, %v1106_v2  ;;  %v5974_v63 = vld [vmem:[#allocation13 + $0x2d0] ss:$24 sps:$4 sm:$0xff]   ;;  %3754 = vmatprep.subr.bf16.mxu1 %v5982_v59 }
 0x2ef   : > { %v1155_v6 = vpack.c.bf16 %v1109_v1, %v1107_v0  ;;  %v1005_v7 = vpop.f32.mrb[36].mxu1  ;;  %v5980_v0 = vld [vmem:[#allocation13 + $0x2d8] ss:$24 sps:$4 sm:$0xff]   ;;  %3369 = vmatpush1.bf16.msra.mxu0 %v5974_v63 }
 0x2f0   : > { %v1006_v8 = vadd.f32 %v1005_v7, %v6937_v61  ;;  %v1007_v9 = vpop.f32.mrb[37].mxu1  ;;  %3755 = vmatpush1.bf16.msra.mxu1 %v5980_v0 }
 0x2f1   : > { %v1008_v10 = vadd.f32 %v1007_v9, %v6940_v62  ;;  %v1009_v11 = vpop.f32.mrb[38].mxu1  ;;  %1688 = vmatprep.mubr.bf16.mxu0 %v1155_v6  ;;  %1881 = vmatprep.mubr.bf16.mxu1 %v1155_v6 }
 0x2f2   : > { %v1010_v12 = vadd.f32 %v1009_v11, %v6937_v61  ;;  %v1011_v13 = vpop.f32.mrb[39].mxu1  ;;  %1689 = vmatmul.mubr.bf16.gmra.mrb[64].mxu0 %v1154_v5  ;;  %1882 = vmatmul.mubr.bf16.gmra.mrb[96].mxu1 %v1154_v5  ;;  %v1110_v15 = vmax.f32 %v1006_v8, 0.0 }
 0x2f3   : > { %v1012_v14 = vadd.f32 %v1011_v13, %v6940_v62  ;;  %v1111_v17 = vmax.f32 %v1008_v10, 0.0 }
 0x2f4   : > { %v1112_v16 = vmax.f32 %v1010_v12, 0.0 }
 0x2f5   : > { %v1113_v18 = vmax.f32 %v1012_v14, 0.0 }
 0x2f6   : > { %v1156_v19 = vpack.c.bf16 %v1112_v16, %v1110_v15 }
 0x2f7   : > { %v1157_v20 = vpack.c.bf16 %v1113_v18, %v1111_v17  ;;  %v1015_v21 = vpop.f32.mrb[40].mxu1 }
 0x2f8   : > { %v1016_v22 = vadd.f32 %v1015_v21, %v6937_v61  ;;  %v1017_v23 = vpop.f32.mrb[41].mxu1 }
 0x2f9   : > { %v1018_v24 = vadd.f32 %v1017_v23, %v6940_v62  ;;  %v1019_v25 = vpop.f32.mrb[42].mxu1  ;;  %1698 = vmatprep.mubr.bf16.mxu0 %v1157_v20  ;;  %1891 = vmatprep.mubr.bf16.mxu1 %v1157_v20  ;;  %v5985_v20 = vld [vmem:[#allocation13 + $0x304] ss:$24 sps:$4 sm:$0xff]  }
 0x2fa   : > { %v1020_v27 = vadd.f32 %v1019_v25, %v6937_v61  ;;  %v1021_v29 = vpop.f32.mrb[43].mxu1  ;;  %1699 = vmatmul.mubr.bf16.gmra.mrb[68].mxu0 %v1156_v19  ;;  %1892 = vmatmul.mubr.bf16.gmra.mrb[100].mxu1 %v1156_v19  ;;  %v1114_v30 = vmax.f32 %v1016_v22, 0.0 }
 0x2fb   : > { %v1022_v4 = vadd.f32 %v1021_v29, %v6940_v62  ;;  %v1115_v32 = vmax.f32 %v1018_v24, 0.0  ;;  %3531 = vmatprep.subr.bf16.mxu0 %v5985_v20 }
 0x2fc   : > { %v1116_v31 = vmax.f32 %v1020_v27, 0.0 }
 0x2fd   : > { %v1117_v33 = vmax.f32 %v1022_v4, 0.0 }
 0x2fe   : > { %v1158_v34 = vpack.c.bf16 %v1116_v31, %v1114_v30 }
 0x2ff   : > { %v1159_v35 = vpack.c.bf16 %v1117_v33, %v1115_v32  ;;  %v1025_v36 = vpop.f32.mrb[44].mxu1 }
 0x300   : > { %v1026_v37 = vadd.f32 %v1025_v36, %v6937_v61  ;;  %v1027_v38 = vpop.f32.mrb[45].mxu1 }
 0x301   : > { %v1028_v39 = vadd.f32 %v1027_v38, %v6940_v62  ;;  %v1029_v40 = vpop.f32.mrb[46].mxu1  ;;  %1708 = vmatprep.mubr.bf16.mxu0 %v1159_v35  ;;  %1901 = vmatprep.mubr.bf16.mxu1 %v1159_v35 }
 0x302   : > { %v1030_v41 = vadd.f32 %v1029_v40, %v6937_v61  ;;  %v1031_v42 = vpop.f32.mrb[47].mxu1  ;;  %1709 = vmatmul.mubr.bf16.gmra.mrb[72].mxu0 %v1158_v34  ;;  %1902 = vmatmul.mubr.bf16.gmra.mrb[104].mxu1 %v1158_v34  ;;  %v1118_v45 = vmax.f32 %v1026_v37, 0.0 }
 0x303   : > { %v1032_v43 = vadd.f32 %v1031_v42, %v6940_v62  ;;  %v1119_v46 = vmax.f32 %v1028_v39, 0.0 }
 0x304   : > { %v1120_v44 = vmax.f32 %v1030_v41, 0.0 }
 0x305   : > { %v1121_v47 = vmax.f32 %v1032_v43, 0.0 }
 0x306   : > { %v1160_v49 = vpack.c.bf16 %v1120_v44, %v1118_v45 }
 0x307   : > { %v1161_v3 = vpack.c.bf16 %v1121_v47, %v1119_v46  ;;  %v1035_v51 = vpop.f32.mrb[48].mxu1 }
 0x308   : > { %v1036_v53 = vadd.f32 %v1035_v51, %v6937_v61  ;;  %v1037_v26 = vpop.f32.mrb[49].mxu1 }
 0x309   : > { %v1038_v50 = vadd.f32 %v1037_v26, %v6940_v62  ;;  %v1039_v48 = vpop.f32.mrb[50].mxu1  ;;  %1718 = vmatprep.mubr.bf16.mxu0 %v1161_v3  ;;  %1911 = vmatprep.mubr.bf16.mxu1 %v1161_v3  ;;  %v6012_v26 = vld [vmem:[#allocation13 + $0x30c] ss:$24 sps:$4 sm:$0xff]  }
 0x30a   : > { %v1040_v54 = vadd.f32 %v1039_v48, %v6937_v61  ;;  %v1041_v55 = vpop.f32.mrb[51].mxu1  ;;  %1719 = vmatmul.mubr.bf16.gmra.mrb[76].mxu0 %v1160_v49  ;;  %1912 = vmatmul.mubr.bf16.gmra.mrb[108].mxu1 %v1160_v49  ;;  %v1122_v1 = vmax.f32 %v1036_v53, 0.0  ;;  %v8179_v48 = vsub.s32 3, %v6928_v57 }
 0x30b   : > { %v1042_v2 = vadd.f32 %v1041_v55, %v6940_v62  ;;  %v1123_v6 = vmax.f32 %v1038_v50, 0.0  ;;  %3917 = vmatprep.subr.bf16.mxu1 %v6012_v26  ;;  %v8180_v50 = vsub.s32 2, %v6928_v57 }
 0x30c   : > { %v1124_v5 = vmax.f32 %v1040_v54, 0.0 }
 0x30d   : > { %v1125_v7 = vmax.f32 %v1042_v2, 0.0 }
 0x30e   : > { %v1162_v8 = vpack.c.bf16 %v1124_v5, %v1122_v1 }
 0x30f   : > { %v1163_v9 = vpack.c.bf16 %v1125_v7, %v1123_v6  ;;  %v1045_v10 = vpop.f32.mrb[52].mxu1 }
 0x310   : > { %v1046_v11 = vadd.f32 %v1045_v10, %v6937_v61  ;;  %v1047_v12 = vpop.f32.mrb[53].mxu1 }
 0x311   : > { %v1048_v13 = vadd.f32 %v1047_v12, %v6940_v62  ;;  %v1049_v14 = vpop.f32.mrb[54].mxu1  ;;  %1728 = vmatprep.mubr.bf16.mxu0 %v1163_v9  ;;  %1921 = vmatprep.mubr.bf16.mxu1 %v1163_v9 }
 0x312   : > { %v1050_v15 = vadd.f32 %v1049_v14, %v6937_v61  ;;  %v1051_v16 = vpop.f32.mrb[55].mxu1  ;;  %1729 = vmatmul.mubr.bf16.gmra.mrb[80].mxu0 %v1162_v8  ;;  %1922 = vmatmul.mubr.bf16.gmra.mrb[112].mxu1 %v1162_v8  ;;  %v1126_v18 = vmax.f32 %v1046_v11, 0.0 }
 0x313   : > { %v1052_v17 = vadd.f32 %v1051_v16, %v6940_v62  ;;  %v1127_v21 = vmax.f32 %v1048_v13, 0.0 }
 0x314   : > { %v1128_v19 = vmax.f32 %v1050_v15, 0.0 }
 0x315   : > { %v1129_v22 = vmax.f32 %v1052_v17, 0.0 }
 0x316   : > { %v1164_v23 = vpack.c.bf16 %v1128_v19, %v1126_v18 }
 0x317   : > { %v1165_v24 = vpack.c.bf16 %v1129_v22, %v1127_v21  ;;  %v1055_v25 = vpop.f32.mrb[56].mxu1 }
 0x318   : > { %v1056_v27 = vadd.f32 %v1055_v25, %v6937_v61  ;;  %v1057_v29 = vpop.f32.mrb[57].mxu1 }
 0x319   : > { %v1058_v4 = vadd.f32 %v1057_v29, %v6940_v62  ;;  %v1059_v30 = vpop.f32.mrb[58].mxu1  ;;  %1738 = vmatprep.mubr.bf16.mxu0 %v1165_v24  ;;  %1931 = vmatprep.mubr.bf16.mxu1 %v1165_v24 }
 0x31a   : > { %v1060_v31 = vadd.f32 %v1059_v30, %v6937_v61  ;;  %v1061_v32 = vpop.f32.mrb[59].mxu1  ;;  %1739 = vmatmul.mubr.bf16.gmra.mrb[84].mxu0 %v1164_v23  ;;  %1932 = vmatmul.mubr.bf16.gmra.mrb[116].mxu1 %v1164_v23  ;;  %v1130_v34 = vmax.f32 %v1056_v27, 0.0 }
 0x31b   : > { %v1062_v33 = vadd.f32 %v1061_v32, %v6940_v62  ;;  %v1131_v36 = vmax.f32 %v1058_v4, 0.0  ;;  %v6010_v32 = vld [vmem:[#allocation13 + $0x308] ss:$24 sps:$4 sm:$0xff]  }
 0x31c   : > { %v1132_v35 = vmax.f32 %v1060_v31, 0.0  ;;  %v5983_v31 = vld [vmem:[#allocation13 + $0x300] ss:$24 sps:$4 sm:$0xff]  }
 0x31d   : > { %v1133_v37 = vmax.f32 %v1062_v33, 0.0 }
 0x31e   : > { %v1166_v38 = vpack.c.bf16 %v1132_v35, %v1130_v34 }
 0x31f   : > { %v1167_v39 = vpack.c.bf16 %v1133_v37, %v1131_v36  ;;  %v1065_v40 = vpop.f32.mrb[60].mxu1  ;;  %v5988_v37 = vld [vmem:[#allocation13 + $0x334] ss:$24 sps:$4 sm:$0xff]  }
 0x320   : > { %v1066_v41 = vadd.f32 %v1065_v40, %v6937_v61  ;;  %v1067_v42 = vpop.f32.mrb[61].mxu1 }
 0x321   : > { %v1068_v43 = vadd.f32 %v1067_v42, %v6940_v62  ;;  %v1069_v45 = vpop.f32.mrb[62].mxu1  ;;  %1748 = vmatprep.mubr.bf16.mxu0 %v1167_v39  ;;  %1941 = vmatprep.mubr.bf16.mxu1 %v1167_v39 }
 0x322   : > { %v1070_v44 = vadd.f32 %v1069_v45, %v6937_v61  ;;  %v1071_v46 = vpop.f32.mrb[63].mxu1  ;;  %1749 = vmatmul.mubr.bf16.gmra.mrb[88].mxu0 %v1166_v38  ;;  %1942 = vmatmul.mubr.bf16.gmra.mrb[120].mxu1 %v1166_v38  ;;  %v1134_v49 = vmax.f32 %v1066_v41, 0.0  ;;  %v1234_v61 = vld [vmem:[#allocation11] sm:$0xf] }
 0x323   : > { %v1072_v47 = vadd.f32 %v1071_v46, %v6940_v62  ;;  %v1135_v3 = vmax.f32 %v1068_v43, 0.0  ;;  %v7009_v54 = vrot.slane %v1234_v61, %v6931_v58  ;;  %v7013_v62 = vrot.slane %v1234_v61, %v8180_v50  ;;  %v6015_v38 = vld [vmem:[#allocation13 + $0x33c] ss:$24 sps:$4 sm:$0xff]  }
 0x324   : > { %v1136_v28 = vmax.f32 %v1070_v44, 0.0  ;;  %v7016_v55 = vrot.slane %v1234_v61, %v6934_v60  ;;  %v7020_v56 = vrot.slane %v1234_v61, %v8179_v48 }
 0x325   : > { %v1137_v51 = vmax.f32 %v1072_v47, 0.0 }
 0x326   : > { %v1168_v52 = vpack.c.bf16 %v1136_v28, %v1134_v49  ;;  %v5986_v28 = vld [vmem:[#allocation13 + $0x330] ss:$24 sps:$4 sm:$0xff]  }
 0x327   : > { %v1169_v53 = vpack.c.bf16 %v1137_v51, %v1135_v3  ;;  %v5991_v3 = vld [vmem:[#allocation13 + $0x364] ss:$24 sps:$4 sm:$0xff]   ;;  %v6013_v51 = vld [vmem:[#allocation13 + $0x338] ss:$24 sps:$4 sm:$0xff]  }
 0x329   : > { %1758 = vmatprep.mubr.bf16.mxu0 %v1169_v53  ;;  %1951 = vmatprep.mubr.bf16.mxu1 %v1169_v53 }
 0x32a   : > { %1759 = vmatmul.mubr.bf16.gmra.mrb[92].mxu0 %v1168_v52  ;;  %1952 = vmatmul.mubr.bf16.gmra.mrb[124].mxu1 %v1168_v52 }
 0x385   : > { %v1610_v59 = vpop.f32.mrb[32].mxu0  ;;  %v1803_v2 = vpop.f32.mrb[64].mxu1 }
 0x386   : > { %v1611_v63 = vadd.f32 %v1610_v59, %v7009_v54  ;;  %v1804_v0 = vadd.f32 %v1803_v2, %v7013_v62  ;;  %v1612_v1 = vpop.f32.mrb[33].mxu0  ;;  %v1805_v5 = vpop.f32.mrb[65].mxu1  ;;  %v6021_v59 = vld [vmem:[#allocation13 + $0x36c] ss:$24 sps:$4 sm:$0xff]  }
 0x387   : > { %v1613_v6 = vadd.f32 %v1612_v1, %v7016_v55  ;;  %v1806_v7 = vadd.f32 %v1805_v5, %v7020_v56  ;;  %v1614_v8 = vpop.f32.mrb[34].mxu0  ;;  %v1807_v9 = vpop.f32.mrb[66].mxu1 }
 0x388   : > { %v1615_v10 = vadd.f32 %v1614_v8, %v7009_v54  ;;  %v1808_v11 = vadd.f32 %v1807_v9, %v7013_v62  ;;  %v1616_v12 = vpop.f32.mrb[35].mxu0  ;;  %v1809_v13 = vpop.f32.mrb[67].mxu1  ;;  %v1962_v16 = vmax.f32 %v1611_v63, 0.0  ;;  %v1964_v17 = vmax.f32 %v1804_v0, 0.0 }
 0x389   : > { %v1617_v14 = vadd.f32 %v1616_v12, %v7016_v55  ;;  %v1810_v15 = vadd.f32 %v1809_v13, %v7020_v56  ;;  %v1963_v20 = vmax.f32 %v1613_v6, 0.0  ;;  %v1965_v21 = vmax.f32 %v1806_v7, 0.0  ;;  %v6019_v12 = vld [vmem:[#allocation13 + $0x368] ss:$24 sps:$4 sm:$0xff]  }
 0x38a   : > { %v1966_v18 = vmax.f32 %v1615_v10, 0.0  ;;  %v1968_v19 = vmax.f32 %v1808_v11, 0.0  ;;  %v5989_v11 = vld [vmem:[#allocation13 + $0x360] ss:$24 sps:$4 sm:$0xff]  }
 0x38b   : > { %v1967_v22 = vmax.f32 %v1617_v14, 0.0  ;;  %v1969_v23 = vmax.f32 %v1810_v15, 0.0 }
 0x38c   : > { %v7030_v24 = vpack.c.bf16 %v1966_v18, %v1962_v16  ;;  %v7032_v25 = vpack.c.bf16 %v1968_v19, %v1964_v17  ;;  %v5994_v17 = vld [vmem:[#allocation13 + $0x394] ss:$24 sps:$4 sm:$0xff]  }
 0x38d   : > { %v7034_v27 = vpack.c.bf16 %v1967_v22, %v1963_v20  ;;  %v7036_v29 = vpack.c.bf16 %v1969_v23, %v1965_v21  ;;  %v1620_v4 = vpop.f32.mrb[36].mxu0  ;;  %v1813_v30 = vpop.f32.mrb[68].mxu1  ;;  %v6024_v18 = vld [vmem:[#allocation13 + $0x39c] ss:$24 sps:$4 sm:$0xff]  }
 0x38e   : > { %8246 = vst [vmem:[#allocation29_spill] sm:$0xff] %v7032_v25  ;;  %v1621_v33 = vadd.f32 %v1620_v4, %v7009_v54  ;;  %v1814_v34 = vadd.f32 %v1813_v30, %v7013_v62  ;;  %v1622_v35 = vpop.f32.mrb[37].mxu0  ;;  %v1815_v36 = vpop.f32.mrb[69].mxu1 }
 0x38f   : > { %8247 = vst [vmem:[#allocation30_spill] sm:$0xff] %v7036_v29  ;;  %v1623_v39 = vadd.f32 %v1622_v35, %v7016_v55  ;;  %v1816_v40 = vadd.f32 %v1815_v36, %v7020_v56  ;;  %v1624_v41 = vpop.f32.mrb[38].mxu0  ;;  %v1817_v42 = vpop.f32.mrb[70].mxu1  ;;  %3370 = vmatprep.mubr.bf16.mxu0 %v7034_v27  ;;  %3756 = vmatprep.mubr.bf16.mxu1 %v7034_v27  ;;  %v5997_v35 = vld [vmem:[#allocation13 + $0x3c4] ss:$24 sps:$4 sm:$0xff]  }
 0x390   : > { %v1625_v43 = vadd.f32 %v1624_v41, %v7009_v54  ;;  %v1818_v45 = vadd.f32 %v1817_v42, %v7013_v62  ;;  %v1626_v44 = vpop.f32.mrb[39].mxu0  ;;  %v1819_v46 = vpop.f32.mrb[71].mxu1  ;;  %3371 = vmatmul.mubr.bf16.vlgmr.msra.gmra.mrb[96].mxu0 %v7030_v24  ;;  %3757 = vmatmul.mubr.bf16.vlgmr.msra.gmra.mrb[128].mxu1 %v7030_v24  ;;  %v1970_v52 = vmax.f32 %v1621_v33, 0.0  ;;  %v1972_v53 = vmax.f32 %v1814_v34, 0.0  ;;  %v5992_v34 = vld [vmem:[#allocation13 + $0x390] ss:$24 sps:$4 sm:$0xff]  }
 0x391   : > { %v1627_v47 = vadd.f32 %v1626_v44, %v7016_v55  ;;  %v1820_v49 = vadd.f32 %v1819_v46, %v7020_v56  ;;  %3532 = vmatpush1.bf16.msra.mxu0 %v5983_v31  ;;  %3918 = vmatpush1.bf16.msra.mxu1 %v6010_v32  ;;  %v1971_v2 = vmax.f32 %v1623_v39, 0.0  ;;  %v1973_v63 = vmax.f32 %v1816_v40, 0.0  ;;  %v6022_v36 = vld [vmem:[#allocation13 + $0x398] ss:$24 sps:$4 sm:$0xff]   ;;  %v6030_v41 = vld [vmem:[#allocation13 + $0x3cc] ss:$24 sps:$4 sm:$0xff]  }
 0x392   : > { %v1974_v26 = vmax.f32 %v1625_v43, 0.0  ;;  %v1976_v61 = vmax.f32 %v1818_v45, 0.0  ;;  %3533 = vmatprep.subr.bf16.mxu0 %v5988_v37  ;;  %3919 = vmatprep.subr.bf16.mxu1 %v6015_v38 }
 0x393   : > { %v1975_v0 = vmax.f32 %v1627_v47, 0.0  ;;  %v1977_v1 = vmax.f32 %v1820_v49, 0.0 }
 0x394   : > { %v7050_v5 = vpack.c.bf16 %v1974_v26, %v1970_v52  ;;  %v7052_v6 = vpack.c.bf16 %v1976_v61, %v1972_v53  ;;  %v5995_v52 = vld [vmem:[#allocation13 + $0x3c0] ss:$24 sps:$4 sm:$0xff]  }
 0x395   : > { %v7054_v7 = vpack.c.bf16 %v1975_v0, %v1971_v2  ;;  %v7056_v8 = vpack.c.bf16 %v1977_v1, %v1973_v63  ;;  %v1630_v9 = vpop.f32.mrb[40].mxu0  ;;  %v1823_v10 = vpop.f32.mrb[72].mxu1  ;;  %3534 = vmatpush1.bf16.msra.mxu0 %v5986_v28  ;;  %3920 = vmatpush1.bf16.msra.mxu1 %v6013_v51  ;;  %v6028_v53 = vld [vmem:[#allocation13 + $0x3c8] ss:$24 sps:$4 sm:$0xff]   ;;  %v6000_v63 = vld [vmem:[#allocation13 + $0x3f4] ss:$24 sps:$4 sm:$0xff]  }
 0x396   : > { %8248 = vst [vmem:[#allocation31_spill] sm:$0xff] %v7052_v6  ;;  %v1631_v13 = vadd.f32 %v1630_v9, %v7009_v54  ;;  %v1824_v14 = vadd.f32 %v1823_v10, %v7013_v62  ;;  %v1632_v15 = vpop.f32.mrb[41].mxu0  ;;  %v1825_v16 = vpop.f32.mrb[73].mxu1  ;;  %3535 = vmatprep.subr.bf16.mxu0 %v5991_v3  ;;  %3921 = vmatprep.subr.bf16.mxu1 %v6021_v59  ;;  %v6033_v0 = vld [vmem:[#allocation13 + $0x3fc] ss:$24 sps:$4 sm:$0xff]  }
 0x397   : > { %8249 = vst [vmem:[#allocation32_spill] sm:$0xff] %v7056_v8  ;;  %v1633_v19 = vadd.f32 %v1632_v15, %v7016_v55  ;;  %v1826_v20 = vadd.f32 %v1825_v16, %v7020_v56  ;;  %v1634_v21 = vpop.f32.mrb[42].mxu0  ;;  %v1827_v22 = vpop.f32.mrb[74].mxu1  ;;  %3380 = vmatprep.mubr.bf16.mxu0 %v7054_v7  ;;  %3766 = vmatprep.mubr.bf16.mxu1 %v7054_v7 }
 0x398   : > { %v1635_v23 = vadd.f32 %v1634_v21, %v7009_v54  ;;  %v1828_v4 = vadd.f32 %v1827_v22, %v7013_v62  ;;  %v1636_v30 = vpop.f32.mrb[43].mxu0  ;;  %v1829_v31 = vpop.f32.mrb[75].mxu1  ;;  %3381 = vmatmul.mubr.bf16.gmra.mrb[100].mxu0 %v7050_v5  ;;  %3767 = vmatmul.mubr.bf16.gmra.mrb[132].mxu1 %v7050_v5  ;;  %v1978_v37 = vmax.f32 %v1631_v13, 0.0  ;;  %v1980_v38 = vmax.f32 %v1824_v14, 0.0 }
 0x399   : > { %v1637_v32 = vadd.f32 %v1636_v30, %v7016_v55  ;;  %v1830_v33 = vadd.f32 %v1829_v31, %v7020_v56  ;;  %3536 = vmatpush1.bf16.msra.mxu0 %v5989_v11  ;;  %3922 = vmatpush1.bf16.msra.mxu1 %v6019_v12  ;;  %v1979_v42 = vmax.f32 %v1633_v19, 0.0  ;;  %v1981_v43 = vmax.f32 %v1826_v20, 0.0  ;;  %v6003_v19 = vld [vmem:[#allocation13 + $0x424] ss:$24 sps:$4 sm:$0xff]   ;;  %v6031_v20 = vld [vmem:[#allocation13 + $0x3f8] ss:$24 sps:$4 sm:$0xff]  }
 0x39a   : > { %v1982_v39 = vmax.f32 %v1635_v23, 0.0  ;;  %v1984_v40 = vmax.f32 %v1828_v4, 0.0  ;;  %3537 = vmatprep.subr.bf16.mxu0 %v5994_v17  ;;  %3923 = vmatprep.subr.bf16.mxu1 %v6024_v18  ;;  %v5998_v18 = vld [vmem:[#allocation13 + $0x3f0] ss:$24 sps:$4 sm:$0xff]   ;;  %v6039_v30 = vld [vmem:[#allocation13 + $0x42c] ss:$24 sps:$4 sm:$0xff]  }
 0x39b   : > { %v1983_v45 = vmax.f32 %v1637_v32, 0.0  ;;  %v1985_v44 = vmax.f32 %v1830_v33, 0.0 }
 0x39c   : > { %v7070_v46 = vpack.c.bf16 %v1982_v39, %v1978_v37  ;;  %v7072_v47 = vpack.c.bf16 %v1984_v40, %v1980_v38 }
 0x39d   : > { %v7074_v49 = vpack.c.bf16 %v1983_v45, %v1979_v42  ;;  %v7076_v28 = vpack.c.bf16 %v1985_v44, %v1981_v43  ;;  %v1640_v3 = vpop.f32.mrb[44].mxu0  ;;  %v1833_v51 = vpop.f32.mrb[76].mxu1  ;;  %3538 = vmatpush1.bf16.msra.mxu0 %v5992_v34  ;;  %3924 = vmatpush1.bf16.msra.mxu1 %v6022_v36  ;;  %v6037_v42 = vld [vmem:[#allocation13 + $0x428] ss:$24 sps:$4 sm:$0xff]  }
 0x39e   : > { %8250 = vst [vmem:[#allocation33_spill] sm:$0xff] %v7072_v47  ;;  %v1641_v26 = vadd.f32 %v1640_v3, %v7009_v54  ;;  %v1834_v61 = vadd.f32 %v1833_v51, %v7013_v62  ;;  %v1642_v59 = vpop.f32.mrb[45].mxu0  ;;  %v1835_v2 = vpop.f32.mrb[77].mxu1  ;;  %3539 = vmatprep.subr.bf16.mxu0 %v5997_v35  ;;  %3925 = vmatprep.subr.bf16.mxu1 %v6030_v41  ;;  %v6001_v41 = vld [vmem:[#allocation13 + $0x420] ss:$24 sps:$4 sm:$0xff]  }
 0x39f   : > { %8251 = vst [vmem:[#allocation34_spill] sm:$0xff] %v7076_v28  ;;  %v1643_v1 = vadd.f32 %v1642_v59, %v7016_v55  ;;  %v1836_v9 = vadd.f32 %v1835_v2, %v7020_v56  ;;  %v1644_v10 = vpop.f32.mrb[46].mxu0  ;;  %v1837_v11 = vpop.f32.mrb[78].mxu1  ;;  %3390 = vmatprep.mubr.bf16.mxu0 %v7074_v49  ;;  %3776 = vmatprep.mubr.bf16.mxu1 %v7074_v49  ;;  %v6006_v51 = vld [vmem:[#allocation13 + $0x454] ss:$24 sps:$4 sm:$0xff]  }
 0x3a0   : > { %v1645_v12 = vadd.f32 %v1644_v10, %v7009_v54  ;;  %v1838_v13 = vadd.f32 %v1837_v11, %v7013_v62  ;;  %v1646_v14 = vpop.f32.mrb[47].mxu0  ;;  %v1839_v15 = vpop.f32.mrb[79].mxu1  ;;  %3391 = vmatmul.mubr.bf16.gmra.mrb[104].mxu0 %v7070_v46  ;;  %3777 = vmatmul.mubr.bf16.gmra.mrb[136].mxu1 %v7070_v46  ;;  %v1986_v21 = vmax.f32 %v1641_v26, 0.0  ;;  %v1988_v22 = vmax.f32 %v1834_v61, 0.0  ;;  %v6004_v11 = vld [vmem:[#allocation13 + $0x450] ss:$24 sps:$4 sm:$0xff]  }
 0x3a1   : > { %v1647_v16 = vadd.f32 %v1646_v14, %v7016_v55  ;;  %v1840_v17 = vadd.f32 %v1839_v15, %v7020_v56  ;;  %3540 = vmatpush1.bf16.msra.mxu0 %v5995_v52  ;;  %3926 = vmatpush1.bf16.msra.mxu1 %v6028_v53  ;;  %v1987_v31 = vmax.f32 %v1643_v1, 0.0  ;;  %v1989_v32 = vmax.f32 %v1836_v9, 0.0  ;;  %v6042_v52 = vld [vmem:[#allocation13 + $0x45c] ss:$24 sps:$4 sm:$0xff]  }
 0x3a2   : > { %v1990_v23 = vmax.f32 %v1645_v12, 0.0  ;;  %v1992_v4 = vmax.f32 %v1838_v13, 0.0  ;;  %3541 = vmatprep.subr.bf16.mxu0 %v6000_v63  ;;  %3927 = vmatprep.subr.bf16.mxu1 %v6033_v0  ;;  %v6009_v12 = vld [vmem:[#allocation13 + $0x484] ss:$24 sps:$4 sm:$0xff]   ;;  %v6040_v13 = vld [vmem:[#allocation13 + $0x458] ss:$24 sps:$4 sm:$0xff]  }
 0x3a3   : > { %v1991_v33 = vmax.f32 %v1647_v16, 0.0  ;;  %v1993_v34 = vmax.f32 %v1840_v17, 0.0 }
 0x3a4   : > { %v7090_v35 = vpack.c.bf16 %v1990_v23, %v1986_v21  ;;  %v7092_v36 = vpack.c.bf16 %v1992_v4, %v1988_v22 }
 0x3a5   : > { %v7094_v37 = vpack.c.bf16 %v1991_v33, %v1987_v31  ;;  %v7096_v38 = vpack.c.bf16 %v1993_v34, %v1989_v32  ;;  %v1650_v39 = vpop.f32.mrb[48].mxu0  ;;  %v1843_v40 = vpop.f32.mrb[80].mxu1  ;;  %3542 = vmatpush1.bf16.msra.mxu0 %v5998_v18  ;;  %3928 = vmatpush1.bf16.msra.mxu1 %v6031_v20  ;;  %v6048_v18 = vld [vmem:[#allocation13 + $0x48c] ss:$24 sps:$4 sm:$0xff]   ;;  %v6007_v34 = vld [vmem:[#allocation13 + $0x480] ss:$24 sps:$4 sm:$0xff]  }
 0x3a6   : > { %8252 = vst [vmem:[#allocation35_spill] sm:$0xff] %v7092_v36  ;;  %v1651_v43 = vadd.f32 %v1650_v39, %v7009_v54  ;;  %v1844_v45 = vadd.f32 %v1843_v40, %v7013_v62  ;;  %v1652_v44 = vpop.f32.mrb[49].mxu0  ;;  %v1845_v3 = vpop.f32.mrb[81].mxu1  ;;  %3543 = vmatprep.subr.bf16.mxu0 %v6003_v19  ;;  %3929 = vmatprep.subr.bf16.mxu1 %v6039_v30  ;;  %v6046_v39 = vld [vmem:[#allocation13 + $0x488] ss:$24 sps:$4 sm:$0xff]  }
 0x3a7   : > { %8253 = vst [vmem:[#allocation36_spill] sm:$0xff] %v7096_v38  ;;  %v1653_v53 = vadd.f32 %v1652_v44, %v7016_v55  ;;  %v1846_v26 = vadd.f32 %v1845_v3, %v7020_v56  ;;  %v1654_v61 = vpop.f32.mrb[50].mxu0  ;;  %v1847_v59 = vpop.f32.mrb[82].mxu1  ;;  %3400 = vmatprep.mubr.bf16.mxu0 %v7094_v37  ;;  %3786 = vmatprep.mubr.bf16.mxu1 %v7094_v37  ;;  %v6051_v44 = vld [vmem:[#allocation13 + $0x4bc] ss:$24 sps:$4 sm:$0xff]  }
 0x3a8   : > { %v1655_v2 = vadd.f32 %v1654_v61, %v7009_v54  ;;  %v1848_v63 = vadd.f32 %v1847_v59, %v7013_v62  ;;  %v1656_v0 = vpop.f32.mrb[51].mxu0  ;;  %v1849_v1 = vpop.f32.mrb[83].mxu1  ;;  %3401 = vmatmul.mubr.bf16.gmra.mrb[108].mxu0 %v7090_v35  ;;  %3787 = vmatmul.mubr.bf16.gmra.mrb[140].mxu1 %v7090_v35  ;;  %v1994_v14 = vmax.f32 %v1651_v43, 0.0  ;;  %v1996_v15 = vmax.f32 %v1844_v45, 0.0  ;;  %v6018_v45 = vld [vmem:[#allocation13 + $0x4b4] ss:$24 sps:$4 sm:$0xff]  }
 0x3a9   : > { %v1657_v9 = vadd.f32 %v1656_v0, %v7016_v55  ;;  %v1850_v10 = vadd.f32 %v1849_v1, %v7020_v56  ;;  %3544 = vmatpush1.bf16.msra.mxu0 %v6001_v41  ;;  %3930 = vmatpush1.bf16.msra.mxu1 %v6037_v42  ;;  %v1995_v19 = vmax.f32 %v1653_v53, 0.0  ;;  %v1997_v20 = vmax.f32 %v1846_v26, 0.0  ;;  %v6016_v1 = vld [vmem:[#allocation13 + $0x4b0] ss:$24 sps:$4 sm:$0xff]  }
 0x3aa   : > { %v1998_v16 = vmax.f32 %v1655_v2, 0.0  ;;  %v2000_v17 = vmax.f32 %v1848_v63, 0.0  ;;  %3545 = vmatprep.subr.bf16.mxu0 %v6006_v51  ;;  %3931 = vmatprep.subr.bf16.mxu1 %v6042_v52 }
 0x3ab   : > { %v1999_v21 = vmax.f32 %v1657_v9, 0.0  ;;  %v2001_v22 = vmax.f32 %v1850_v10, 0.0  ;;  %v6027_v9 = vld [vmem:[#allocation13 + $0x4e4] ss:$24 sps:$4 sm:$0xff]   ;;  %v6049_v10 = vld [vmem:[#allocation13 + $0x4b8] ss:$24 sps:$4 sm:$0xff]  }
 0x3ac   : > { %v7110_v23 = vpack.c.bf16 %v1998_v16, %v1994_v14  ;;  %v7112_v4 = vpack.c.bf16 %v2000_v17, %v1996_v15  ;;  %v6057_v15 = vld [vmem:[#allocation13 + $0x4ec] ss:$24 sps:$4 sm:$0xff]  }
 0x3ad   : > { %v7114_v30 = vpack.c.bf16 %v1999_v21, %v1995_v19  ;;  %v7116_v31 = vpack.c.bf16 %v2001_v22, %v1997_v20  ;;  %v1660_v32 = vpop.f32.mrb[52].mxu0  ;;  %v1853_v33 = vpop.f32.mrb[84].mxu1  ;;  %3546 = vmatpush1.bf16.msra.mxu0 %v6004_v11  ;;  %3932 = vmatpush1.bf16.msra.mxu1 %v6040_v13 }
 0x3ae   : > { %8254 = vst [vmem:[#allocation37_spill] sm:$0xff] %v7110_v23  ;;  %8255 = vst [vmem:[#allocation38_spill] sm:$0xff] %v7112_v4  ;;  %v1661_v40 = vadd.f32 %v1660_v32, %v7009_v54  ;;  %v1854_v41 = vadd.f32 %v1853_v33, %v7013_v62  ;;  %v1662_v42 = vpop.f32.mrb[53].mxu0  ;;  %v1855_v43 = vpop.f32.mrb[85].mxu1  ;;  %3547 = vmatprep.subr.bf16.mxu0 %v6009_v12  ;;  %3933 = vmatprep.subr.bf16.mxu1 %v6048_v18 }
 0x3af   : > { %8256 = vst [vmem:[#allocation39_spill] sm:$0xff] %v7114_v30  ;;  %8257 = vst [vmem:[#allocation40_spill] sm:$0xff] %v7116_v31  ;;  %v1663_v3 = vadd.f32 %v1662_v42, %v7016_v55  ;;  %v1856_v51 = vadd.f32 %v1855_v43, %v7020_v56  ;;  %v1664_v52 = vpop.f32.mrb[54].mxu0  ;;  %v1857_v53 = vpop.f32.mrb[86].mxu1  ;;  %3410 = vmatprep.mubr.bf16.mxu0 %v7114_v30  ;;  %3796 = vmatprep.mubr.bf16.mxu1 %v7114_v30 }
 0x3b0   : > { %v1665_v26 = vadd.f32 %v1664_v52, %v7009_v54  ;;  %v1858_v61 = vadd.f32 %v1857_v53, %v7013_v62  ;;  %v1666_v59 = vpop.f32.mrb[55].mxu0  ;;  %v1859_v2 = vpop.f32.mrb[87].mxu1  ;;  %3411 = vmatmul.mubr.bf16.gmra.mrb[112].mxu0 %v7110_v23  ;;  %3797 = vmatmul.mubr.bf16.gmra.mrb[144].mxu1 %v7110_v23  ;;  %v2002_v11 = vmax.f32 %v1661_v40, 0.0  ;;  %v2004_v12 = vmax.f32 %v1854_v41, 0.0  ;;  %v6055_v40 = vld [vmem:[#allocation13 + $0x4e8] ss:$24 sps:$4 sm:$0xff]  }
 0x3b1   : > { %v1667_v63 = vadd.f32 %v1666_v59, %v7016_v55  ;;  %v1860_v0 = vadd.f32 %v1859_v2, %v7020_v56  ;;  %3548 = vmatpush1.bf16.msra.mxu0 %v6007_v34  ;;  %3934 = vmatpush1.bf16.msra.mxu1 %v6046_v39  ;;  %v2003_v16 = vmax.f32 %v1663_v3, 0.0  ;;  %v2005_v17 = vmax.f32 %v1856_v51, 0.0  ;;  %v6025_v39 = vld [vmem:[#allocation13 + $0x4e0] ss:$24 sps:$4 sm:$0xff]   ;;  %v6060_v3 = vld [vmem:[#allocation13 + $0x51c] ss:$24 sps:$4 sm:$0xff]  }
 0x3b2   : > { %v2006_v13 = vmax.f32 %v1665_v26, 0.0  ;;  %v2008_v14 = vmax.f32 %v1858_v61, 0.0  ;;  %3549 = vmatprep.subr.bf16.mxu0 %v6018_v45  ;;  %3935 = vmatprep.subr.bf16.mxu1 %v6051_v44  ;;  %v6036_v44 = vld [vmem:[#allocation13 + $0x514] ss:$24 sps:$4 sm:$0xff]  }
 0x3b3   : > { %v2007_v18 = vmax.f32 %v1667_v63, 0.0  ;;  %v2009_v19 = vmax.f32 %v1860_v0, 0.0 }
 0x3b4   : > { %v7130_v20 = vpack.c.bf16 %v2006_v13, %v2002_v11  ;;  %v7132_v21 = vpack.c.bf16 %v2008_v14, %v2004_v12  ;;  %v6058_v11 = vld [vmem:[#allocation13 + $0x518] ss:$24 sps:$4 sm:$0xff]  }
 0x3b5   : > { %v7134_v22 = vpack.c.bf16 %v2007_v18, %v2003_v16  ;;  %v7136_v32 = vpack.c.bf16 %v2009_v19, %v2005_v17  ;;  %v1670_v33 = vpop.f32.mrb[56].mxu0  ;;  %v1863_v34 = vpop.f32.mrb[88].mxu1  ;;  %3550 = vmatpush1.bf16.msra.mxu0 %v6016_v1  ;;  %3936 = vmatpush1.bf16.msra.mxu1 %v6049_v10  ;;  %v6045_v10 = vld [vmem:[#allocation13 + $0x544] ss:$24 sps:$4 sm:$0xff]  }
 0x3b6   : > { %8258 = vst [vmem:[#allocation41_spill] sm:$0xff] %v7130_v20  ;;  %8259 = vst [vmem:[#allocation42_spill] sm:$0xff] %v7132_v21  ;;  %v1671_v41 = vadd.f32 %v1670_v33, %v7009_v54  ;;  %v1864_v42 = vadd.f32 %v1863_v34, %v7013_v62  ;;  %v1672_v43 = vpop.f32.mrb[57].mxu0  ;;  %v1865_v45 = vpop.f32.mrb[89].mxu1  ;;  %3551 = vmatprep.subr.bf16.mxu0 %v6027_v9  ;;  %3937 = vmatprep.subr.bf16.mxu1 %v6057_v15  ;;  %v6034_v9 = vld [vmem:[#allocation13 + $0x510] ss:$24 sps:$4 sm:$0xff]  }
 0x3b7   : > { %8260 = vst [vmem:[#allocation43_spill] sm:$0xff] %v7134_v22  ;;  %8261 = vst [vmem:[#allocation44_spill] sm:$0xff] %v7136_v32  ;;  %v1673_v51 = vadd.f32 %v1672_v43, %v7016_v55  ;;  %v1866_v52 = vadd.f32 %v1865_v45, %v7020_v56  ;;  %v1674_v53 = vpop.f32.mrb[58].mxu0  ;;  %v1867_v26 = vpop.f32.mrb[90].mxu1  ;;  %3420 = vmatprep.mubr.bf16.mxu0 %v7134_v22  ;;  %3806 = vmatprep.mubr.bf16.mxu1 %v7134_v22  ;;  %v6066_v16 = vld [vmem:[#allocation13 + $0x54c] ss:$24 sps:$4 sm:$0xff]  }
 0x3b8   : > { %v1675_v61 = vadd.f32 %v1674_v53, %v7009_v54  ;;  %v1868_v59 = vadd.f32 %v1867_v26, %v7013_v62  ;;  %v1676_v2 = vpop.f32.mrb[59].mxu0  ;;  %v1869_v63 = vpop.f32.mrb[91].mxu1  ;;  %3421 = vmatmul.mubr.bf16.gmra.mrb[116].mxu0 %v7130_v20  ;;  %3807 = vmatmul.mubr.bf16.gmra.mrb[148].mxu1 %v7130_v20  ;;  %v2010_v12 = vmax.f32 %v1671_v41, 0.0  ;;  %v2012_v13 = vmax.f32 %v1864_v42, 0.0  ;;  %v6043_v42 = vld [vmem:[#allocation13 + $0x540] ss:$24 sps:$4 sm:$0xff]  }
 0x3b9   : > { %v1677_v0 = vadd.f32 %v1676_v2, %v7016_v55  ;;  %v1870_v1 = vadd.f32 %v1869_v63, %v7020_v56  ;;  %3552 = vmatpush1.bf16.msra.mxu0 %v6025_v39  ;;  %3938 = vmatpush1.bf16.msra.mxu1 %v6055_v40  ;;  %v2011_v17 = vmax.f32 %v1673_v51, 0.0  ;;  %v2013_v18 = vmax.f32 %v1866_v52, 0.0  ;;  %v6054_v26 = vld [vmem:[#allocation13 + $0x574] ss:$24 sps:$4 sm:$0xff]  }
 0x3ba   : > { %v2014_v14 = vmax.f32 %v1675_v61, 0.0  ;;  %v2016_v15 = vmax.f32 %v1868_v59, 0.0  ;;  %3553 = vmatprep.subr.bf16.mxu0 %v6036_v44  ;;  %3939 = vmatprep.subr.bf16.mxu1 %v6060_v3  ;;  %v6064_v44 = vld [vmem:[#allocation13 + $0x548] ss:$24 sps:$4 sm:$0xff]   ;;  %v6069_v61 = vld [vmem:[#allocation13 + $0x57c] ss:$24 sps:$4 sm:$0xff]  }
 0x3bb   : > { %v2015_v19 = vmax.f32 %v1677_v0, 0.0  ;;  %v2017_v33 = vmax.f32 %v1870_v1, 0.0 }
 0x3bc   : > { %v7150_v34 = vpack.c.bf16 %v2014_v14, %v2010_v12  ;;  %v7152_v43 = vpack.c.bf16 %v2016_v15, %v2012_v13  ;;  %v6052_v14 = vld [vmem:[#allocation13 + $0x570] ss:$24 sps:$4 sm:$0xff]   ;;  %v6063_v15 = vld [vmem:[#allocation13 + $0x5a4] ss:$24 sps:$4 sm:$0xff]  }
 0x3bd   : > { %v7154_v39 = vpack.c.bf16 %v2015_v19, %v2011_v17  ;;  %v7156_v45 = vpack.c.bf16 %v2017_v33, %v2013_v18  ;;  %v1680_v40 = vpop.f32.mrb[60].mxu0  ;;  %v1873_v41 = vpop.f32.mrb[92].mxu1  ;;  %3554 = vmatpush1.bf16.msra.mxu0 %v6034_v9  ;;  %3940 = vmatpush1.bf16.msra.mxu1 %v6058_v11 }
 0x3be   : > { %8262 = vst [vmem:[#allocation45_spill] sm:$0xff] %v7150_v34  ;;  %v1681_v3 = vadd.f32 %v1680_v40, %v7009_v54  ;;  %v1874_v51 = vadd.f32 %v1873_v41, %v7013_v62  ;;  %v1682_v52 = vpop.f32.mrb[61].mxu0  ;;  %v1875_v53 = vpop.f32.mrb[93].mxu1  ;;  %3555 = vmatprep.subr.bf16.mxu0 %v6045_v10  ;;  %3941 = vmatprep.subr.bf16.mxu1 %v6066_v16  ;;  %v6067_v16 = vld [vmem:[#allocation13 + $0x578] ss:$24 sps:$4 sm:$0xff]  }
 0x3bf   : > { %8263 = vst [vmem:[#allocation46_spill] sm:$0xff] %v7154_v39  ;;  %v1683_v59 = vadd.f32 %v1682_v52, %v7016_v55  ;;  %v1876_v2 = vadd.f32 %v1875_v53, %v7020_v56  ;;  %v1684_v63 = vpop.f32.mrb[62].mxu0  ;;  %v1877_v0 = vpop.f32.mrb[94].mxu1  ;;  %3430 = vmatprep.mubr.bf16.mxu0 %v7154_v39  ;;  %3816 = vmatprep.mubr.bf16.mxu1 %v7154_v39  ;;  %v6075_v40 = vld [vmem:[#allocation13 + $0x5ac] ss:$24 sps:$4 sm:$0xff]  }
 0x3c0   : > { %v1685_v1 = vadd.f32 %v1684_v63, %v7009_v54  ;;  %v1878_v9 = vadd.f32 %v1877_v0, %v7013_v62  ;;  %v1686_v11 = vpop.f32.mrb[63].mxu0  ;;  %v1879_v12 = vpop.f32.mrb[95].mxu1  ;;  %3431 = vmatmul.mubr.bf16.gmra.mrb[120].mxu0 %v7150_v34  ;;  %3817 = vmatmul.mubr.bf16.gmra.mrb[152].mxu1 %v7150_v34  ;;  %v2018_v17 = vmax.f32 %v1681_v3, 0.0  ;;  %v2020_v18 = vmax.f32 %v1874_v51, 0.0  ;;  %v6061_v51 = vld [vmem:[#allocation13 + $0x5a0] ss:$24 sps:$4 sm:$0xff]  }
 0x3c1   : > { %v1687_v10 = vadd.f32 %v1686_v11, %v7016_v55  ;;  %v1880_v13 = vadd.f32 %v1879_v12, %v7020_v56  ;;  %3556 = vmatpush1.bf16.msra.mxu0 %v6043_v42  ;;  %3942 = vmatpush1.bf16.msra.mxu1 %v6064_v44  ;;  %v2019_v41 = vmax.f32 %v1683_v59, 0.0  ;;  %v2021_v52 = vmax.f32 %v1876_v2, 0.0 }
 0x3c2   : > { %v2022_v19 = vmax.f32 %v1685_v1, 0.0  ;;  %v2024_v33 = vmax.f32 %v1878_v9, 0.0  ;;  %3557 = vmatprep.subr.bf16.mxu0 %v6054_v26  ;;  %3943 = vmatprep.subr.bf16.mxu1 %v6069_v61  ;;  %v6073_v26 = vld [vmem:[#allocation13 + $0x5a8] ss:$24 sps:$4 sm:$0xff]   ;;  %v6072_v9 = vld [vmem:[#allocation13 + $0x5d4] ss:$24 sps:$4 sm:$0xff]  }
 0x3c3   : > { %v2023_v53 = vmax.f32 %v1687_v10, 0.0  ;;  %v2025_v63 = vmax.f32 %v1880_v13, 0.0  ;;  %v6078_v10 = vld [vmem:[#allocation13 + $0x5dc] ss:$24 sps:$4 sm:$0xff]  }
 0x3c4   : > { %v7170_v0 = vpack.c.bf16 %v2022_v19, %v2018_v17  ;;  %v7172_v11 = vpack.c.bf16 %v2024_v33, %v2020_v18 }
 0x3c5   : > { %v7174_v42 = vpack.c.bf16 %v2023_v53, %v2019_v41  ;;  %v7176_v12 = vpack.c.bf16 %v2025_v63, %v2021_v52  ;;  %v1690_v44 = vpop.f32.mrb[64].mxu0  ;;  %v1883_v3 = vpop.f32.mrb[96].mxu1  ;;  %3558 = vmatpush1.bf16.msra.mxu0 %v6052_v14  ;;  %3944 = vmatpush1.bf16.msra.mxu1 %v6067_v16  ;;  %v6070_v52 = vld [vmem:[#allocation13 + $0x5d0] ss:$24 sps:$4 sm:$0xff]  }
 0x3c6   : > { %8264 = vst [vmem:[#allocation47_spill] sm:$0xff] %v7170_v0  ;;  %v1691_v61 = vadd.f32 %v1690_v44, %v7009_v54  ;;  %v1884_v59 = vadd.f32 %v1883_v3, %v7013_v62  ;;  %v1692_v2 = vpop.f32.mrb[65].mxu0  ;;  %v1885_v1 = vpop.f32.mrb[97].mxu1  ;;  %3559 = vmatprep.subr.bf16.mxu0 %v6063_v15  ;;  %3945 = vmatprep.subr.bf16.mxu1 %v6075_v40  ;;  %v6076_v53 = vld [vmem:[#allocation13 + $0x5d8] ss:$24 sps:$4 sm:$0xff]  }
 0x3c7   : > { %8265 = vst [vmem:[#allocation48_spill] sm:$0xff] %v7174_v42  ;;  %v1693_v13 = vadd.f32 %v1692_v2, %v7016_v55  ;;  %v1886_v17 = vadd.f32 %v1885_v1, %v7020_v56  ;;  %v1694_v18 = vpop.f32.mrb[66].mxu0  ;;  %v1887_v19 = vpop.f32.mrb[98].mxu1  ;;  %3440 = vmatprep.mubr.bf16.mxu0 %v7174_v42  ;;  %3826 = vmatprep.mubr.bf16.mxu1 %v7174_v42  ;;  %v6081_v1 = vld [vmem:[#allocation13 + $0x14] ss:$24 sps:$4 sm:$0xff]  }
 0x3c8   : > { %v1695_v14 = vadd.f32 %v1694_v18, %v7009_v54  ;;  %v1888_v16 = vadd.f32 %v1887_v19, %v7013_v62  ;;  %v1696_v33 = vpop.f32.mrb[67].mxu0  ;;  %v1889_v41 = vpop.f32.mrb[99].mxu1  ;;  %3441 = vmatmul.mubr.bf16.gmra.mrb[124].mxu0 %v7170_v0  ;;  %3827 = vmatmul.mubr.bf16.gmra.mrb[156].mxu1 %v7170_v0  ;;  %v2026_v63 = vmax.f32 %v1691_v61, 0.0  ;;  %v2028_v44 = vmax.f32 %v1884_v59, 0.0 }
 0x3c9   : > { %v1697_v15 = vadd.f32 %v1696_v33, %v7016_v55  ;;  %v1890_v40 = vadd.f32 %v1889_v41, %v7020_v56  ;;  %3560 = vmatpush1.bf16.msra.mxu0 %v6061_v51  ;;  %3946 = vmatpush1.bf16.msra.mxu1 %v6073_v26  ;;  %v2027_v18 = vmax.f32 %v1693_v13, 0.0  ;;  %v2029_v19 = vmax.f32 %v1886_v17, 0.0 }
 0x3ca   : > { %v2030_v3 = vmax.f32 %v1695_v14, 0.0  ;;  %v2032_v2 = vmax.f32 %v1888_v16, 0.0  ;;  %3561 = vmatprep.subr.bf16.mxu0 %v6072_v9  ;;  %3947 = vmatprep.subr.bf16.mxu1 %v6078_v10 }
 0x3cb   : > { %v2031_v48 = vmax.f32 %v1697_v15, 0.0  ;;  %v2033_v50 = vmax.f32 %v1890_v40, 0.0 }
 0x3cc   : > { %v7190_v60 = vpack.c.bf16 %v2030_v3, %v2026_v63  ;;  %v7192_v33 = vpack.c.bf16 %v2032_v2, %v2028_v44 }
 0x3cd   : > { %v7194_v41 = vpack.c.bf16 %v2031_v48, %v2027_v18  ;;  %v7196_v51 = vpack.c.bf16 %v2033_v50, %v2029_v19  ;;  %v1700_v26 = vpop.f32.mrb[68].mxu0  ;;  %v1893_v61 = vpop.f32.mrb[100].mxu1  ;;  %3562 = vmatpush1.bf16.msra.mxu0 %v6070_v52  ;;  %3948 = vmatpush1.bf16.msra.mxu1 %v6076_v53  ;;  %v7204_v50 = vld [vmem:[#allocation13 + $0x314] ss:$24 sps:$4 sm:$0xff]  }
 0x3ce   : > { %8266 = vst [vmem:[#allocation49_spill] sm:$0xff] %v7190_v60  ;;  %v1701_v59 = vadd.f32 %v1700_v26, %v7009_v54  ;;  %v1894_v9 = vadd.f32 %v1893_v61, %v7013_v62  ;;  %v1702_v10 = vpop.f32.mrb[69].mxu0  ;;  %v1895_v13 = vpop.f32.mrb[101].mxu1  ;;  %4110 = vmatprep.subr.bf16.mxu0 %v6081_v1  ;;  %5216 = vmatprep.subr.bf16.mxu1 %v7204_v50 }
 0x3cf   : > { %8267 = vst [vmem:[#allocation50_spill] sm:$0xff] %v7194_v41  ;;  %v1703_v17 = vadd.f32 %v1702_v10, %v7016_v55  ;;  %v1896_v14 = vadd.f32 %v1895_v13, %v7020_v56  ;;  %v1704_v16 = vpop.f32.mrb[70].mxu0  ;;  %v1897_v48 = vpop.f32.mrb[102].mxu1  ;;  %3450 = vmatprep.mubr.bf16.mxu0 %v7194_v41  ;;  %3836 = vmatprep.mubr.bf16.mxu1 %v7194_v41 }
 0x3d0   : > { %v1705_v15 = vadd.f32 %v1704_v16, %v7009_v54  ;;  %v1898_v40 = vadd.f32 %v1897_v48, %v7013_v62  ;;  %v1706_v52 = vpop.f32.mrb[71].mxu0  ;;  %v1899_v53 = vpop.f32.mrb[103].mxu1  ;;  %3451 = vmatmul.mubr.bf16.gmra.mrb[128].mxu0 %v7190_v60  ;;  %3837 = vmatmul.mubr.bf16.gmra.mrb[160].mxu1 %v7190_v60  ;;  %v2034_v3 = vmax.f32 %v1701_v59, 0.0  ;;  %v2036_v2 = vmax.f32 %v1894_v9, 0.0 }
 0x3d1   : > { %v1707_v63 = vadd.f32 %v1706_v52, %v7016_v55  ;;  %v1900_v44 = vadd.f32 %v1899_v53, %v7020_v56  ;;  %v2035_v19 = vmax.f32 %v1703_v17, 0.0  ;;  %v2037_v26 = vmax.f32 %v1896_v14, 0.0 }
 0x3d2   : > { %v2038_v1 = vmax.f32 %v1705_v15, 0.0  ;;  %v2040_v18 = vmax.f32 %v1898_v40, 0.0 }
 0x3d3   : > { %v2039_v61 = vmax.f32 %v1707_v63, 0.0  ;;  %v2041_v10 = vmax.f32 %v1900_v44, 0.0 }
 0x3d4   : > { %v7213_v13 = vpack.c.bf16 %v2038_v1, %v2034_v3  ;;  %v7215_v16 = vpack.c.bf16 %v2040_v18, %v2036_v2 }
 0x3d5   : > { %v7217_v48 = vpack.c.bf16 %v2039_v61, %v2035_v19  ;;  %v7219_v57 = vpack.c.bf16 %v2041_v10, %v2037_v26  ;;  %v1710_v52 = vpop.f32.mrb[72].mxu0  ;;  %v1903_v53 = vpop.f32.mrb[104].mxu1 }
 0x3d6   : > { %8268 = vst [vmem:[#allocation51_spill] sm:$0xff] %v7213_v13  ;;  %v1711_v58 = vadd.f32 %v1710_v52, %v7009_v54  ;;  %v1904_v59 = vadd.f32 %v1903_v53, %v7013_v62  ;;  %v1712_v9 = vpop.f32.mrb[73].mxu0  ;;  %v1905_v15 = vpop.f32.mrb[105].mxu1 }
 0x3d7   : > { %8269 = vst [vmem:[#allocation52_spill] sm:$0xff] %v7217_v48  ;;  %v1713_v17 = vadd.f32 %v1712_v9, %v7016_v55  ;;  %v1906_v14 = vadd.f32 %v1905_v15, %v7020_v56  ;;  %v1714_v40 = vpop.f32.mrb[74].mxu0  ;;  %v1907_v63 = vpop.f32.mrb[106].mxu1  ;;  %3460 = vmatprep.mubr.bf16.mxu0 %v7217_v48  ;;  %3846 = vmatprep.mubr.bf16.mxu1 %v7217_v48 }
 0x3d8   : > { %v1715_v44 = vadd.f32 %v1714_v40, %v7009_v54  ;;  %v1908_v3 = vadd.f32 %v1907_v63, %v7013_v62  ;;  %v1716_v2 = vpop.f32.mrb[75].mxu0  ;;  %v1909_v1 = vpop.f32.mrb[107].mxu1  ;;  %3461 = vmatmul.mubr.bf16.gmra.mrb[132].mxu0 %v7213_v13  ;;  %3847 = vmatmul.mubr.bf16.gmra.mrb[164].mxu1 %v7213_v13  ;;  %v2042_v26 = vmax.f32 %v1711_v58, 0.0  ;;  %v2044_v61 = vmax.f32 %v1904_v59, 0.0 }
 0x3d9   : > { %v1717_v18 = vadd.f32 %v1716_v2, %v7016_v55  ;;  %v1910_v19 = vadd.f32 %v1909_v1, %v7020_v56  ;;  %v2043_v53 = vmax.f32 %v1713_v17, 0.0  ;;  %v2045_v9 = vmax.f32 %v1906_v14, 0.0 }
 0x3da   : > { %v2046_v10 = vmax.f32 %v1715_v44, 0.0  ;;  %v2048_v52 = vmax.f32 %v1908_v3, 0.0 }
 0x3db   : > { %v2047_v15 = vmax.f32 %v1717_v18, 0.0  ;;  %v2049_v40 = vmax.f32 %v1910_v19, 0.0 }
 0x3dc   : > { %v7233_v48 = vpack.c.bf16 %v2046_v10, %v2042_v26  ;;  %v7235_v63 = vpack.c.bf16 %v2048_v52, %v2044_v61 }
 0x3dd   : > { %v7237_v60 = vpack.c.bf16 %v2047_v15, %v2043_v53  ;;  %v7239_v41 = vpack.c.bf16 %v2049_v40, %v2045_v9  ;;  %v1720_v13 = vpop.f32.mrb[76].mxu0  ;;  %v1913_v2 = vpop.f32.mrb[108].mxu1 }
 0x3de   : > { %8270 = vst [vmem:[#allocation53_spill] sm:$0xff] %v7233_v48  ;;  %v1721_v1 = vadd.f32 %v1720_v13, %v7009_v54  ;;  %v1914_v58 = vadd.f32 %v1913_v2, %v7013_v62  ;;  %v1722_v59 = vpop.f32.mrb[77].mxu0  ;;  %v1915_v44 = vpop.f32.mrb[109].mxu1 }
 0x3df   : > { %8271 = vst [vmem:[#allocation54_spill] sm:$0xff] %v7237_v60  ;;  %v1723_v17 = vadd.f32 %v1722_v59, %v7016_v55  ;;  %v1916_v14 = vadd.f32 %v1915_v44, %v7020_v56  ;;  %v1724_v3 = vpop.f32.mrb[78].mxu0  ;;  %v1917_v18 = vpop.f32.mrb[110].mxu1  ;;  %3470 = vmatprep.mubr.bf16.mxu0 %v7237_v60  ;;  %3856 = vmatprep.mubr.bf16.mxu1 %v7237_v60 }
 0x3e0   : > { %v1725_v19 = vadd.f32 %v1724_v3, %v7009_v54  ;;  %v1918_v26 = vadd.f32 %v1917_v18, %v7013_v62  ;;  %v1726_v61 = vpop.f32.mrb[79].mxu0  ;;  %v1919_v13 = vpop.f32.mrb[111].mxu1  ;;  %3471 = vmatmul.mubr.bf16.gmra.mrb[136].mxu0 %v7233_v48  ;;  %3857 = vmatmul.mubr.bf16.gmra.mrb[168].mxu1 %v7233_v48  ;;  %v2050_v53 = vmax.f32 %v1721_v1, 0.0  ;;  %v2052_v9 = vmax.f32 %v1914_v58, 0.0 }
 0x3e1   : > { %v1727_v10 = vadd.f32 %v1726_v61, %v7016_v55  ;;  %v1920_v52 = vadd.f32 %v1919_v13, %v7020_v56  ;;  %v2051_v2 = vmax.f32 %v1723_v17, 0.0  ;;  %v2053_v59 = vmax.f32 %v1916_v14, 0.0 }
 0x3e2   : > { %v2054_v15 = vmax.f32 %v1725_v19, 0.0  ;;  %v2056_v40 = vmax.f32 %v1918_v26, 0.0 }
 0x3e3   : > { %v2055_v44 = vmax.f32 %v1727_v10, 0.0  ;;  %v2057_v3 = vmax.f32 %v1920_v52, 0.0 }
 0x3e4   : > { %v7253_v60 = vpack.c.bf16 %v2054_v15, %v2050_v53  ;;  %v7255_v18 = vpack.c.bf16 %v2056_v40, %v2052_v9 }
 0x3e5   : > { %v7257_v0 = vpack.c.bf16 %v2055_v44, %v2051_v2  ;;  %v7259_v42 = vpack.c.bf16 %v2057_v3, %v2053_v59  ;;  %v1730_v48 = vpop.f32.mrb[80].mxu0  ;;  %v1923_v61 = vpop.f32.mrb[112].mxu1 }
 0x3e6   : > { %8272 = vst [vmem:[#allocation55_spill] sm:$0xff] %v7253_v60  ;;  %v1731_v13 = vadd.f32 %v1730_v48, %v7009_v54  ;;  %v1924_v1 = vadd.f32 %v1923_v61, %v7013_v62  ;;  %v1732_v58 = vpop.f32.mrb[81].mxu0  ;;  %v1925_v19 = vpop.f32.mrb[113].mxu1 }
 0x3e7   : > { %8273 = vst [vmem:[#allocation56_spill] sm:$0xff] %v7257_v0  ;;  %v1733_v17 = vadd.f32 %v1732_v58, %v7016_v55  ;;  %v1926_v14 = vadd.f32 %v1925_v19, %v7020_v56  ;;  %v1734_v26 = vpop.f32.mrb[82].mxu0  ;;  %v1927_v10 = vpop.f32.mrb[114].mxu1  ;;  %3480 = vmatprep.mubr.bf16.mxu0 %v7257_v0  ;;  %3866 = vmatprep.mubr.bf16.mxu1 %v7257_v0 }
 0x3e8   : > { %v1735_v52 = vadd.f32 %v1734_v26, %v7009_v54  ;;  %v1928_v53 = vadd.f32 %v1927_v10, %v7013_v62  ;;  %v1736_v9 = vpop.f32.mrb[83].mxu0  ;;  %v1929_v48 = vpop.f32.mrb[115].mxu1  ;;  %3481 = vmatmul.mubr.bf16.gmra.mrb[140].mxu0 %v7253_v60  ;;  %3867 = vmatmul.mubr.bf16.gmra.mrb[172].mxu1 %v7253_v60  ;;  %v2058_v2 = vmax.f32 %v1731_v13, 0.0  ;;  %v2060_v59 = vmax.f32 %v1924_v1, 0.0 }
 0x3e9   : > { %v1737_v15 = vadd.f32 %v1736_v9, %v7016_v55  ;;  %v1930_v40 = vadd.f32 %v1929_v48, %v7020_v56  ;;  %v2059_v61 = vmax.f32 %v1733_v17, 0.0  ;;  %v2061_v58 = vmax.f32 %v1926_v14, 0.0 }
 0x3ea   : > { %v2062_v44 = vmax.f32 %v1735_v52, 0.0  ;;  %v2064_v3 = vmax.f32 %v1928_v53, 0.0 }
 0x3eb   : > { %v2063_v19 = vmax.f32 %v1737_v15, 0.0  ;;  %v2065_v26 = vmax.f32 %v1930_v40, 0.0 }
 0x3ec   : > { %v7273_v0 = vpack.c.bf16 %v2062_v44, %v2058_v2  ;;  %v7275_v10 = vpack.c.bf16 %v2064_v3, %v2060_v59 }
 0x3ed   : > { %v7277_v34 = vpack.c.bf16 %v2063_v19, %v2059_v61  ;;  %v7279_v39 = vpack.c.bf16 %v2065_v26, %v2061_v58  ;;  %v1740_v60 = vpop.f32.mrb[84].mxu0  ;;  %v1933_v9 = vpop.f32.mrb[116].mxu1 }
 0x3ee   : > { %8274 = vst [vmem:[#allocation57_spill] sm:$0xff] %v7273_v0  ;;  %v1741_v48 = vadd.f32 %v1740_v60, %v7009_v54  ;;  %v1934_v13 = vadd.f32 %v1933_v9, %v7013_v62  ;;  %v1742_v1 = vpop.f32.mrb[85].mxu0  ;;  %v1935_v52 = vpop.f32.mrb[117].mxu1 }
 0x3ef   : > { %8275 = vst [vmem:[#allocation58_spill] sm:$0xff] %v7277_v34  ;;  %v1743_v17 = vadd.f32 %v1742_v1, %v7016_v55  ;;  %v1936_v14 = vadd.f32 %v1935_v52, %v7020_v56  ;;  %v1744_v53 = vpop.f32.mrb[86].mxu0  ;;  %v1937_v15 = vpop.f32.mrb[118].mxu1  ;;  %3490 = vmatprep.mubr.bf16.mxu0 %v7277_v34  ;;  %3876 = vmatprep.mubr.bf16.mxu1 %v7277_v34 }
 0x3f0   : > { %v1745_v40 = vadd.f32 %v1744_v53, %v7009_v54  ;;  %v1938_v2 = vadd.f32 %v1937_v15, %v7013_v62  ;;  %v1746_v59 = vpop.f32.mrb[87].mxu0  ;;  %v1939_v60 = vpop.f32.mrb[119].mxu1  ;;  %3491 = vmatmul.mubr.bf16.gmra.mrb[144].mxu0 %v7273_v0  ;;  %3877 = vmatmul.mubr.bf16.gmra.mrb[176].mxu1 %v7273_v0  ;;  %v2066_v61 = vmax.f32 %v1741_v48, 0.0  ;;  %v2068_v58 = vmax.f32 %v1934_v13, 0.0 }
 0x3f1   : > { %v1747_v44 = vadd.f32 %v1746_v59, %v7016_v55  ;;  %v1940_v3 = vadd.f32 %v1939_v60, %v7020_v56  ;;  %v2067_v9 = vmax.f32 %v1743_v17, 0.0  ;;  %v2069_v1 = vmax.f32 %v1936_v14, 0.0 }
 0x3f2   : > { %v2070_v19 = vmax.f32 %v1745_v40, 0.0  ;;  %v2072_v26 = vmax.f32 %v1938_v2, 0.0 }
 0x3f3   : > { %v2071_v52 = vmax.f32 %v1747_v44, 0.0  ;;  %v2073_v53 = vmax.f32 %v1940_v3, 0.0 }
 0x3f4   : > { %v7293_v34 = vpack.c.bf16 %v2070_v19, %v2066_v61  ;;  %v7295_v15 = vpack.c.bf16 %v2072_v26, %v2068_v58 }
 0x3f5   : > { %v7297_v20 = vpack.c.bf16 %v2071_v52, %v2067_v9  ;;  %v7299_v22 = vpack.c.bf16 %v2073_v53, %v2069_v1  ;;  %v1750_v0 = vpop.f32.mrb[88].mxu0  ;;  %v1943_v59 = vpop.f32.mrb[120].mxu1 }
 0x3f6   : > { %8276 = vst [vmem:[#allocation59_spill] sm:$0xff] %v7293_v34  ;;  %v1751_v60 = vadd.f32 %v1750_v0, %v7009_v54  ;;  %v1944_v48 = vadd.f32 %v1943_v59, %v7013_v62  ;;  %v1752_v13 = vpop.f32.mrb[89].mxu0  ;;  %v1945_v40 = vpop.f32.mrb[121].mxu1 }
 0x3f7   : > { %8277 = vst [vmem:[#allocation60_spill] sm:$0xff] %v7297_v20  ;;  %v1753_v17 = vadd.f32 %v1752_v13, %v7016_v55  ;;  %v1946_v14 = vadd.f32 %v1945_v40, %v7020_v56  ;;  %v1754_v2 = vpop.f32.mrb[90].mxu0  ;;  %v1947_v44 = vpop.f32.mrb[122].mxu1  ;;  %3500 = vmatprep.mubr.bf16.mxu0 %v7297_v20  ;;  %3886 = vmatprep.mubr.bf16.mxu1 %v7297_v20 }
 0x3f8   : > { %v1755_v3 = vadd.f32 %v1754_v2, %v7009_v54  ;;  %v1948_v61 = vadd.f32 %v1947_v44, %v7013_v62  ;;  %v1756_v58 = vpop.f32.mrb[91].mxu0  ;;  %v1949_v0 = vpop.f32.mrb[123].mxu1  ;;  %3501 = vmatmul.mubr.bf16.gmra.mrb[148].mxu0 %v7293_v34  ;;  %3887 = vmatmul.mubr.bf16.gmra.mrb[180].mxu1 %v7293_v34  ;;  %v2074_v9 = vmax.f32 %v1751_v60, 0.0  ;;  %v2076_v1 = vmax.f32 %v1944_v48, 0.0 }
 0x3f9   : > { %v1757_v19 = vadd.f32 %v1756_v58, %v7016_v55  ;;  %v1950_v26 = vadd.f32 %v1949_v0, %v7020_v56  ;;  %v2075_v59 = vmax.f32 %v1753_v17, 0.0  ;;  %v2077_v13 = vmax.f32 %v1946_v14, 0.0 }
 0x3fa   : > { %v2078_v52 = vmax.f32 %v1755_v3, 0.0  ;;  %v2080_v53 = vmax.f32 %v1948_v61, 0.0 }
 0x3fb   : > { %v2079_v40 = vmax.f32 %v1757_v19, 0.0  ;;  %v2081_v2 = vmax.f32 %v1950_v26, 0.0 }
 0x3fc   : > { %v7313_v20 = vpack.c.bf16 %v2078_v52, %v2074_v9  ;;  %v7315_v44 = vpack.c.bf16 %v2080_v53, %v2076_v1 }
 0x3fd   : > { %v7317_v23 = vpack.c.bf16 %v2079_v40, %v2075_v59  ;;  %v7319_v30 = vpack.c.bf16 %v2081_v2, %v2077_v13  ;;  %v1760_v34 = vpop.f32.mrb[92].mxu0  ;;  %v1953_v58 = vpop.f32.mrb[124].mxu1 }
 0x3fe   : > { %v1761_v0 = vadd.f32 %v1760_v34, %v7009_v54  ;;  %v1954_v60 = vadd.f32 %v1953_v58, %v7013_v62  ;;  %v1762_v48 = vpop.f32.mrb[93].mxu0  ;;  %v1955_v3 = vpop.f32.mrb[125].mxu1 }
 0x3ff   : > { %8278 = vst [vmem:[#allocation61_spill] sm:$0xff] %v7317_v23  ;;  %v1763_v17 = vadd.f32 %v1762_v48, %v7016_v55  ;;  %v1956_v14 = vadd.f32 %v1955_v3, %v7020_v56  ;;  %v1764_v61 = vpop.f32.mrb[94].mxu0  ;;  %v1957_v19 = vpop.f32.mrb[126].mxu1  ;;  %3510 = vmatprep.mubr.bf16.mxu0 %v7317_v23  ;;  %3896 = vmatprep.mubr.bf16.mxu1 %v7317_v23 }
 0x400   : > { %v1765_v26 = vadd.f32 %v1764_v61, %v7009_v54  ;;  %v1958_v9 = vadd.f32 %v1957_v19, %v7013_v62  ;;  %v1766_v1 = vpop.f32.mrb[95].mxu0  ;;  %v1959_v34 = vpop.f32.mrb[127].mxu1  ;;  %3511 = vmatmul.mubr.bf16.gmra.mrb[152].mxu0 %v7313_v20  ;;  %3897 = vmatmul.mubr.bf16.gmra.mrb[184].mxu1 %v7313_v20  ;;  %v2082_v59 = vmax.f32 %v1761_v0, 0.0  ;;  %v2084_v13 = vmax.f32 %v1954_v60, 0.0  ;;  %v7347_v0 = vld [vmem:[#allocation13 + $0x310] ss:$24 sps:$4 sm:$0xff]  }
 0x401   : > { %v1767_v52 = vadd.f32 %v1766_v1, %v7016_v55  ;;  %v1960_v53 = vadd.f32 %v1959_v34, %v7020_v56  ;;  %v2083_v58 = vmax.f32 %v1763_v17, 0.0  ;;  %v2085_v48 = vmax.f32 %v1956_v14, 0.0  ;;  %v6079_v55 = vld [vmem:[#allocation13 + $0x10] ss:$24 sps:$4 sm:$0xff]   ;;  %v6084_v56 = vld [vmem:[#allocation13 + $0x44] ss:$24 sps:$4 sm:$0xff]  }
 0x402   : > { %v2086_v40 = vmax.f32 %v1765_v26, 0.0  ;;  %v2088_v2 = vmax.f32 %v1958_v9, 0.0  ;;  %v7351_v60 = vld [vmem:[#allocation13 + $0x344] ss:$24 sps:$4 sm:$0xff]   ;;  %v6082_v17 = vld [vmem:[#allocation13 + $0x40] ss:$24 sps:$4 sm:$0xff]  }
 0x403   : > { %v2087_v3 = vmax.f32 %v1767_v52, 0.0  ;;  %v2089_v54 = vmax.f32 %v1960_v53, 0.0  ;;  %v6087_v14 = vld [vmem:[#allocation13 + $0x74] ss:$24 sps:$4 sm:$0xff]   ;;  %v7356_v26 = vld [vmem:[#allocation13 + $0x340] ss:$24 sps:$4 sm:$0xff]  }
 0x404   : > { %v7333_v61 = vpack.c.bf16 %v2086_v40, %v2082_v59  ;;  %v7335_v62 = vpack.c.bf16 %v2088_v2, %v2084_v13  ;;  %v6085_v9 = vld [vmem:[#allocation13 + $0x70] ss:$24 sps:$4 sm:$0xff]   ;;  %v7359_v1 = vld [vmem:[#allocation13 + $0x374] ss:$24 sps:$4 sm:$0xff]   ;;  %v6090_v34 = vld [vmem:[#allocation13 + $0xa4] ss:$24 sps:$4 sm:$0xff]  }
 0x405   : > { %v7337_v19 = vpack.c.bf16 %v2087_v3, %v2083_v58  ;;  %v7339_v23 = vpack.c.bf16 %v2089_v54, %v2085_v48  ;;  %v7362_v52 = vld [vmem:[#allocation13 + $0x370] ss:$24 sps:$4 sm:$0xff]   ;;  %v7366_v53 = vld [vmem:[#allocation13 + $0x3a4] ss:$24 sps:$4 sm:$0xff]   ;;  %v6088_v59 = vld [vmem:[#allocation13 + $0xa0] ss:$24 sps:$4 sm:$0xff]  }
 0x406   : > { %8279 = vst [vmem:[#allocation62_spill] sm:$0xff] %v7333_v61  ;;  %v6093_v13 = vld [vmem:[#allocation13 + $0xd4] ss:$24 sps:$4 sm:$0xff]   ;;  %v7372_v40 = vld [vmem:[#allocation13 + $0x3a0] ss:$24 sps:$4 sm:$0xff]  }
 0x407   : > { %8280 = vst [vmem:[#allocation63_spill] sm:$0xff] %v7337_v19  ;;  %3520 = vmatprep.mubr.bf16.mxu0 %v7337_v19  ;;  %3906 = vmatprep.mubr.bf16.mxu1 %v7337_v19  ;;  %v6091_v2 = vld [vmem:[#allocation13 + $0xd0] ss:$24 sps:$4 sm:$0xff]   ;;  %v7375_v58 = vld [vmem:[#allocation13 + $0x3d4] ss:$24 sps:$4 sm:$0xff]  }
 0x408   : > { %3521 = vmatmul.mubr.bf16.gmra.mrb[156].mxu0 %v7333_v61  ;;  %3907 = vmatmul.mubr.bf16.gmra.mrb[188].mxu1 %v7333_v61  ;;  %v6096_v48 = vld [vmem:[#allocation13 + $0x104] ss:$24 sps:$4 sm:$0xff]   ;;  %v7378_v3 = vld [vmem:[#allocation13 + $0x3d0] ss:$24 sps:$4 sm:$0xff]   ;;  %v7455_v61 = vld [vmem:[#allocation13 + $0x5b4] ss:$24 sps:$4 sm:$0xff]  }
 0x409   : > { %3563 = vmatprep.mubr.bf16.mxu0 %v7036_v29  ;;  %3949 = vmatprep.mubr.bf16.mxu1 %v7036_v29  ;;  %v7382_v54 = vld [vmem:[#allocation13 + $0x404] ss:$24 sps:$4 sm:$0xff]   ;;  %v6157_v29 = vld [vmem:[#allocation13 + $0x2b0] ss:$24 sps:$4 sm:$0xff]  }
 0x40a   : > { %v6168_v19 = vld [vmem:[#allocation13 + $0x2e4] ss:$24 sps:$4 sm:$0xff]  }
 0x410   : > { %3564 = vmatmul.mubr.bf16.vlgmr.msra.gmra.mrb[96].mxu0 %v7032_v25  ;;  %3950 = vmatmul.mubr.bf16.vlgmr.msra.gmra.mrb[128].mxu1 %v7032_v25  ;;  %v7452_v25 = vld [vmem:[#allocation13 + $0x580] ss:$24 sps:$4 sm:$0xff]  }
 0x411   : > { %4111 = vmatpush1.bf16.msra.mxu0 %v6079_v55  ;;  %3573 = vmatprep.mubr.bf16.mxu0 %v7056_v8  ;;  %v6094_v55 = vld [vmem:[#allocation13 + $0x100] ss:$24 sps:$4 sm:$0xff]  }
 0x412   : > { %3959 = vmatprep.mubr.bf16.mxu1 %v7056_v8  ;;  %4112 = vmatprep.subr.bf16.mxu0 %v6084_v56  ;;  %v6099_v56 = vld [vmem:[#allocation13 + $0x134] ss:$24 sps:$4 sm:$0xff]   ;;  %v6150_v8 = vld [vmem:[#allocation13 + $0x284] ss:$24 sps:$4 sm:$0xff]  }
 0x413   : > { %5232 = vmatpush1.bf16.msra.mxu1 %v7347_v0 }
 0x414   : > { %5217 = vmatprep.subr.bf16.mxu1 %v7351_v60 }
 0x415   : > { %4113 = vmatpush1.bf16.msra.mxu0 %v6082_v17  ;;  %v7388_v17 = vld [vmem:[#allocation13 + $0x400] ss:$24 sps:$4 sm:$0xff]  }
 0x416   : > { %4114 = vmatprep.subr.bf16.mxu0 %v6087_v14  ;;  %v6097_v14 = vld [vmem:[#allocation13 + $0x130] ss:$24 sps:$4 sm:$0xff]  }
 0x417   : > { %5233 = vmatpush1.bf16.msra.mxu1 %v7356_v26 }
 0x418   : > { %3574 = vmatmul.mubr.bf16.gmra.mrb[100].mxu0 %v7052_v6  ;;  %3960 = vmatmul.mubr.bf16.gmra.mrb[132].mxu1 %v7052_v6  ;;  %v7439_v6 = vld [vmem:[#allocation13 + $0x554] ss:$24 sps:$4 sm:$0xff]  }
 0x419   : > { %3583 = vmatprep.mubr.bf16.mxu0 %v7076_v28  ;;  %3969 = vmatprep.mubr.bf16.mxu1 %v7076_v28  ;;  %v6132_v28 = vld [vmem:[#allocation13 + $0x224] ss:$24 sps:$4 sm:$0xff]  }
 0x41a   : > { %4115 = vmatpush1.bf16.msra.mxu0 %v6085_v9  ;;  %5218 = vmatprep.subr.bf16.mxu1 %v7359_v1  ;;  %v7391_v9 = vld [vmem:[#allocation13 + $0x434] ss:$24 sps:$4 sm:$0xff]  }
 0x41b   : > { %4116 = vmatprep.subr.bf16.mxu0 %v6090_v34  ;;  %5234 = vmatpush1.bf16.msra.mxu1 %v7362_v52  ;;  %v6102_v34 = vld [vmem:[#allocation13 + $0x164] ss:$24 sps:$4 sm:$0xff]  }
 0x41c   : > { %5219 = vmatprep.subr.bf16.mxu1 %v7366_v53 }
 0x41e   : > { %4117 = vmatpush1.bf16.msra.mxu0 %v6088_v59  ;;  %v7394_v59 = vld [vmem:[#allocation13 + $0x430] ss:$24 sps:$4 sm:$0xff]  }
 0x41f   : > { %4118 = vmatprep.subr.bf16.mxu0 %v6093_v13  ;;  %5235 = vmatpush1.bf16.msra.mxu1 %v7372_v40  ;;  %v7398_v13 = vld [vmem:[#allocation13 + $0x464] ss:$24 sps:$4 sm:$0xff]  }
 0x420   : > { %3584 = vmatmul.mubr.bf16.gmra.mrb[104].mxu0 %v7072_v47  ;;  %3970 = vmatmul.mubr.bf16.gmra.mrb[136].mxu1 %v7072_v47  ;;  %v7423_v47 = vld [vmem:[#allocation13 + $0x4f4] ss:$24 sps:$4 sm:$0xff]  }
 0x421   : > { %3593 = vmatprep.mubr.bf16.mxu0 %v7096_v38  ;;  %3979 = vmatprep.mubr.bf16.mxu1 %v7096_v38  ;;  %v6114_v38 = vld [vmem:[#allocation13 + $0x1c4] ss:$24 sps:$4 sm:$0xff]  }
 0x422   : > { %4119 = vmatpush1.bf16.msra.mxu0 %v6091_v2  ;;  %5220 = vmatprep.subr.bf16.mxu1 %v7375_v58  ;;  %v6100_v2 = vld [vmem:[#allocation13 + $0x160] ss:$24 sps:$4 sm:$0xff]  }
 0x423   : > { %4120 = vmatprep.subr.bf16.mxu0 %v6096_v48  ;;  %5236 = vmatpush1.bf16.msra.mxu1 %v7378_v3  ;;  %v6105_v48 = vld [vmem:[#allocation13 + $0x194] ss:$24 sps:$4 sm:$0xff]  }
 0x424   : > { %5221 = vmatprep.subr.bf16.mxu1 %v7382_v54 }
 0x426   : > { %4121 = vmatpush1.bf16.msra.mxu0 %v6094_v55  ;;  %v7404_v55 = vld [vmem:[#allocation13 + $0x460] ss:$24 sps:$4 sm:$0xff]  }
 0x427   : > { %4122 = vmatprep.subr.bf16.mxu0 %v6099_v56  ;;  %5237 = vmatpush1.bf16.msra.mxu1 %v7388_v17  ;;  %v6103_v56 = vld [vmem:[#allocation13 + $0x190] ss:$24 sps:$4 sm:$0xff]  }
 0x428   : > { %3594 = vmatmul.mubr.bf16.gmra.mrb[108].mxu0 %v7092_v36  ;;  %3980 = vmatmul.mubr.bf16.gmra.mrb[140].mxu1 %v7092_v36  ;;  %v7407_v36 = vld [vmem:[#allocation13 + $0x494] ss:$24 sps:$4 sm:$0xff]  }
 0x429   : > { %3603 = vmatprep.mubr.bf16.mxu0 %v7116_v31  ;;  %3989 = vmatprep.mubr.bf16.mxu1 %v7116_v31  ;;  %v7420_v31 = vld [vmem:[#allocation13 + $0x4c0] ss:$24 sps:$4 sm:$0xff]  }
 0x42a   : > { %4123 = vmatpush1.bf16.msra.mxu0 %v6097_v14  ;;  %5222 = vmatprep.subr.bf16.mxu1 %v7391_v9  ;;  %v7410_v14 = vld [vmem:[#allocation13 + $0x490] ss:$24 sps:$4 sm:$0xff]  }
 0x42b   : > { %4124 = vmatprep.subr.bf16.mxu0 %v6102_v34  ;;  %5238 = vmatpush1.bf16.msra.mxu1 %v7394_v59  ;;  %v7414_v34 = vld [vmem:[#allocation13 + $0x4c4] ss:$24 sps:$4 sm:$0xff]  }
 0x42c   : > { %5223 = vmatprep.subr.bf16.mxu1 %v7398_v13 }
 0x42e   : > { %4125 = vmatpush1.bf16.msra.mxu0 %v6100_v2  ;;  %v6112_v2 = vld [vmem:[#allocation13 + $0x1c0] ss:$24 sps:$4 sm:$0xff]  }
 0x42f   : > { %4126 = vmatprep.subr.bf16.mxu0 %v6105_v48  ;;  %5239 = vmatpush1.bf16.msra.mxu1 %v7404_v55  ;;  %v6123_v48 = vld [vmem:[#allocation13 + $0x1f4] ss:$24 sps:$4 sm:$0xff]  }
 0x430   : > { %3604 = vmatmul.mubr.bf16.gmra.mrb[112].mxu0 %v7112_v4  ;;  %3990 = vmatmul.mubr.bf16.gmra.mrb[144].mxu1 %v7112_v4  ;;  %v6121_v4 = vld [vmem:[#allocation13 + $0x1f0] ss:$24 sps:$4 sm:$0xff]  }
 0x431   : > { %3613 = vmatprep.mubr.bf16.mxu0 %v7136_v32  ;;  %3999 = vmatprep.mubr.bf16.mxu1 %v7136_v32  ;;  %v7436_v32 = vld [vmem:[#allocation13 + $0x520] ss:$24 sps:$4 sm:$0xff]  }
 0x432   : > { %4127 = vmatpush1.bf16.msra.mxu0 %v6103_v56  ;;  %5224 = vmatprep.subr.bf16.mxu1 %v7407_v36  ;;  %v7426_v56 = vld [vmem:[#allocation13 + $0x4f0] ss:$24 sps:$4 sm:$0xff]  }
 0x433   : > { %4128 = vmatprep.subr.bf16.mxu0 %v6114_v38  ;;  %5240 = vmatpush1.bf16.msra.mxu1 %v7410_v14  ;;  %v7430_v38 = vld [vmem:[#allocation13 + $0x524] ss:$24 sps:$4 sm:$0xff]  }
 0x434   : > { %5225 = vmatprep.subr.bf16.mxu1 %v7414_v34 }
 0x436   : > { %4129 = vmatpush1.bf16.msra.mxu0 %v6112_v2  ;;  %v6130_v2 = vld [vmem:[#allocation13 + $0x220] ss:$24 sps:$4 sm:$0xff]  }
 0x437   : > { %4130 = vmatprep.subr.bf16.mxu0 %v6123_v48  ;;  %5241 = vmatpush1.bf16.msra.mxu1 %v7420_v31  ;;  %v6141_v48 = vld [vmem:[#allocation13 + $0x254] ss:$24 sps:$4 sm:$0xff]  }
 0x438   : > { %3614 = vmatmul.mubr.bf16.gmra.mrb[116].mxu0 %v7132_v21  ;;  %4000 = vmatmul.mubr.bf16.gmra.mrb[148].mxu1 %v7132_v21  ;;  %v6139_v21 = vld [vmem:[#allocation13 + $0x250] ss:$24 sps:$4 sm:$0xff]  }
 0x439   : > { %3623 = vmatprep.mubr.bf16.mxu0 %v7156_v45  ;;  %4009 = vmatprep.mubr.bf16.mxu1 %v7156_v45 }
 0x43a   : > { %4131 = vmatpush1.bf16.msra.mxu0 %v6121_v4  ;;  %5226 = vmatprep.subr.bf16.mxu1 %v7423_v47  ;;  %v7442_v4 = vld [vmem:[#allocation13 + $0x550] ss:$24 sps:$4 sm:$0xff]  }
 0x43b   : > { %4132 = vmatprep.subr.bf16.mxu0 %v6132_v28  ;;  %5242 = vmatpush1.bf16.msra.mxu1 %v7426_v56  ;;  %v7446_v28 = vld [vmem:[#allocation13 + $0x584] ss:$24 sps:$4 sm:$0xff]  }
 0x43c   : > { %5227 = vmatprep.subr.bf16.mxu1 %v7430_v38 }
 0x43e   : > { %4133 = vmatpush1.bf16.msra.mxu0 %v6130_v2  ;;  %v6148_v2 = vld [vmem:[#allocation13 + $0x280] ss:$24 sps:$4 sm:$0xff]  }
 0x43f   : > { %4134 = vmatprep.subr.bf16.mxu0 %v6141_v48  ;;  %5243 = vmatpush1.bf16.msra.mxu1 %v7436_v32  ;;  %v6159_v48 = vld [vmem:[#allocation13 + $0x2b4] ss:$24 sps:$4 sm:$0xff]  }
 0x440   : > { %3624 = vmatmul.mubr.bf16.gmra.mrb[120].mxu0 %v7152_v43  ;;  %4010 = vmatmul.mubr.bf16.gmra.mrb[152].mxu1 %v7152_v43 }
 0x441   : > { %3633 = vmatprep.mubr.bf16.mxu0 %v7176_v12  ;;  %4019 = vmatprep.mubr.bf16.mxu1 %v7176_v12 }
 0x442   : > { %4135 = vmatpush1.bf16.msra.mxu0 %v6139_v21  ;;  %5228 = vmatprep.subr.bf16.mxu1 %v7439_v6  ;;  %v7458_v21 = vld [vmem:[#allocation13 + $0x5b0] ss:$24 sps:$4 sm:$0xff]  }
 0x443   : > { %4136 = vmatprep.subr.bf16.mxu0 %v6150_v8  ;;  %5244 = vmatpush1.bf16.msra.mxu1 %v7442_v4  ;;  %v7462_v8 = vld [vmem:[#allocation13 + $0x5e4] ss:$24 sps:$4 sm:$0xff]  }
 0x444   : > { %5229 = vmatprep.subr.bf16.mxu1 %v7446_v28 }
 0x446   : > { %4137 = vmatpush1.bf16.msra.mxu0 %v6148_v2  ;;  %v6166_v2 = vld [vmem:[#allocation13 + $0x2e0] ss:$24 sps:$4 sm:$0xff]  }
 0x447   : > { %4138 = vmatprep.subr.bf16.mxu0 %v6159_v48  ;;  %5245 = vmatpush1.bf16.msra.mxu1 %v7452_v25  ;;  %v7468_v48 = vld [vmem:[#allocation13 + $0x5e0] ss:$24 sps:$4 sm:$0xff]  }
 0x448   : > { %3634 = vmatmul.mubr.bf16.gmra.mrb[124].mxu0 %v7172_v11  ;;  %4020 = vmatmul.mubr.bf16.gmra.mrb[156].mxu1 %v7172_v11 }
 0x449   : > { %3643 = vmatprep.mubr.bf16.mxu0 %v7196_v51  ;;  %4029 = vmatprep.mubr.bf16.mxu1 %v7196_v51 }
 0x44a   : > { %4139 = vmatpush1.bf16.msra.mxu0 %v6157_v29  ;;  %5230 = vmatprep.subr.bf16.mxu1 %v7455_v61  ;;  %v8284_v29 = vld [vmem:[#allocation41_spill] sm:$0xff] }
 0x44b   : > { %4140 = vmatprep.subr.bf16.mxu0 %v6168_v19  ;;  %5246 = vmatpush1.bf16.msra.mxu1 %v7458_v21 }
 0x44c   : > { %5231 = vmatprep.subr.bf16.mxu1 %v7462_v8 }
 0x44e   : > { %4141 = vmatpush1.bf16.msra.mxu0 %v6166_v2 }
 0x44f   : > { %5247 = vmatpush1.bf16.msra.mxu1 %v7468_v48  ;;  %4303 = vmatprep.subr.bf16.mxu0 %v7204_v50 }
 0x450   : > { %3644 = vmatmul.mubr.bf16.gmra.mrb[128].mxu0 %v7192_v33  ;;  %4030 = vmatmul.mubr.bf16.gmra.mrb[160].mxu1 %v7192_v33 }
 0x451   : > { %3653 = vmatprep.mubr.bf16.mxu0 %v7219_v57  ;;  %4039 = vmatprep.mubr.bf16.mxu1 %v7219_v57 }
 0x458   : > { %3654 = vmatmul.mubr.bf16.gmra.mrb[132].mxu0 %v7215_v16  ;;  %4040 = vmatmul.mubr.bf16.gmra.mrb[164].mxu1 %v7215_v16 }
 0x459   : > { %3663 = vmatprep.mubr.bf16.mxu0 %v7239_v41  ;;  %4049 = vmatprep.mubr.bf16.mxu1 %v7239_v41 }
 0x460   : > { %3664 = vmatmul.mubr.bf16.gmra.mrb[136].mxu0 %v7235_v63  ;;  %4050 = vmatmul.mubr.bf16.gmra.mrb[168].mxu1 %v7235_v63 }
 0x461   : > { %3673 = vmatprep.mubr.bf16.mxu0 %v7259_v42  ;;  %4059 = vmatprep.mubr.bf16.mxu1 %v7259_v42 }
 0x468   : > { %3674 = vmatmul.mubr.bf16.gmra.mrb[140].mxu0 %v7255_v18  ;;  %4060 = vmatmul.mubr.bf16.gmra.mrb[172].mxu1 %v7255_v18 }
 0x469   : > { %3683 = vmatprep.mubr.bf16.mxu0 %v7279_v39  ;;  %4069 = vmatprep.mubr.bf16.mxu1 %v7279_v39 }
 0x470   : > { %3684 = vmatmul.mubr.bf16.gmra.mrb[144].mxu0 %v7275_v10  ;;  %4070 = vmatmul.mubr.bf16.gmra.mrb[176].mxu1 %v7275_v10 }
 0x471   : > { %3693 = vmatprep.mubr.bf16.mxu0 %v7299_v22  ;;  %4079 = vmatprep.mubr.bf16.mxu1 %v7299_v22 }
 0x478   : > { %3694 = vmatmul.mubr.bf16.gmra.mrb[148].mxu0 %v7295_v15  ;;  %4080 = vmatmul.mubr.bf16.gmra.mrb[180].mxu1 %v7295_v15 }
 0x479   : > { %3703 = vmatprep.mubr.bf16.mxu0 %v7319_v30  ;;  %4089 = vmatprep.mubr.bf16.mxu1 %v7319_v30 }
 0x480   : > { %3704 = vmatmul.mubr.bf16.gmra.mrb[152].mxu0 %v7315_v44  ;;  %4090 = vmatmul.mubr.bf16.gmra.mrb[184].mxu1 %v7315_v44 }
 0x481   : > { %3713 = vmatprep.mubr.bf16.mxu0 %v7339_v23  ;;  %4099 = vmatprep.mubr.bf16.mxu1 %v7339_v23 }
 0x488   : > { %3714 = vmatmul.mubr.bf16.gmra.mrb[156].mxu0 %v7335_v62  ;;  %4100 = vmatmul.mubr.bf16.gmra.mrb[188].mxu1 %v7335_v62 }
 0x489   : > { %4142 = vmatprep.mubr.bf16.mxu0 %v7034_v27  ;;  %4395 = vmatprep.mubr.bf16.mxu1 %v7156_v45  ;;  %v8283_v27 = vld [vmem:[#allocation43_spill] sm:$0xff]  ;;  %v8299_v45 = vld [vmem:[#allocation28_spill] sm:$0xff] }
 0x490   : > { %4143 = vmatmul.mubr.bf16.vlgmr.msra.gmra.mrb[160].mxu0 %v7030_v24  ;;  %4396 = vmatmul.mubr.bf16.vlgmr.msra.gmra.mrb[192].mxu1 %v7152_v43  ;;  %v8281_v24 = vld [vmem:[#allocation39_spill] sm:$0xff] }
 0x491   : > { %4304 = vmatpush1.bf16.msra.mxu0 %v7347_v0  ;;  %4152 = vmatprep.mubr.bf16.mxu0 %v7054_v7  ;;  %v8286_v7 = vld [vmem:[#allocation45_spill] sm:$0xff] }
 0x492   : > { %4405 = vmatprep.mubr.bf16.mxu1 %v7176_v12  ;;  %4305 = vmatprep.subr.bf16.mxu0 %v7351_v60 }
 0x495   : > { %4306 = vmatpush1.bf16.msra.mxu0 %v7356_v26 }
 0x496   : > { %4307 = vmatprep.subr.bf16.mxu0 %v7359_v1  ;;  %v8301_v1 = vld [vmem:[#allocation55_spill] sm:$0xff] }
 0x498   : > { %4153 = vmatmul.mubr.bf16.gmra.mrb[164].mxu0 %v7050_v5  ;;  %4406 = vmatmul.mubr.bf16.gmra.mrb[196].mxu1 %v7172_v11  ;;  %v8285_v5 = vld [vmem:[#allocation46_spill] sm:$0xff] }
 0x499   : > { %4162 = vmatprep.mubr.bf16.mxu0 %v7074_v49  ;;  %4415 = vmatprep.mubr.bf16.mxu1 %v7196_v51  ;;  %v8290_v49 = vld [vmem:[#allocation49_spill] sm:$0xff] }
 0x49a   : > { %4308 = vmatpush1.bf16.msra.mxu0 %v7362_v52  ;;  %v8302_v52 = vld [vmem:[#allocation58_spill] sm:$0xff] }
 0x49b   : > { %4309 = vmatprep.subr.bf16.mxu0 %v7366_v53 }
 0x49e   : > { %4310 = vmatpush1.bf16.msra.mxu0 %v7372_v40 }
 0x49f   : > { %4311 = vmatprep.subr.bf16.mxu0 %v7375_v58 }
 0x4a0   : > { %4163 = vmatmul.mubr.bf16.gmra.mrb[168].mxu0 %v7070_v46  ;;  %4416 = vmatmul.mubr.bf16.gmra.mrb[200].mxu1 %v7192_v33  ;;  %v8287_v46 = vld [vmem:[#allocation48_spill] sm:$0xff] }
 0x4a1   : > { %4172 = vmatprep.mubr.bf16.mxu0 %v7094_v37  ;;  %4425 = vmatprep.mubr.bf16.mxu1 %v7219_v57  ;;  %v8282_v57 = vld [vmem:[#allocation37_spill] sm:$0xff] }
 0x4a2   : > { %4312 = vmatpush1.bf16.msra.mxu0 %v7378_v3  ;;  %v7576_v37 = vld [vmem:[#allocation14] sm:$0x3f] }
 0x4a3   : > { %4313 = vmatprep.subr.bf16.mxu0 %v7382_v54  ;;  %v7593_v11 = vrot.slane %v7576_v37, %v8299_v45 }
 0x4a6   : > { %4314 = vmatpush1.bf16.msra.mxu0 %v7388_v17 }
 0x4a7   : > { %4315 = vmatprep.subr.bf16.mxu0 %v7391_v9 }
 0x4a8   : > { %4173 = vmatmul.mubr.bf16.gmra.mrb[172].mxu0 %v7090_v35  ;;  %4426 = vmatmul.mubr.bf16.gmra.mrb[204].mxu1 %v7215_v16  ;;  %v8292_v35 = vld [vmem:[#allocation51_spill] sm:$0xff] }
 0x4a9   : > { %4182 = vmatprep.mubr.bf16.mxu0 %v8281_v24  ;;  %4435 = vmatprep.mubr.bf16.mxu1 %v7239_v41 }
 0x4aa   : > { %4316 = vmatpush1.bf16.msra.mxu0 %v7394_v59 }
 0x4ab   : > { %4317 = vmatprep.subr.bf16.mxu0 %v7398_v13 }
 0x4ae   : > { %4318 = vmatpush1.bf16.msra.mxu0 %v7404_v55 }
 0x4af   : > { %4319 = vmatprep.subr.bf16.mxu0 %v7407_v36  ;;  %v8293_v36 = vld [vmem:[#allocation54_spill] sm:$0xff] }
 0x4b0   : > { %4183 = vmatmul.mubr.bf16.gmra.mrb[176].mxu0 %v8282_v57  ;;  %4436 = vmatmul.mubr.bf16.gmra.mrb[208].mxu1 %v7235_v63 }
 0x4b1   : > { %4192 = vmatprep.mubr.bf16.mxu0 %v8283_v27  ;;  %4445 = vmatprep.mubr.bf16.mxu1 %v7259_v42 }
 0x4b2   : > { %4320 = vmatpush1.bf16.msra.mxu0 %v7410_v14 }
 0x4b3   : > { %4321 = vmatprep.subr.bf16.mxu0 %v7414_v34 }
 0x4b6   : > { %4322 = vmatpush1.bf16.msra.mxu0 %v7420_v31  ;;  %v8295_v31 = vld [vmem:[#allocation27_spill] sm:$0xff] }
 0x4b7   : > { %4323 = vmatprep.subr.bf16.mxu0 %v7423_v47  ;;  %v8288_v47 = vld [vmem:[#allocation47_spill] sm:$0xff] }
 0x4b8   : > { %4193 = vmatmul.mubr.bf16.gmra.mrb[180].mxu0 %v8284_v29  ;;  %4446 = vmatmul.mubr.bf16.gmra.mrb[212].mxu1 %v7255_v18 }
 0x4b9   : > { %4202 = vmatprep.mubr.bf16.mxu0 %v8285_v5  ;;  %4455 = vmatprep.mubr.bf16.mxu1 %v7279_v39  ;;  %v8298_v39 = vld [vmem:[#allocation56_spill] sm:$0xff] }
 0x4ba   : > { %4324 = vmatpush1.bf16.msra.mxu0 %v7426_v56 }
 0x4bb   : > { %4325 = vmatprep.subr.bf16.mxu0 %v7430_v38 }
 0x4be   : > { %4326 = vmatpush1.bf16.msra.mxu0 %v7436_v32  ;;  %v8296_v32 = vld [vmem:[#allocation26_spill] sm:$0xff] }
 0x4bf   : > { %4327 = vmatprep.subr.bf16.mxu0 %v7439_v6  ;;  %v8289_v6 = vld [vmem:[#allocation50_spill] sm:$0xff]  ;;  %v8297_v43 = vsub.s32 2, %v8296_v32  ;;  %v8300_v42 = vsub.s32 3, %v8296_v32 }
 0x4c0   : > { %4203 = vmatmul.mubr.bf16.gmra.mrb[184].mxu0 %v8286_v7  ;;  %4456 = vmatmul.mubr.bf16.gmra.mrb[216].mxu1 %v7275_v10 }
 0x4c1   : > { %4212 = vmatprep.mubr.bf16.mxu0 %v8287_v46  ;;  %4465 = vmatprep.mubr.bf16.mxu1 %v7299_v22  ;;  %v7583_v22 = vrot.slane %v7576_v37, %v8295_v31  ;;  %v7598_v12 = vrot.slane %v7576_v37, %v8300_v42  ;;  %v8305_v31 = vld [vmem:[#allocation59_spill] sm:$0xff] }
 0x4c2   : > { %4328 = vmatpush1.bf16.msra.mxu0 %v7442_v4 }
 0x4c3   : > { %4329 = vmatprep.subr.bf16.mxu0 %v7446_v28 }
 0x4c6   : > { %4330 = vmatpush1.bf16.msra.mxu0 %v7452_v25  ;;  %v8291_v25 = vld [vmem:[#allocation52_spill] sm:$0xff] }
 0x4c7   : > { %4331 = vmatprep.subr.bf16.mxu0 %v7455_v61 }
 0x4c8   : > { %4213 = vmatmul.mubr.bf16.gmra.mrb[188].mxu0 %v8288_v47  ;;  %4466 = vmatmul.mubr.bf16.gmra.mrb[220].mxu1 %v7295_v15 }
 0x4c9   : > { %4222 = vmatprep.mubr.bf16.mxu0 %v8289_v6  ;;  %4475 = vmatprep.mubr.bf16.mxu1 %v7319_v30  ;;  %v8294_v30 = vld [vmem:[#allocation53_spill] sm:$0xff] }
 0x4ca   : > { %4332 = vmatpush1.bf16.msra.mxu0 %v7458_v21  ;;  %v8303_v21 = vld [vmem:[#allocation57_spill] sm:$0xff] }
 0x4cb   : > { %4333 = vmatprep.subr.bf16.mxu0 %v7462_v8  ;;  %v8304_v8 = vld [vmem:[#allocation60_spill] sm:$0xff] }
 0x4ce   : > { %4334 = vmatpush1.bf16.msra.mxu0 %v7468_v48 }
 0x4d0   : > { %4223 = vmatmul.mubr.bf16.gmra.mrb[192].mxu0 %v8290_v49  ;;  %4476 = vmatmul.mubr.bf16.gmra.mrb[224].mxu1 %v7315_v44 }
 0x4d1   : > { %4232 = vmatprep.mubr.bf16.mxu0 %v8291_v25  ;;  %4485 = vmatprep.mubr.bf16.mxu1 %v7339_v23  ;;  %v7588_v23 = vrot.slane %v7576_v37, %v8297_v43  ;;  %v8306_v43 = vld [vmem:[#allocation61_spill] sm:$0xff] }
 0x4d8   : > { %4233 = vmatmul.mubr.bf16.gmra.mrb[196].mxu0 %v8292_v35  ;;  %4486 = vmatmul.mubr.bf16.gmra.mrb[228].mxu1 %v7335_v62 }
 0x4d9   : > { %4242 = vmatprep.mubr.bf16.mxu0 %v8293_v36 }
 0x4e0   : > { %4243 = vmatmul.mubr.bf16.gmra.mrb[200].mxu0 %v8294_v30 }
 0x4e1   : > { %4252 = vmatprep.mubr.bf16.mxu0 %v8298_v39 }
 0x4e3   : > { %v3565_v33 = vpop.f32.mrb[96].mxu0  ;;  %v3951_v41 = vpop.f32.mrb[128].mxu1 }
 0x4e4   : > { %v5248_v51 = vadd.f32 %v3565_v33, %v7583_v22  ;;  %v5312_v50 = vadd.f32 %v3951_v41, %v7588_v23  ;;  %v3567_v16 = vpop.f32.mrb[97].mxu0  ;;  %v3953_v63 = vpop.f32.mrb[129].mxu1 }
 0x4e5   : > { %v5249_v18 = vadd.f32 %v3567_v16, %v7593_v11  ;;  %v5313_v10 = vadd.f32 %v3953_v63, %v7598_v12  ;;  %v3569_v15 = vpop.f32.mrb[98].mxu0  ;;  %v3955_v44 = vpop.f32.mrb[130].mxu1 }
 0x4e6   : > { %4496 = vst [vmem:[%s7604_s29] sm:$0xff] %v5248_v51  ;;  %4498 = vst [vmem:[%s7604_s29 + $0x10] sm:$0xff] %v5312_v50  ;;  %v5250_v61 = vadd.f32 %v3569_v15, %v7583_v22  ;;  %v5314_v62 = vadd.f32 %v3955_v44, %v7588_v23  ;;  %v3571_v19 = vpop.f32.mrb[99].mxu0  ;;  %v3957_v0 = vpop.f32.mrb[131].mxu1 }
 0x4e7   : > { %4497 = vst [vmem:[%s7604_s29 + $0x8] sm:$0xff] %v5249_v18  ;;  %4499 = vst [vmem:[%s7604_s29 + $0x18] sm:$0xff] %v5313_v10  ;;  %v5251_v60 = vadd.f32 %v3571_v19, %v7593_v11  ;;  %v5315_v26 = vadd.f32 %v3957_v0, %v7598_v12  ;;  %v8307_v0 = vld [vmem:[#allocation63_spill] sm:$0xff] }
 0x4e8   : > { %4502 = vst [vmem:[%s7604_s29 + $0x30] sm:$0xff] %v5250_v61  ;;  %4504 = vst [vmem:[%s7604_s29 + $0x40] sm:$0xff] %v5314_v62  ;;  %4253 = vmatmul.mubr.bf16.gmra.mrb[204].mxu0 %v8301_v1 }
 0x4e9   : > { %4503 = vst [vmem:[%s7604_s29 + $0x38] sm:$0xff] %v5251_v60  ;;  %4505 = vst [vmem:[%s7604_s29 + $0x48] sm:$0xff] %v5315_v26  ;;  %4262 = vmatprep.mubr.bf16.mxu0 %v8302_v52 }
 0x4eb   : > { %v3575_v53 = vpop.f32.mrb[100].mxu0  ;;  %v3961_v40 = vpop.f32.mrb[132].mxu1 }
 0x4ec   : > { %v5252_v58 = vadd.f32 %v3575_v53, %v7583_v22  ;;  %v5316_v3 = vadd.f32 %v3961_v40, %v7588_v23  ;;  %v3577_v54 = vpop.f32.mrb[101].mxu0  ;;  %v3963_v17 = vpop.f32.mrb[133].mxu1 }
 0x4ed   : > { %v5253_v9 = vadd.f32 %v3577_v54, %v7593_v11  ;;  %v5317_v59 = vadd.f32 %v3963_v17, %v7598_v12  ;;  %v3579_v13 = vpop.f32.mrb[102].mxu0  ;;  %v3965_v55 = vpop.f32.mrb[134].mxu1 }
 0x4ee   : > { %4508 = vst [vmem:[%s7604_s29 + $0x60] sm:$0xff] %v5252_v58  ;;  %4510 = vst [vmem:[%s7604_s29 + $0x70] sm:$0xff] %v5316_v3  ;;  %v5254_v14 = vadd.f32 %v3579_v13, %v7583_v22  ;;  %v5318_v34 = vadd.f32 %v3965_v55, %v7588_v23  ;;  %v3581_v56 = vpop.f32.mrb[103].mxu0  ;;  %v3967_v38 = vpop.f32.mrb[135].mxu1 }
 0x4ef   : > { %4509 = vst [vmem:[%s7604_s29 + $0x68] sm:$0xff] %v5253_v9  ;;  %4511 = vst [vmem:[%s7604_s29 + $0x78] sm:$0xff] %v5317_v59  ;;  %v5255_v4 = vadd.f32 %v3581_v56, %v7593_v11  ;;  %v5319_v28 = vadd.f32 %v3967_v38, %v7598_v12  ;;  %v8309_v56 = vld [vmem:[#allocation30_spill] sm:$0xff] }
 0x4f0   : > { %4514 = vst [vmem:[%s7604_s29 + $0x90] sm:$0xff] %v5254_v14  ;;  %4516 = vst [vmem:[%s7604_s29 + $0xa0] sm:$0xff] %v5318_v34  ;;  %4263 = vmatmul.mubr.bf16.gmra.mrb[208].mxu0 %v8303_v21  ;;  %v8308_v34 = vld [vmem:[#allocation62_spill] sm:$0xff] }
 0x4f1   : > { %4515 = vst [vmem:[%s7604_s29 + $0x98] sm:$0xff] %v5255_v4  ;;  %4517 = vst [vmem:[%s7604_s29 + $0xa8] sm:$0xff] %v5319_v28  ;;  %4272 = vmatprep.mubr.bf16.mxu0 %v8304_v8 }
 0x4f3   : > { %v3585_v2 = vpop.f32.mrb[104].mxu0  ;;  %v3971_v48 = vpop.f32.mrb[136].mxu1 }
 0x4f4   : > { %v5256_v24 = vadd.f32 %v3585_v2, %v7583_v22  ;;  %v5320_v57 = vadd.f32 %v3971_v48, %v7588_v23  ;;  %v3587_v27 = vpop.f32.mrb[105].mxu0  ;;  %v3973_v29 = vpop.f32.mrb[137].mxu1 }
 0x4f5   : > { %v5257_v5 = vadd.f32 %v3587_v27, %v7593_v11  ;;  %v5321_v7 = vadd.f32 %v3973_v29, %v7598_v12  ;;  %v3589_v46 = vpop.f32.mrb[106].mxu0  ;;  %v3975_v47 = vpop.f32.mrb[138].mxu1 }
 0x4f6   : > { %4520 = vst [vmem:[%s7604_s29 + $0xc0] sm:$0xff] %v5256_v24  ;;  %4522 = vst [vmem:[%s7604_s29 + $0xd0] sm:$0xff] %v5320_v57  ;;  %v5258_v6 = vadd.f32 %v3589_v46, %v7583_v22  ;;  %v5322_v49 = vadd.f32 %v3975_v47, %v7588_v23  ;;  %v3591_v25 = vpop.f32.mrb[107].mxu0  ;;  %v3977_v35 = vpop.f32.mrb[139].mxu1 }
 0x4f7   : > { %4521 = vst [vmem:[%s7604_s29 + $0xc8] sm:$0xff] %v5257_v5  ;;  %4523 = vst [vmem:[%s7604_s29 + $0xd8] sm:$0xff] %v5321_v7  ;;  %v5259_v36 = vadd.f32 %v3591_v25, %v7593_v11  ;;  %v5323_v30 = vadd.f32 %v3977_v35, %v7598_v12  ;;  %v8311_v25 = vld [vmem:[#allocation32_spill] sm:$0xff] }
 0x4f8   : > { %4526 = vst [vmem:[%s7604_s29 + $0xf0] sm:$0xff] %v5258_v6  ;;  %4528 = vst [vmem:[%s7604_s29 + $0x100] sm:$0xff] %v5322_v49  ;;  %4273 = vmatmul.mubr.bf16.gmra.mrb[212].mxu0 %v8305_v31  ;;  %v8310_v49 = vld [vmem:[#allocation29_spill] sm:$0xff] }
 0x4f9   : > { %4527 = vst [vmem:[%s7604_s29 + $0xf8] sm:$0xff] %v5259_v36  ;;  %4529 = vst [vmem:[%s7604_s29 + $0x108] sm:$0xff] %v5323_v30  ;;  %4282 = vmatprep.mubr.bf16.mxu0 %v8306_v43 }
 0x4fb   : > { %v3595_v39 = vpop.f32.mrb[108].mxu0  ;;  %v3981_v45 = vpop.f32.mrb[140].mxu1 }
 0x4fc   : > { %v5260_v42 = vadd.f32 %v3595_v39, %v7583_v22  ;;  %v5324_v33 = vadd.f32 %v3981_v45, %v7588_v23  ;;  %v3597_v41 = vpop.f32.mrb[109].mxu0  ;;  %v3983_v51 = vpop.f32.mrb[141].mxu1 }
 0x4fd   : > { %v5261_v50 = vadd.f32 %v3597_v41, %v7593_v11  ;;  %v5325_v16 = vadd.f32 %v3983_v51, %v7598_v12  ;;  %v3599_v63 = vpop.f32.mrb[110].mxu0  ;;  %v3985_v18 = vpop.f32.mrb[142].mxu1 }
 0x4fe   : > { %4532 = vst [vmem:[%s7604_s29 + $0x120] sm:$0xff] %v5260_v42  ;;  %4534 = vst [vmem:[%s7604_s29 + $0x130] sm:$0xff] %v5324_v33  ;;  %v5262_v10 = vadd.f32 %v3599_v63, %v7583_v22  ;;  %v5326_v15 = vadd.f32 %v3985_v18, %v7588_v23  ;;  %v3601_v44 = vpop.f32.mrb[111].mxu0  ;;  %v3987_v61 = vpop.f32.mrb[143].mxu1 }
 0x4ff   : > { %4533 = vst [vmem:[%s7604_s29 + $0x128] sm:$0xff] %v5261_v50  ;;  %4535 = vst [vmem:[%s7604_s29 + $0x138] sm:$0xff] %v5325_v16  ;;  %v5263_v62 = vadd.f32 %v3601_v44, %v7593_v11  ;;  %v5327_v19 = vadd.f32 %v3987_v61, %v7598_v12  ;;  %v8313_v44 = vld [vmem:[#allocation34_spill] sm:$0xff] }
 0x500   : > { %4538 = vst [vmem:[%s7604_s29 + $0x150] sm:$0xff] %v5262_v10  ;;  %4540 = vst [vmem:[%s7604_s29 + $0x160] sm:$0xff] %v5326_v15  ;;  %4283 = vmatmul.mubr.bf16.gmra.mrb[216].mxu0 %v7313_v20  ;;  %v8312_v15 = vld [vmem:[#allocation31_spill] sm:$0xff] }
 0x501   : > { %4539 = vst [vmem:[%s7604_s29 + $0x158] sm:$0xff] %v5263_v62  ;;  %4541 = vst [vmem:[%s7604_s29 + $0x168] sm:$0xff] %v5327_v19  ;;  %4292 = vmatprep.mubr.bf16.mxu0 %v8307_v0 }
 0x503   : > { %v3605_v60 = vpop.f32.mrb[112].mxu0  ;;  %v3991_v26 = vpop.f32.mrb[144].mxu1 }
 0x504   : > { %v5264_v1 = vadd.f32 %v3605_v60, %v7583_v22  ;;  %v5328_v52 = vadd.f32 %v3991_v26, %v7588_v23  ;;  %v3607_v53 = vpop.f32.mrb[113].mxu0  ;;  %v3993_v40 = vpop.f32.mrb[145].mxu1 }
 0x505   : > { %v5265_v58 = vadd.f32 %v3607_v53, %v7593_v11  ;;  %v5329_v20 = vadd.f32 %v3993_v40, %v7598_v12  ;;  %v3609_v3 = vpop.f32.mrb[114].mxu0  ;;  %v3995_v54 = vpop.f32.mrb[146].mxu1 }
 0x506   : > { %4544 = vst [vmem:[%s7604_s29 + $0x180] sm:$0xff] %v5264_v1  ;;  %4546 = vst [vmem:[%s7604_s29 + $0x190] sm:$0xff] %v5328_v52  ;;  %v5266_v17 = vadd.f32 %v3609_v3, %v7583_v22  ;;  %v5330_v9 = vadd.f32 %v3995_v54, %v7588_v23  ;;  %v3611_v59 = vpop.f32.mrb[115].mxu0  ;;  %v3997_v13 = vpop.f32.mrb[147].mxu1 }
 0x507   : > { %4545 = vst [vmem:[%s7604_s29 + $0x188] sm:$0xff] %v5265_v58  ;;  %4547 = vst [vmem:[%s7604_s29 + $0x198] sm:$0xff] %v5329_v20  ;;  %v5267_v55 = vadd.f32 %v3611_v59, %v7593_v11  ;;  %v5331_v14 = vadd.f32 %v3997_v13, %v7598_v12  ;;  %v8314_v59 = vld [vmem:[#allocation33_spill] sm:$0xff]  ;;  %v8315_v13 = vld [vmem:[#allocation36_spill] sm:$0xff] }
 0x508   : > { %4550 = vst [vmem:[%s7604_s29 + $0x1b0] sm:$0xff] %v5266_v17  ;;  %4552 = vst [vmem:[%s7604_s29 + $0x1c0] sm:$0xff] %v5330_v9  ;;  %4293 = vmatmul.mubr.bf16.gmra.mrb[220].mxu0 %v8308_v34 }
 0x509   : > { %4551 = vst [vmem:[%s7604_s29 + $0x1b8] sm:$0xff] %v5267_v55  ;;  %4553 = vst [vmem:[%s7604_s29 + $0x1c8] sm:$0xff] %v5331_v14  ;;  %4335 = vmatprep.mubr.bf16.mxu0 %v8309_v56 }
 0x50b   : > { %v3615_v38 = vpop.f32.mrb[116].mxu0  ;;  %v4001_v4 = vpop.f32.mrb[148].mxu1 }
 0x50c   : > { %v5268_v28 = vadd.f32 %v3615_v38, %v7583_v22  ;;  %v5332_v21 = vadd.f32 %v4001_v4, %v7588_v23  ;;  %v3617_v8 = vpop.f32.mrb[117].mxu0  ;;  %v4003_v2 = vpop.f32.mrb[149].mxu1 }
 0x50d   : > { %v5269_v48 = vadd.f32 %v3617_v8, %v7593_v11  ;;  %v5333_v24 = vadd.f32 %v4003_v2, %v7598_v12  ;;  %v3619_v57 = vpop.f32.mrb[118].mxu0  ;;  %v4005_v27 = vpop.f32.mrb[150].mxu1 }
 0x50e   : > { %4556 = vst [vmem:[%s7604_s29 + $0x1e0] sm:$0xff] %v5268_v28  ;;  %4558 = vst [vmem:[%s7604_s29 + $0x1f0] sm:$0xff] %v5332_v21  ;;  %v5270_v29 = vadd.f32 %v3619_v57, %v7583_v22  ;;  %v5334_v5 = vadd.f32 %v4005_v27, %v7588_v23  ;;  %v3621_v7 = vpop.f32.mrb[119].mxu0  ;;  %v4007_v46 = vpop.f32.mrb[151].mxu1 }
 0x50f   : > { %4557 = vst [vmem:[%s7604_s29 + $0x1e8] sm:$0xff] %v5269_v48  ;;  %4559 = vst [vmem:[%s7604_s29 + $0x1f8] sm:$0xff] %v5333_v24  ;;  %v5271_v47 = vadd.f32 %v3621_v7, %v7593_v11  ;;  %v5335_v6 = vadd.f32 %v4007_v46, %v7598_v12  ;;  %v8316_v7 = vld [vmem:[#allocation35_spill] sm:$0xff]  ;;  %v8317_v46 = vld [vmem:[#allocation40_spill] sm:$0xff] }
 0x510   : > { %4562 = vst [vmem:[%s7604_s29 + $0x210] sm:$0xff] %v5270_v29  ;;  %4564 = vst [vmem:[%s7604_s29 + $0x220] sm:$0xff] %v5334_v5  ;;  %4336 = vmatmul.mubr.bf16.vlgmr.msra.gmra.mrb[160].mxu0 %v8310_v49 }
 0x511   : > { %4563 = vst [vmem:[%s7604_s29 + $0x218] sm:$0xff] %v5271_v47  ;;  %4565 = vst [vmem:[%s7604_s29 + $0x228] sm:$0xff] %v5335_v6  ;;  %4345 = vmatprep.mubr.bf16.mxu0 %v8311_v25 }
 0x513   : > { %v3625_v35 = vpop.f32.mrb[120].mxu0  ;;  %v4011_v36 = vpop.f32.mrb[152].mxu1 }
 0x514   : > { %v5272_v30 = vadd.f32 %v3625_v35, %v7583_v22  ;;  %v5336_v31 = vadd.f32 %v4011_v36, %v7588_v23  ;;  %v3627_v43 = vpop.f32.mrb[121].mxu0  ;;  %v4013_v39 = vpop.f32.mrb[153].mxu1 }
 0x515   : > { %v5273_v45 = vadd.f32 %v3627_v43, %v7593_v11  ;;  %v5337_v42 = vadd.f32 %v4013_v39, %v7598_v12  ;;  %v3629_v33 = vpop.f32.mrb[122].mxu0  ;;  %v4015_v41 = vpop.f32.mrb[154].mxu1 }
 0x516   : > { %4568 = vst [vmem:[%s7604_s29 + $0x240] sm:$0xff] %v5272_v30  ;;  %4570 = vst [vmem:[%s7604_s29 + $0x250] sm:$0xff] %v5336_v31  ;;  %v5274_v51 = vadd.f32 %v3629_v33, %v7583_v22  ;;  %v5338_v50 = vadd.f32 %v4015_v41, %v7588_v23  ;;  %v3631_v16 = vpop.f32.mrb[123].mxu0  ;;  %v4017_v63 = vpop.f32.mrb[155].mxu1 }
 0x517   : > { %4569 = vst [vmem:[%s7604_s29 + $0x248] sm:$0xff] %v5273_v45  ;;  %4571 = vst [vmem:[%s7604_s29 + $0x258] sm:$0xff] %v5337_v42  ;;  %v5275_v18 = vadd.f32 %v3631_v16, %v7593_v11  ;;  %v5339_v10 = vadd.f32 %v4017_v63, %v7598_v12  ;;  %v8318_v16 = vld [vmem:[#allocation38_spill] sm:$0xff]  ;;  %v8319_v63 = vld [vmem:[#allocation44_spill] sm:$0xff] }
 0x518   : > { %4574 = vst [vmem:[%s7604_s29 + $0x270] sm:$0xff] %v5274_v51  ;;  %4576 = vst [vmem:[%s7604_s29 + $0x280] sm:$0xff] %v5338_v50  ;;  %4346 = vmatmul.mubr.bf16.gmra.mrb[164].mxu0 %v8312_v15 }
 0x519   : > { %4575 = vst [vmem:[%s7604_s29 + $0x278] sm:$0xff] %v5275_v18  ;;  %4577 = vst [vmem:[%s7604_s29 + $0x288] sm:$0xff] %v5339_v10  ;;  %4355 = vmatprep.mubr.bf16.mxu0 %v8313_v44 }
 0x51b   : > { %v3635_v61 = vpop.f32.mrb[124].mxu0  ;;  %v4021_v62 = vpop.f32.mrb[156].mxu1 }
 0x51c   : > { %v5276_v19 = vadd.f32 %v3635_v61, %v7583_v22  ;;  %v5340_v0 = vadd.f32 %v4021_v62, %v7588_v23  ;;  %v3637_v60 = vpop.f32.mrb[125].mxu0  ;;  %v4023_v26 = vpop.f32.mrb[157].mxu1 }
 0x51d   : > { %v5277_v1 = vadd.f32 %v3637_v60, %v7593_v11  ;;  %v5341_v52 = vadd.f32 %v4023_v26, %v7598_v12  ;;  %v3639_v53 = vpop.f32.mrb[126].mxu0  ;;  %v4025_v40 = vpop.f32.mrb[158].mxu1 }
 0x51e   : > { %4580 = vst [vmem:[%s7604_s29 + $0x2a0] sm:$0xff] %v5276_v19  ;;  %4582 = vst [vmem:[%s7604_s29 + $0x2b0] sm:$0xff] %v5340_v0  ;;  %v5278_v58 = vadd.f32 %v3639_v53, %v7583_v22  ;;  %v5342_v20 = vadd.f32 %v4025_v40, %v7588_v23  ;;  %v3641_v3 = vpop.f32.mrb[127].mxu0  ;;  %v4027_v54 = vpop.f32.mrb[159].mxu1 }
 0x51f   : > { %4581 = vst [vmem:[%s7604_s29 + $0x2a8] sm:$0xff] %v5277_v1  ;;  %4583 = vst [vmem:[%s7604_s29 + $0x2b8] sm:$0xff] %v5341_v52  ;;  %v5279_v17 = vadd.f32 %v3641_v3, %v7593_v11  ;;  %v5343_v9 = vadd.f32 %v4027_v54, %v7598_v12  ;;  %v8320_v3 = vld [vmem:[#allocation42_spill] sm:$0xff] }
 0x520   : > { %4586 = vst [vmem:[%s7604_s29 + $0x2d0] sm:$0xff] %v5278_v58  ;;  %4588 = vst [vmem:[%s7604_s29 + $0x2e0] sm:$0xff] %v5342_v20  ;;  %4356 = vmatmul.mubr.bf16.gmra.mrb[168].mxu0 %v8314_v59 }
 0x521   : > { %4587 = vst [vmem:[%s7604_s29 + $0x2d8] sm:$0xff] %v5279_v17  ;;  %4589 = vst [vmem:[%s7604_s29 + $0x2e8] sm:$0xff] %v5343_v9  ;;  %4365 = vmatprep.mubr.bf16.mxu0 %v8315_v13 }
 0x523   : > { %v3645_v55 = vpop.f32.mrb[128].mxu0  ;;  %v4031_v14 = vpop.f32.mrb[160].mxu1 }
 0x524   : > { %v5280_v34 = vadd.f32 %v3645_v55, %v7583_v22  ;;  %v5344_v56 = vadd.f32 %v4031_v14, %v7588_v23  ;;  %v3647_v38 = vpop.f32.mrb[129].mxu0  ;;  %v4033_v4 = vpop.f32.mrb[161].mxu1 }
 0x525   : > { %v5281_v28 = vadd.f32 %v3647_v38, %v7593_v11  ;;  %v5345_v21 = vadd.f32 %v4033_v4, %v7598_v12  ;;  %v3649_v8 = vpop.f32.mrb[130].mxu0  ;;  %v4035_v2 = vpop.f32.mrb[162].mxu1 }
 0x526   : > { %4592 = vst [vmem:[%s7604_s29 + $0x300] sm:$0xff] %v5280_v34  ;;  %4594 = vst [vmem:[%s7604_s29 + $0x310] sm:$0xff] %v5344_v56  ;;  %v5282_v48 = vadd.f32 %v3649_v8, %v7583_v22  ;;  %v5346_v24 = vadd.f32 %v4035_v2, %v7588_v23  ;;  %v3651_v57 = vpop.f32.mrb[131].mxu0  ;;  %v4037_v27 = vpop.f32.mrb[163].mxu1 }
 0x527   : > { %4593 = vst [vmem:[%s7604_s29 + $0x308] sm:$0xff] %v5281_v28  ;;  %4595 = vst [vmem:[%s7604_s29 + $0x318] sm:$0xff] %v5345_v21  ;;  %v5283_v29 = vadd.f32 %v3651_v57, %v7593_v11  ;;  %v5347_v5 = vadd.f32 %v4037_v27, %v7598_v12 }
 0x528   : > { %4598 = vst [vmem:[%s7604_s29 + $0x330] sm:$0xff] %v5282_v48  ;;  %4600 = vst [vmem:[%s7604_s29 + $0x340] sm:$0xff] %v5346_v24  ;;  %4366 = vmatmul.mubr.bf16.gmra.mrb[172].mxu0 %v8316_v7 }
 0x529   : > { %4599 = vst [vmem:[%s7604_s29 + $0x338] sm:$0xff] %v5283_v29  ;;  %4601 = vst [vmem:[%s7604_s29 + $0x348] sm:$0xff] %v5347_v5  ;;  %4375 = vmatprep.mubr.bf16.mxu0 %v8317_v46 }
 0x52b   : > { %v3655_v47 = vpop.f32.mrb[132].mxu0  ;;  %v4041_v6 = vpop.f32.mrb[164].mxu1 }
 0x52c   : > { %v5284_v49 = vadd.f32 %v3655_v47, %v7583_v22  ;;  %v5348_v25 = vadd.f32 %v4041_v6, %v7588_v23  ;;  %v3657_v35 = vpop.f32.mrb[133].mxu0  ;;  %v4043_v36 = vpop.f32.mrb[165].mxu1 }
 0x52d   : > { %v5285_v30 = vadd.f32 %v3657_v35, %v7593_v11  ;;  %v5349_v31 = vadd.f32 %v4043_v36, %v7598_v12  ;;  %v3659_v43 = vpop.f32.mrb[134].mxu0  ;;  %v4045_v39 = vpop.f32.mrb[166].mxu1 }
 0x52e   : > { %4604 = vst [vmem:[%s7604_s29 + $0x360] sm:$0xff] %v5284_v49  ;;  %4606 = vst [vmem:[%s7604_s29 + $0x370] sm:$0xff] %v5348_v25  ;;  %v5286_v45 = vadd.f32 %v3659_v43, %v7583_v22  ;;  %v5350_v42 = vadd.f32 %v4045_v39, %v7588_v23  ;;  %v3661_v33 = vpop.f32.mrb[135].mxu0  ;;  %v4047_v41 = vpop.f32.mrb[167].mxu1 }
 0x52f   : > { %4605 = vst [vmem:[%s7604_s29 + $0x368] sm:$0xff] %v5285_v30  ;;  %4607 = vst [vmem:[%s7604_s29 + $0x378] sm:$0xff] %v5349_v31  ;;  %v5287_v51 = vadd.f32 %v3661_v33, %v7593_v11  ;;  %v5351_v50 = vadd.f32 %v4047_v41, %v7598_v12 }
 0x530   : > { %4610 = vst [vmem:[%s7604_s29 + $0x390] sm:$0xff] %v5286_v45  ;;  %4612 = vst [vmem:[%s7604_s29 + $0x3a0] sm:$0xff] %v5350_v42  ;;  %4376 = vmatmul.mubr.bf16.gmra.mrb[176].mxu0 %v8318_v16 }
 0x531   : > { %4611 = vst [vmem:[%s7604_s29 + $0x398] sm:$0xff] %v5287_v51  ;;  %4613 = vst [vmem:[%s7604_s29 + $0x3a8] sm:$0xff] %v5351_v50  ;;  %4385 = vmatprep.mubr.bf16.mxu0 %v8319_v63 }
 0x533   : > { %v3665_v18 = vpop.f32.mrb[136].mxu0  ;;  %v4051_v10 = vpop.f32.mrb[168].mxu1 }
 0x534   : > { %v5288_v15 = vadd.f32 %v3665_v18, %v7583_v22  ;;  %v5352_v44 = vadd.f32 %v4051_v10, %v7588_v23  ;;  %v3667_v61 = vpop.f32.mrb[137].mxu0  ;;  %v4053_v62 = vpop.f32.mrb[169].mxu1 }
 0x535   : > { %v5289_v19 = vadd.f32 %v3667_v61, %v7593_v11  ;;  %v5353_v0 = vadd.f32 %v4053_v62, %v7598_v12  ;;  %v3669_v60 = vpop.f32.mrb[138].mxu0  ;;  %v4055_v26 = vpop.f32.mrb[170].mxu1 }
 0x536   : > { %4616 = vst [vmem:[%s7604_s29 + $0x3c0] sm:$0xff] %v5288_v15  ;;  %4618 = vst [vmem:[%s7604_s29 + $0x3d0] sm:$0xff] %v5352_v44  ;;  %v5290_v1 = vadd.f32 %v3669_v60, %v7583_v22  ;;  %v5354_v52 = vadd.f32 %v4055_v26, %v7588_v23  ;;  %v3671_v53 = vpop.f32.mrb[139].mxu0  ;;  %v4057_v40 = vpop.f32.mrb[171].mxu1 }
 0x537   : > { %4617 = vst [vmem:[%s7604_s29 + $0x3c8] sm:$0xff] %v5289_v19  ;;  %4619 = vst [vmem:[%s7604_s29 + $0x3d8] sm:$0xff] %v5353_v0  ;;  %v5291_v58 = vadd.f32 %v3671_v53, %v7593_v11  ;;  %v5355_v20 = vadd.f32 %v4057_v40, %v7598_v12 }
 0x538   : > { %4622 = vst [vmem:[%s7604_s29 + $0x3f0] sm:$0xff] %v5290_v1  ;;  %4624 = vst [vmem:[%s7604_s29 + $0x400] sm:$0xff] %v5354_v52  ;;  %4386 = vmatmul.mubr.bf16.gmra.mrb[180].mxu0 %v8320_v3 }
 0x539   : > { %4623 = vst [vmem:[%s7604_s29 + $0x3f8] sm:$0xff] %v5291_v58  ;;  %4625 = vst [vmem:[%s7604_s29 + $0x408] sm:$0xff] %v5355_v20 }
 0x53b   : > { %v3675_v54 = vpop.f32.mrb[140].mxu0  ;;  %v4061_v17 = vpop.f32.mrb[172].mxu1 }
 0x53c   : > { %v5292_v9 = vadd.f32 %v3675_v54, %v7583_v22  ;;  %v5356_v59 = vadd.f32 %v4061_v17, %v7588_v23  ;;  %v3677_v13 = vpop.f32.mrb[141].mxu0  ;;  %v4063_v55 = vpop.f32.mrb[173].mxu1 }
 0x53d   : > { %v5293_v14 = vadd.f32 %v3677_v13, %v7593_v11  ;;  %v5357_v34 = vadd.f32 %v4063_v55, %v7598_v12  ;;  %v3679_v56 = vpop.f32.mrb[142].mxu0  ;;  %v4065_v38 = vpop.f32.mrb[174].mxu1 }
 0x53e   : > { %4628 = vst [vmem:[%s7604_s29 + $0x420] sm:$0xff] %v5292_v9  ;;  %4630 = vst [vmem:[%s7604_s29 + $0x430] sm:$0xff] %v5356_v59  ;;  %v5294_v4 = vadd.f32 %v3679_v56, %v7583_v22  ;;  %v5358_v28 = vadd.f32 %v4065_v38, %v7588_v23  ;;  %v3681_v21 = vpop.f32.mrb[143].mxu0  ;;  %v4067_v8 = vpop.f32.mrb[175].mxu1 }
 0x53f   : > { %4629 = vst [vmem:[%s7604_s29 + $0x428] sm:$0xff] %v5293_v14  ;;  %4631 = vst [vmem:[%s7604_s29 + $0x438] sm:$0xff] %v5357_v34  ;;  %v5295_v2 = vadd.f32 %v3681_v21, %v7593_v11  ;;  %v5359_v48 = vadd.f32 %v4067_v8, %v7598_v12 }
 0x540   : > { %4634 = vst [vmem:[%s7604_s29 + $0x450] sm:$0xff] %v5294_v4  ;;  %4636 = vst [vmem:[%s7604_s29 + $0x460] sm:$0xff] %v5358_v28 }
 0x541   : > { %4635 = vst [vmem:[%s7604_s29 + $0x458] sm:$0xff] %v5295_v2  ;;  %4637 = vst [vmem:[%s7604_s29 + $0x468] sm:$0xff] %v5359_v48 }
 0x543   : > { %v3685_v24 = vpop.f32.mrb[144].mxu0  ;;  %v4071_v57 = vpop.f32.mrb[176].mxu1 }
 0x544   : > { %v5296_v27 = vadd.f32 %v3685_v24, %v7583_v22  ;;  %v5360_v29 = vadd.f32 %v4071_v57, %v7588_v23  ;;  %v3687_v5 = vpop.f32.mrb[145].mxu0  ;;  %v4073_v7 = vpop.f32.mrb[177].mxu1 }
 0x545   : > { %v5297_v46 = vadd.f32 %v3687_v5, %v7593_v11  ;;  %v5361_v47 = vadd.f32 %v4073_v7, %v7598_v12  ;;  %v3689_v6 = vpop.f32.mrb[146].mxu0  ;;  %v4075_v49 = vpop.f32.mrb[178].mxu1 }
 0x546   : > { %4640 = vst [vmem:[%s7604_s29 + $0x480] sm:$0xff] %v5296_v27  ;;  %4642 = vst [vmem:[%s7604_s29 + $0x490] sm:$0xff] %v5360_v29  ;;  %v5298_v25 = vadd.f32 %v3689_v6, %v7583_v22  ;;  %v5362_v35 = vadd.f32 %v4075_v49, %v7588_v23  ;;  %v3691_v36 = vpop.f32.mrb[147].mxu0  ;;  %v4077_v30 = vpop.f32.mrb[179].mxu1 }
 0x547   : > { %4641 = vst [vmem:[%s7604_s29 + $0x488] sm:$0xff] %v5297_v46  ;;  %4643 = vst [vmem:[%s7604_s29 + $0x498] sm:$0xff] %v5361_v47  ;;  %v5299_v31 = vadd.f32 %v3691_v36, %v7593_v11  ;;  %v5363_v43 = vadd.f32 %v4077_v30, %v7598_v12 }
 0x548   : > { %4646 = vst [vmem:[%s7604_s29 + $0x4b0] sm:$0xff] %v5298_v25  ;;  %4648 = vst [vmem:[%s7604_s29 + $0x4c0] sm:$0xff] %v5362_v35 }
 0x549   : > { %4647 = vst [vmem:[%s7604_s29 + $0x4b8] sm:$0xff] %v5299_v31  ;;  %4649 = vst [vmem:[%s7604_s29 + $0x4c8] sm:$0xff] %v5363_v43 }
 0x54b   : > { %v3695_v39 = vpop.f32.mrb[148].mxu0  ;;  %v4081_v45 = vpop.f32.mrb[180].mxu1 }
 0x54c   : > { %v5300_v42 = vadd.f32 %v3695_v39, %v7583_v22  ;;  %v5364_v33 = vadd.f32 %v4081_v45, %v7588_v23  ;;  %v3697_v41 = vpop.f32.mrb[149].mxu0  ;;  %v4083_v51 = vpop.f32.mrb[181].mxu1 }
 0x54d   : > { %v5301_v50 = vadd.f32 %v3697_v41, %v7593_v11  ;;  %v5365_v16 = vadd.f32 %v4083_v51, %v7598_v12  ;;  %v3699_v63 = vpop.f32.mrb[150].mxu0  ;;  %v4085_v18 = vpop.f32.mrb[182].mxu1 }
 0x54e   : > { %4652 = vst [vmem:[%s7604_s29 + $0x4e0] sm:$0xff] %v5300_v42  ;;  %4654 = vst [vmem:[%s7604_s29 + $0x4f0] sm:$0xff] %v5364_v33  ;;  %v5302_v10 = vadd.f32 %v3699_v63, %v7583_v22  ;;  %v5366_v15 = vadd.f32 %v4085_v18, %v7588_v23  ;;  %v3701_v44 = vpop.f32.mrb[151].mxu0  ;;  %v4087_v61 = vpop.f32.mrb[183].mxu1  ;;  %v2370_v18 = vsub.s32 5, %v8296_v32 }
 0x54f   : > { %4653 = vst [vmem:[%s7604_s29 + $0x4e8] sm:$0xff] %v5301_v50  ;;  %4655 = vst [vmem:[%s7604_s29 + $0x4f8] sm:$0xff] %v5365_v16  ;;  %v5303_v62 = vadd.f32 %v3701_v44, %v7593_v11  ;;  %v5367_v19 = vadd.f32 %v4087_v61, %v7598_v12  ;;  %v2366_v16 = vsub.s32 4, %v8296_v32 }
 0x550   : > { %4658 = vst [vmem:[%s7604_s29 + $0x510] sm:$0xff] %v5302_v10  ;;  %4660 = vst [vmem:[%s7604_s29 + $0x520] sm:$0xff] %v5366_v15  ;;  %v7917_v61 = vrot.slane %v7576_v37, %v2370_v18 }
 0x551   : > { %4659 = vst [vmem:[%s7604_s29 + $0x518] sm:$0xff] %v5303_v62  ;;  %4661 = vst [vmem:[%s7604_s29 + $0x528] sm:$0xff] %v5367_v19  ;;  %v7914_v44 = vrot.slane %v7576_v37, %v2366_v16 }
 0x553   : > { %v3705_v0 = vpop.f32.mrb[152].mxu0  ;;  %v4091_v60 = vpop.f32.mrb[184].mxu1 }
 0x554   : > { %v5304_v26 = vadd.f32 %v3705_v0, %v7583_v22  ;;  %v5368_v1 = vadd.f32 %v4091_v60, %v7588_v23  ;;  %v3707_v52 = vpop.f32.mrb[153].mxu0  ;;  %v4093_v53 = vpop.f32.mrb[185].mxu1 }
 0x555   : > { %v5305_v40 = vadd.f32 %v3707_v52, %v7593_v11  ;;  %v5369_v58 = vadd.f32 %v4093_v53, %v7598_v12  ;;  %v3709_v20 = vpop.f32.mrb[154].mxu0  ;;  %v4095_v3 = vpop.f32.mrb[186].mxu1 }
 0x556   : > { %4664 = vst [vmem:[%s7604_s29 + $0x540] sm:$0xff] %v5304_v26  ;;  %4666 = vst [vmem:[%s7604_s29 + $0x550] sm:$0xff] %v5368_v1  ;;  %v5306_v54 = vadd.f32 %v3709_v20, %v7583_v22  ;;  %v5370_v17 = vadd.f32 %v4095_v3, %v7588_v23  ;;  %v3711_v9 = vpop.f32.mrb[155].mxu0  ;;  %v4097_v59 = vpop.f32.mrb[187].mxu1 }
 0x557   : > { %4665 = vst [vmem:[%s7604_s29 + $0x548] sm:$0xff] %v5305_v40  ;;  %4667 = vst [vmem:[%s7604_s29 + $0x558] sm:$0xff] %v5369_v58  ;;  %v5307_v13 = vadd.f32 %v3711_v9, %v7593_v11  ;;  %v5371_v55 = vadd.f32 %v4097_v59, %v7598_v12 }
 0x558   : > { %4670 = vst [vmem:[%s7604_s29 + $0x570] sm:$0xff] %v5306_v54  ;;  %4672 = vst [vmem:[%s7604_s29 + $0x580] sm:$0xff] %v5370_v17 }
 0x559   : > { %4671 = vst [vmem:[%s7604_s29 + $0x578] sm:$0xff] %v5307_v13  ;;  %4673 = vst [vmem:[%s7604_s29 + $0x588] sm:$0xff] %v5371_v55 }
 0x55b   : > { %v3715_v14 = vpop.f32.mrb[156].mxu0  ;;  %v4101_v34 = vpop.f32.mrb[188].mxu1 }
 0x55c   : > { %v5308_v56 = vadd.f32 %v3715_v14, %v7583_v22  ;;  %v5372_v38 = vadd.f32 %v4101_v34, %v7588_v23  ;;  %v3717_v4 = vpop.f32.mrb[157].mxu0  ;;  %v4103_v28 = vpop.f32.mrb[189].mxu1 }
 0x55d   : > { %v5309_v21 = vadd.f32 %v3717_v4, %v7593_v11  ;;  %v5373_v8 = vadd.f32 %v4103_v28, %v7598_v12  ;;  %v3719_v2 = vpop.f32.mrb[158].mxu0  ;;  %v4105_v48 = vpop.f32.mrb[190].mxu1 }
 0x55e   : > { %4676 = vst [vmem:[%s7604_s29 + $0x5a0] sm:$0xff] %v5308_v56  ;;  %4678 = vst [vmem:[%s7604_s29 + $0x5b0] sm:$0xff] %v5372_v38  ;;  %v5310_v24 = vadd.f32 %v3719_v2, %v7583_v22  ;;  %v5374_v57 = vadd.f32 %v4105_v48, %v7588_v23  ;;  %v3721_v27 = vpop.f32.mrb[159].mxu0  ;;  %v4107_v29 = vpop.f32.mrb[191].mxu1 }
 0x55f   : > { %4677 = vst [vmem:[%s7604_s29 + $0x5a8] sm:$0xff] %v5309_v21  ;;  %4679 = vst [vmem:[%s7604_s29 + $0x5b8] sm:$0xff] %v5373_v8  ;;  %v5311_v5 = vadd.f32 %v3721_v27, %v7593_v11  ;;  %v5375_v7 = vadd.f32 %v4107_v29, %v7598_v12 }
 0x560   : > { %4682 = vst [vmem:[%s7604_s29 + $0x5d0] sm:$0xff] %v5310_v24  ;;  %4684 = vst [vmem:[%s7604_s29 + $0x5e0] sm:$0xff] %v5374_v57 }
 0x561   : > { %4683 = vst [vmem:[%s7604_s29 + $0x5d8] sm:$0xff] %v5311_v5  ;;  %4685 = vst [vmem:[%s7604_s29 + $0x5e8] sm:$0xff] %v5375_v7 }
 0x563   : > { %v4397_v46 = vpop.f32.mrb[192].mxu1 }
 0x564   : > { %v4399_v47 = vpop.f32.mrb[193].mxu1 }
 0x565   : > { %v4401_v6 = vpop.f32.mrb[194].mxu1 }
 0x566   : > { %v4403_v49 = vpop.f32.mrb[195].mxu1 }
 0x56b   : > { %v4407_v25 = vpop.f32.mrb[196].mxu1 }
 0x56c   : > { %v4409_v22 = vpop.f32.mrb[197].mxu1 }
 0x56d   : > { %v4411_v35 = vpop.f32.mrb[198].mxu1 }
 0x56e   : > { %v4413_v23 = vpop.f32.mrb[199].mxu1 }
 0x573   : > { %v7879_v36 = vpop.f32.mrb[200].mxu1 }
 0x574   : > { %v7881_v30 = vpop.f32.mrb[201].mxu1 }
 0x575   : > { %v7883_v31 = vpop.f32.mrb[202].mxu1 }
 0x576   : > { %v7885_v11 = vpop.f32.mrb[203].mxu1 }
 0x57b   : > { %v7887_v12 = vpop.f32.mrb[204].mxu1 }
 0x57c   : > { %v7889_v43 = vpop.f32.mrb[205].mxu1 }
 0x57d   : > { %v7891_v39 = vpop.f32.mrb[206].mxu1 }
 0x57e   : > { %v7893_v45 = vpop.f32.mrb[207].mxu1 }
 0x583   : > { %v7895_v42 = vpop.f32.mrb[208].mxu1 }
 0x584   : > { %v7897_v33 = vpop.f32.mrb[209].mxu1 }
 0x585   : > { %v7899_v41 = vpop.f32.mrb[210].mxu1 }
 0x586   : > { %v7901_v51 = vpop.f32.mrb[211].mxu1 }
 0x58b   : > { %v7903_v50 = vpop.f32.mrb[212].mxu1 }
 0x58c   : > { %v7906_v63 = vpop.f32.mrb[213].mxu1 }
 0x58d   : > { %v7909_v10 = vpop.f32.mrb[214].mxu1 }
 0x58e   : > { %v7911_v15 = vpop.f32.mrb[215].mxu1 }
 0x593   : > { %v4204_v62 = vpop.f32.mrb[184].mxu0  ;;  %v7919_v19 = vpop.f32.mrb[216].mxu1 }
 0x594   : > { %v4205_v0 = vadd.f32 %v4204_v62, %v7914_v44  ;;  %v4206_v60 = vpop.f32.mrb[185].mxu0  ;;  %v7922_v32 = vpop.f32.mrb[217].mxu1 }
 0x595   : > { %v4207_v26 = vadd.f32 %v4206_v60, %v7917_v61  ;;  %v4208_v1 = vpop.f32.mrb[186].mxu0  ;;  %v7925_v52 = vpop.f32.mrb[218].mxu1 }
 0x596   : > { %v4398_v53 = vadd.f32 %v4397_v46, %v4205_v0  ;;  %v4209_v37 = vadd.f32 %v4208_v1, %v7914_v44  ;;  %v4210_v40 = vpop.f32.mrb[187].mxu0  ;;  %v7928_v58 = vpop.f32.mrb[219].mxu1 }
 0x597   : > { %v4400_v20 = vadd.f32 %v4399_v47, %v4207_v26  ;;  %v4211_v3 = vadd.f32 %v4210_v40, %v7917_v61 }
 0x598   : > { %4572 = vst [vmem:[%s7604_s29 + $0x260] sm:$0xff] %v4398_v53  ;;  %v4402_v54 = vadd.f32 %v4401_v6, %v4209_v37 }
 0x599   : > { %4573 = vst [vmem:[%s7604_s29 + $0x268] sm:$0xff] %v4400_v20  ;;  %v4404_v17 = vadd.f32 %v4403_v49, %v4211_v3 }
 0x59a   : > { %4578 = vst [vmem:[%s7604_s29 + $0x290] sm:$0xff] %v4402_v54 }
 0x59b   : > { %4579 = vst [vmem:[%s7604_s29 + $0x298] sm:$0xff] %v4404_v17  ;;  %v4214_v9 = vpop.f32.mrb[188].mxu0  ;;  %v7935_v59 = vpop.f32.mrb[220].mxu1 }
 0x59c   : > { %v4215_v13 = vadd.f32 %v4214_v9, %v7914_v44  ;;  %v4216_v55 = vpop.f32.mrb[189].mxu0  ;;  %v7938_v14 = vpop.f32.mrb[221].mxu1 }
 0x59d   : > { %v4217_v34 = vadd.f32 %v4216_v55, %v7917_v61  ;;  %v4218_v56 = vpop.f32.mrb[190].mxu0  ;;  %v7941_v38 = vpop.f32.mrb[222].mxu1 }
 0x59e   : > { %v4408_v4 = vadd.f32 %v4407_v25, %v4215_v13  ;;  %v4219_v28 = vadd.f32 %v4218_v56, %v7914_v44  ;;  %v4220_v21 = vpop.f32.mrb[191].mxu0  ;;  %v7944_v8 = vpop.f32.mrb[223].mxu1 }
 0x59f   : > { %v4410_v2 = vadd.f32 %v4409_v22, %v4217_v34  ;;  %v4221_v48 = vadd.f32 %v4220_v21, %v7917_v61 }
 0x5a0   : > { %4584 = vst [vmem:[%s7604_s29 + $0x2c0] sm:$0xff] %v4408_v4  ;;  %v4412_v24 = vadd.f32 %v4411_v35, %v4219_v28 }
 0x5a1   : > { %4585 = vst [vmem:[%s7604_s29 + $0x2c8] sm:$0xff] %v4410_v2  ;;  %v4414_v57 = vadd.f32 %v4413_v23, %v4221_v48 }
 0x5a2   : > { %4590 = vst [vmem:[%s7604_s29 + $0x2f0] sm:$0xff] %v4412_v24 }
 0x5a3   : > { %4591 = vst [vmem:[%s7604_s29 + $0x2f8] sm:$0xff] %v4414_v57  ;;  %v4224_v27 = vpop.f32.mrb[192].mxu0  ;;  %v7951_v29 = vpop.f32.mrb[224].mxu1 }
 0x5a4   : > { %v4225_v5 = vadd.f32 %v4224_v27, %v7914_v44  ;;  %v4226_v7 = vpop.f32.mrb[193].mxu0  ;;  %v7954_v46 = vpop.f32.mrb[225].mxu1 }
 0x5a5   : > { %v4227_v47 = vadd.f32 %v4226_v7, %v7917_v61  ;;  %v4228_v6 = vpop.f32.mrb[194].mxu0  ;;  %v7957_v49 = vpop.f32.mrb[226].mxu1 }
 0x5a6   : > { %v4418_v25 = vadd.f32 %v7879_v36, %v4225_v5  ;;  %v4229_v22 = vadd.f32 %v4228_v6, %v7914_v44  ;;  %v4230_v35 = vpop.f32.mrb[195].mxu0  ;;  %v7961_v23 = vpop.f32.mrb[227].mxu1 }
 0x5a7   : > { %v4420_v16 = vadd.f32 %v7881_v30, %v4227_v47  ;;  %v4231_v18 = vadd.f32 %v4230_v35, %v7917_v61 }
 0x5a8   : > { %4596 = vst [vmem:[%s7604_s29 + $0x320] sm:$0xff] %v4418_v25  ;;  %v4422_v62 = vadd.f32 %v7883_v31, %v4229_v22 }
 0x5a9   : > { %4597 = vst [vmem:[%s7604_s29 + $0x328] sm:$0xff] %v4420_v16  ;;  %v4424_v0 = vadd.f32 %v7885_v11, %v4231_v18 }
 0x5aa   : > { %4602 = vst [vmem:[%s7604_s29 + $0x350] sm:$0xff] %v4422_v62 }
 0x5ab   : > { %4603 = vst [vmem:[%s7604_s29 + $0x358] sm:$0xff] %v4424_v0  ;;  %v4234_v60 = vpop.f32.mrb[196].mxu0  ;;  %v7971_v36 = vpop.f32.mrb[228].mxu1 }
 0x5ac   : > { %v4235_v26 = vadd.f32 %v4234_v60, %v7914_v44  ;;  %v4236_v1 = vpop.f32.mrb[197].mxu0  ;;  %v7974_v30 = vpop.f32.mrb[229].mxu1 }
 0x5ad   : > { %v4237_v53 = vadd.f32 %v4236_v1, %v7917_v61  ;;  %v4238_v31 = vpop.f32.mrb[198].mxu0  ;;  %v7977_v37 = vpop.f32.mrb[230].mxu1 }
 0x5ae   : > { %v4428_v11 = vadd.f32 %v7887_v12, %v4235_v26  ;;  %v4239_v40 = vadd.f32 %v4238_v31, %v7914_v44  ;;  %v4240_v20 = vpop.f32.mrb[199].mxu0  ;;  %v7981_v3 = vpop.f32.mrb[231].mxu1 }
 0x5af   : > { %v4430_v54 = vadd.f32 %v7889_v43, %v4237_v53  ;;  %v4241_v17 = vadd.f32 %v4240_v20, %v7917_v61 }
 0x5b0   : > { %4608 = vst [vmem:[%s7604_s29 + $0x380] sm:$0xff] %v4428_v11  ;;  %v4432_v9 = vadd.f32 %v7891_v39, %v4239_v40 }
 0x5b1   : > { %4609 = vst [vmem:[%s7604_s29 + $0x388] sm:$0xff] %v4430_v54  ;;  %v4434_v13 = vadd.f32 %v7893_v45, %v4241_v17 }
 0x5b2   : > { %4614 = vst [vmem:[%s7604_s29 + $0x3b0] sm:$0xff] %v4432_v9 }
 0x5b3   : > { %4615 = vst [vmem:[%s7604_s29 + $0x3b8] sm:$0xff] %v4434_v13  ;;  %v4244_v12 = vpop.f32.mrb[200].mxu0 }
 0x5b4   : > { %v4245_v55 = vadd.f32 %v4244_v12, %v7914_v44  ;;  %v4246_v34 = vpop.f32.mrb[201].mxu0 }
 0x5b5   : > { %v4247_v43 = vadd.f32 %v4246_v34, %v7917_v61  ;;  %v4248_v56 = vpop.f32.mrb[202].mxu0 }
 0x5b6   : > { %v4438_v4 = vadd.f32 %v7895_v42, %v4245_v55  ;;  %v4249_v28 = vadd.f32 %v4248_v56, %v7914_v44  ;;  %v4250_v39 = vpop.f32.mrb[203].mxu0 }
 0x5b7   : > { %v4440_v21 = vadd.f32 %v7897_v33, %v4247_v43  ;;  %v4251_v45 = vadd.f32 %v4250_v39, %v7917_v61 }
 0x5b8   : > { %4620 = vst [vmem:[%s7604_s29 + $0x3e0] sm:$0xff] %v4438_v4  ;;  %v4442_v2 = vadd.f32 %v7899_v41, %v4249_v28 }
 0x5b9   : > { %4621 = vst [vmem:[%s7604_s29 + $0x3e8] sm:$0xff] %v4440_v21  ;;  %v4444_v48 = vadd.f32 %v7901_v51, %v4251_v45 }
 0x5ba   : > { %4626 = vst [vmem:[%s7604_s29 + $0x410] sm:$0xff] %v4442_v2 }
 0x5bb   : > { %4627 = vst [vmem:[%s7604_s29 + $0x418] sm:$0xff] %v4444_v48  ;;  %v4254_v42 = vpop.f32.mrb[204].mxu0 }
 0x5bc   : > { %v4255_v24 = vadd.f32 %v4254_v42, %v7914_v44  ;;  %v4256_v57 = vpop.f32.mrb[205].mxu0 }
 0x5bd   : > { %v4257_v33 = vadd.f32 %v4256_v57, %v7917_v61  ;;  %v4258_v27 = vpop.f32.mrb[206].mxu0 }
 0x5be   : > { %v4448_v5 = vadd.f32 %v7903_v50, %v4255_v24  ;;  %v4259_v7 = vadd.f32 %v4258_v27, %v7914_v44  ;;  %v4260_v41 = vpop.f32.mrb[207].mxu0 }
 0x5bf   : > { %v4450_v47 = vadd.f32 %v7906_v63, %v4257_v33  ;;  %v4261_v51 = vadd.f32 %v4260_v41, %v7917_v61 }
 0x5c0   : > { %4632 = vst [vmem:[%s7604_s29 + $0x440] sm:$0xff] %v4448_v5  ;;  %v4452_v6 = vadd.f32 %v7909_v10, %v4259_v7 }
 0x5c1   : > { %4633 = vst [vmem:[%s7604_s29 + $0x448] sm:$0xff] %v4450_v47  ;;  %v4454_v25 = vadd.f32 %v7911_v15, %v4261_v51 }
 0x5c2   : > { %4638 = vst [vmem:[%s7604_s29 + $0x470] sm:$0xff] %v4452_v6 }
 0x5c3   : > { %4639 = vst [vmem:[%s7604_s29 + $0x478] sm:$0xff] %v4454_v25  ;;  %v4264_v50 = vpop.f32.mrb[208].mxu0 }
 0x5c4   : > { %v4265_v22 = vadd.f32 %v4264_v50, %v7914_v44  ;;  %v4266_v35 = vpop.f32.mrb[209].mxu0 }
 0x5c5   : > { %v4267_v63 = vadd.f32 %v4266_v35, %v7917_v61  ;;  %v4268_v16 = vpop.f32.mrb[210].mxu0 }
 0x5c6   : > { %v4458_v18 = vadd.f32 %v7919_v19, %v4265_v22  ;;  %v4269_v62 = vadd.f32 %v4268_v16, %v7914_v44  ;;  %v4270_v10 = vpop.f32.mrb[211].mxu0 }
 0x5c7   : > { %v4460_v0 = vadd.f32 %v7922_v32, %v4267_v63  ;;  %v4271_v15 = vadd.f32 %v4270_v10, %v7917_v61 }
 0x5c8   : > { %4644 = vst [vmem:[%s7604_s29 + $0x4a0] sm:$0xff] %v4458_v18  ;;  %v4462_v60 = vadd.f32 %v7925_v52, %v4269_v62 }
 0x5c9   : > { %4645 = vst [vmem:[%s7604_s29 + $0x4a8] sm:$0xff] %v4460_v0  ;;  %v4464_v26 = vadd.f32 %v7928_v58, %v4271_v15 }
 0x5ca   : > { %4650 = vst [vmem:[%s7604_s29 + $0x4d0] sm:$0xff] %v4462_v60 }
 0x5cb   : > { %4651 = vst [vmem:[%s7604_s29 + $0x4d8] sm:$0xff] %v4464_v26  ;;  %v4274_v19 = vpop.f32.mrb[212].mxu0 }
 0x5cc   : > { %v4275_v1 = vadd.f32 %v4274_v19, %v7914_v44  ;;  %v4276_v53 = vpop.f32.mrb[213].mxu0 }
 0x5cd   : > { %v4277_v32 = vadd.f32 %v4276_v53, %v7917_v61  ;;  %v4278_v31 = vpop.f32.mrb[214].mxu0 }
 0x5ce   : > { %v4468_v11 = vadd.f32 %v7935_v59, %v4275_v1  ;;  %v4279_v40 = vadd.f32 %v4278_v31, %v7914_v44  ;;  %v4280_v52 = vpop.f32.mrb[215].mxu0 }
 0x5cf   : > { %v4470_v20 = vadd.f32 %v7938_v14, %v4277_v32  ;;  %v4281_v58 = vadd.f32 %v4280_v52, %v7917_v61 }
 0x5d0   : > { %4656 = vst [vmem:[%s7604_s29 + $0x500] sm:$0xff] %v4468_v11  ;;  %v4472_v54 = vadd.f32 %v7941_v38, %v4279_v40 }
 0x5d1   : > { %4657 = vst [vmem:[%s7604_s29 + $0x508] sm:$0xff] %v4470_v20  ;;  %v4474_v17 = vadd.f32 %v7944_v8, %v4281_v58 }
 0x5d2   : > { %4662 = vst [vmem:[%s7604_s29 + $0x530] sm:$0xff] %v4472_v54 }
 0x5d3   : > { %4663 = vst [vmem:[%s7604_s29 + $0x538] sm:$0xff] %v4474_v17  ;;  %v4284_v59 = vpop.f32.mrb[216].mxu0 }
 0x5d4   : > { %v4285_v9 = vadd.f32 %v4284_v59, %v7914_v44  ;;  %v4286_v13 = vpop.f32.mrb[217].mxu0 }
 0x5d5   : > { %v4287_v14 = vadd.f32 %v4286_v13, %v7917_v61  ;;  %v4288_v12 = vpop.f32.mrb[218].mxu0 }
 0x5d6   : > { %v4478_v55 = vadd.f32 %v7951_v29, %v4285_v9  ;;  %v4289_v34 = vadd.f32 %v4288_v12, %v7914_v44  ;;  %v4290_v38 = vpop.f32.mrb[219].mxu0 }
 0x5d7   : > { %v4480_v43 = vadd.f32 %v7954_v46, %v4287_v14  ;;  %v4291_v8 = vadd.f32 %v4290_v38, %v7917_v61 }
 0x5d8   : > { %4668 = vst [vmem:[%s7604_s29 + $0x560] sm:$0xff] %v4478_v55  ;;  %v4482_v56 = vadd.f32 %v7957_v49, %v4289_v34 }
 0x5d9   : > { %4669 = vst [vmem:[%s7604_s29 + $0x568] sm:$0xff] %v4480_v43  ;;  %v4484_v4 = vadd.f32 %v7961_v23, %v4291_v8 }
 0x5da   : > { %4674 = vst [vmem:[%s7604_s29 + $0x590] sm:$0xff] %v4482_v56 }
 0x5db   : > { %4675 = vst [vmem:[%s7604_s29 + $0x598] sm:$0xff] %v4484_v4  ;;  %v4294_v29 = vpop.f32.mrb[220].mxu0 }
 0x5dc   : > { %v4295_v28 = vadd.f32 %v4294_v29, %v7914_v44  ;;  %v4296_v39 = vpop.f32.mrb[221].mxu0 }
 0x5dd   : > { %v4297_v46 = vadd.f32 %v4296_v39, %v7917_v61  ;;  %v4298_v21 = vpop.f32.mrb[222].mxu0 }
 0x5de   : > { %v4488_v45 = vadd.f32 %v7971_v36, %v4295_v28  ;;  %v4299_v49 = vadd.f32 %v4298_v21, %v7914_v44  ;;  %v4300_v2 = vpop.f32.mrb[223].mxu0 }
 0x5df   : > { %v4490_v48 = vadd.f32 %v7974_v30, %v4297_v46  ;;  %v4301_v23 = vadd.f32 %v4300_v2, %v7917_v61 }
 0x5e0   : > { %4680 = vst [vmem:[%s7604_s29 + $0x5c0] sm:$0xff] %v4488_v45  ;;  %v4492_v42 = vadd.f32 %v7977_v37, %v4299_v49 }
 0x5e1   : > { %4681 = vst [vmem:[%s7604_s29 + $0x5c8] sm:$0xff] %v4490_v48  ;;  %v4494_v24 = vadd.f32 %v7981_v3, %v4301_v23 }
 0x5e2   : > { %4686 = vst [vmem:[%s7604_s29 + $0x5f0] sm:$0xff] %v4492_v42 }
 0x5e3   : > { %4687 = vst [vmem:[%s7604_s29 + $0x5f8] sm:$0xff] %v4494_v24  ;;  %v4337_v36 = vpop.f32.mrb[160].mxu0 }
 0x5e4   : > { %v5376_v57 = vadd.f32 %v4337_v36, %v7914_v44  ;;  %v4339_v33 = vpop.f32.mrb[161].mxu0 }
 0x5e5   : > { %v5377_v30 = vadd.f32 %v4339_v33, %v7917_v61  ;;  %v4341_v27 = vpop.f32.mrb[162].mxu0 }
 0x5e6   : > { %4500 = vst [vmem:[%s7604_s29 + $0x20] sm:$0xff] %v5376_v57  ;;  %v5378_v5 = vadd.f32 %v4341_v27, %v7914_v44  ;;  %v4343_v37 = vpop.f32.mrb[163].mxu0 }
 0x5e7   : > { %4501 = vst [vmem:[%s7604_s29 + $0x28] sm:$0xff] %v5377_v30  ;;  %v5379_v3 = vadd.f32 %v4343_v37, %v7917_v61 }
 0x5e8   : > { %4506 = vst [vmem:[%s7604_s29 + $0x50] sm:$0xff] %v5378_v5 }
 0x5e9   : > { %4507 = vst [vmem:[%s7604_s29 + $0x58] sm:$0xff] %v5379_v3 }
 0x5eb   : > { %v4347_v7 = vpop.f32.mrb[164].mxu0 }
 0x5ec   : > { %v5380_v41 = vadd.f32 %v4347_v7, %v7914_v44  ;;  %v4349_v47 = vpop.f32.mrb[165].mxu0 }
 0x5ed   : > { %v5381_v51 = vadd.f32 %v4349_v47, %v7917_v61  ;;  %v4351_v6 = vpop.f32.mrb[166].mxu0 }
 0x5ee   : > { %4512 = vst [vmem:[%s7604_s29 + $0x80] sm:$0xff] %v5380_v41  ;;  %v5382_v25 = vadd.f32 %v4351_v6, %v7914_v44  ;;  %v4353_v50 = vpop.f32.mrb[167].mxu0 }
 0x5ef   : > { %4513 = vst [vmem:[%s7604_s29 + $0x88] sm:$0xff] %v5381_v51  ;;  %v5383_v22 = vadd.f32 %v4353_v50, %v7917_v61 }
 0x5f0   : > { %4518 = vst [vmem:[%s7604_s29 + $0xb0] sm:$0xff] %v5382_v25 }
 0x5f1   : > { %4519 = vst [vmem:[%s7604_s29 + $0xb8] sm:$0xff] %v5383_v22 }
 0x5f3   : > { %v4357_v35 = vpop.f32.mrb[168].mxu0 }
 0x5f4   : > { %v5384_v63 = vadd.f32 %v4357_v35, %v7914_v44  ;;  %v4359_v16 = vpop.f32.mrb[169].mxu0 }
 0x5f5   : > { %v5385_v18 = vadd.f32 %v4359_v16, %v7917_v61  ;;  %v4361_v62 = vpop.f32.mrb[170].mxu0 }
 0x5f6   : > { %4524 = vst [vmem:[%s7604_s29 + $0xe0] sm:$0xff] %v5384_v63  ;;  %v5386_v10 = vadd.f32 %v4361_v62, %v7914_v44  ;;  %v4363_v0 = vpop.f32.mrb[171].mxu0 }
 0x5f7   : > { %4525 = vst [vmem:[%s7604_s29 + $0xe8] sm:$0xff] %v5385_v18  ;;  %v5387_v15 = vadd.f32 %v4363_v0, %v7917_v61 }
 0x5f8   : > { %4530 = vst [vmem:[%s7604_s29 + $0x110] sm:$0xff] %v5386_v10 }
 0x5f9   : > { %4531 = vst [vmem:[%s7604_s29 + $0x118] sm:$0xff] %v5387_v15 }
 0x5fb   : > { %v4367_v60 = vpop.f32.mrb[172].mxu0 }
 0x5fc   : > { %v5388_v26 = vadd.f32 %v4367_v60, %v7914_v44  ;;  %v4369_v19 = vpop.f32.mrb[173].mxu0 }
 0x5fd   : > { %v5389_v1 = vadd.f32 %v4369_v19, %v7917_v61  ;;  %v4371_v53 = vpop.f32.mrb[174].mxu0 }
 0x5fe   : > { %4536 = vst [vmem:[%s7604_s29 + $0x140] sm:$0xff] %v5388_v26  ;;  %v5390_v32 = vadd.f32 %v4371_v53, %v7914_v44  ;;  %v4373_v31 = vpop.f32.mrb[175].mxu0 }
 0x5ff   : > { %4537 = vst [vmem:[%s7604_s29 + $0x148] sm:$0xff] %v5389_v1  ;;  %v5391_v11 = vadd.f32 %v4373_v31, %v7917_v61 }
 0x600   : > { %4542 = vst [vmem:[%s7604_s29 + $0x170] sm:$0xff] %v5390_v32 }
 0x601   : > { %4543 = vst [vmem:[%s7604_s29 + $0x178] sm:$0xff] %v5391_v11 }
 0x603   : > { %v4377_v40 = vpop.f32.mrb[176].mxu0 }
 0x604   : > { %v5392_v52 = vadd.f32 %v4377_v40, %v7914_v44  ;;  %v4379_v20 = vpop.f32.mrb[177].mxu0 }
 0x605   : > { %v5393_v58 = vadd.f32 %v4379_v20, %v7917_v61  ;;  %v4381_v54 = vpop.f32.mrb[178].mxu0 }
 0x606   : > { %4548 = vst [vmem:[%s7604_s29 + $0x1a0] sm:$0xff] %v5392_v52  ;;  %v5394_v17 = vadd.f32 %v4381_v54, %v7914_v44  ;;  %v4383_v59 = vpop.f32.mrb[179].mxu0 }
 0x607   : > { %4549 = vst [vmem:[%s7604_s29 + $0x1a8] sm:$0xff] %v5393_v58  ;;  %v5395_v9 = vadd.f32 %v4383_v59, %v7917_v61 }
 0x608   : > { %4554 = vst [vmem:[%s7604_s29 + $0x1d0] sm:$0xff] %v5394_v17 }
 0x609   : > { %4555 = vst [vmem:[%s7604_s29 + $0x1d8] sm:$0xff] %v5395_v9 }
 0x60b   : > { %v4387_v13 = vpop.f32.mrb[180].mxu0 }
 0x60c   : > { %v5396_v14 = vadd.f32 %v4387_v13, %v7914_v44  ;;  %v4389_v12 = vpop.f32.mrb[181].mxu0 }
 0x60d   : > { %v5397_v55 = vadd.f32 %v4389_v12, %v7917_v61  ;;  %v4391_v34 = vpop.f32.mrb[182].mxu0 }
 0x60e   : > { %4560 = vst [vmem:[%s7604_s29 + $0x200] sm:$0xff] %v5396_v14  ;;  %v5398_v38 = vadd.f32 %v4391_v34, %v7914_v44  ;;  %v4393_v43 = vpop.f32.mrb[183].mxu0 }
 0x60f   : > { %4561 = vst [vmem:[%s7604_s29 + $0x208] sm:$0xff] %v5397_v55  ;;  %v5399_v8 = vadd.f32 %v4393_v43, %v7917_v61 }
 0x610   : > { %4566 = vst [vmem:[%s7604_s29 + $0x230] sm:$0xff] %v5398_v38 }
 0x611   : > { %4567 = vst [vmem:[%s7604_s29 + $0x238] sm:$0xff] %v5399_v8 }
 0x612   : > { %6412 = shalt.err (!%p6409_p9)
}
 0x613   : > { %s6413_s21 = scalar_lea.hbm %s8112_s16, 24576  ;;  %s6417_s2 = scalar_lea.hbm %s8172_s9, 49152 }
 0x614   : > { %p6414_p12 = scmp.ne.s32.totalorder %s8112_s16, %s6413_s21  ;;  %p6418_p3 = scmp.lt.u32.totalorder %s8112_s16, %s8172_s9 }
 0x615   : > { %p6419_p4 = scmp.lt.u32.totalorder %s6417_s2, %s6413_s21  ;;  %p6421_p8 = scmp.lt.u32.totalorder %s6413_s21, %s8112_s16 }
 0x616   : > { %p6415_p10 = pnand %p6414_p12, %p8321_p11 }
 0x617   : > { %p6420_p7 = por %p6419_p4, %p6418_p3 }
 0x618   : > { %p6416_p2 = pneg %p6415_p10 }
 0x619   : > { %p6422_p13 = por %p6421_p8, %p6420_p7 }
 0x61b   : > { %p6423_p1 = pnand %p6422_p13, %p6416_p2 }
 0x61d   : > { %6426 = shalt.err (!%p6423_p1)
}
 0x61e   : > { %s6501_s27 = smov 768   ;;  %s6502_s29 = smov 48  }
 0x61f   : > { %5666 = dma.vmem_to_hbm [thread:$0]  (%p8321_p11), %s8114_s25, 24576, %s8112_s16, %s8122_s13, %s6501_s27, %s6501_s27, %s6502_s29  }
 0x620 PF: > { %p5713_p0 = scmp.ge.s32.totalorder %s6481_s12, 2  ;;  %s4718_s14 = sand.u32 1, %s6469_s30  }
 0x621   : > { %p8322_p6 = scmp.ne.s32.totalorder %s8226_s20, 0  ;;  %s4719_s28 = scalar_lea.sflag [#allocation4], %s4718_s14 }
 0x623   : > { %p5694_p5 = pnand %p5713_p0, %p8322_p6 }
 0x625   : > { %6464 = dma.done.wait (!%p5694_p5), %s4719_s28, 24576  }
 0x626   : > { %6466 = vsyncadd (!%p5694_p5), %s4719_s28, 4294942720  ;;  %s8323_s12 = sld [smem:[#allocation24_spill]]  ;;  %s8324_s17 = sld [smem:[#allocation23_spill]] }
 0x627   : > { %s8325_s11 = sld [smem:[#allocation25_spill]]  ;;  %s8326_s30 = smov %s6473_s10 }
 0x62c   : > { %p24_p9 = scmp.ge.s32.totalorder %s8323_s12, 4   ;;  %s8327_s10 = smov %s8324_s17 }
 0x62e   :  { %26 = sbr.rel (!%p24_p9) target bundleno = 11 (0xb), region = 124 }
 0x635   :  { %4724 = vsyncpa [#allocation3], 1 }
 0x636   :  { %4726 = vsyncpa [#allocation3 + $0x1], 1 }
 0x637   :  { %4727 = vsyncpa [#allocation6], 1 }
 0x638   :  { %4728 = vsyncpa [#allocation9], 1 }
 0x639   :  { %4729 = vsyncpa [#allocation12], 1 }
 0x63a   :  { %4730 = vsyncpa [#allocation15], 1 }
 0x63b   :  { %4731 = vsyncpa [#allocation4], 1 }
 0x63c   :  { %4733 = vsyncpa [#allocation4 + $0x1], 1 }

</bundles_post_ra>
